<compile_context>
chip_gen: v7x
topology: tpu7x:2x2x1
jax: 0.10.0
libtpu: 0.0.40
codegen_flags: <defaults>
</compile_context>

<pallas_src>
import functools

import jax
import jax.numpy as jnp
from jax.experimental import pallas as pl
from jax.experimental.pallas import tpu as pltpu


# ---------------------------------------------------------------------------
# Chip detection (only used to decide whether M tiles should be split in two
# for v7x's 2 TensorCores; single-TC chips get a single grid step per block).
# ---------------------------------------------------------------------------
def _detect_v7x():
    try:
        return "v7" in jax.devices()[0].device_kind.lower()
    except Exception:
        return False


_IS_V7X = _detect_v7x()


# ---------------------------------------------------------------------------
# Pallas kernels
# ---------------------------------------------------------------------------
def _conv_block_kernel(a_ref, w_ref, bs_ref, o_ref):
    """Fused im2col-GEMM conv block, lane-dense N (BN scale pre-folded):
       out = LeakyReLU_0.2(A @ W' + b') + shift, stored bf16."""
    acc = jnp.dot(a_ref[...], w_ref[...], preferred_element_type=jnp.float32)
    acc = acc + bs_ref[0:1, :]              # conv bias * bn scale (folded)
    acc = jnp.maximum(acc, 0.2 * acc)       # LeakyReLU(0.2)
    # TODO(synk): Dropout2d(0.25) is identity in eval mode, so it is omitted.
    o_ref[...] = (acc + bs_ref[1:2, :]).astype(o_ref.dtype)   # BN eval shift


def _tail_kernel(p5_ref, w5_ref, bs5_ref, w6_ref, bs6_ref, hw_ref, hb_ref,
                 out_ref, a5_ref, *, n_classes):
    """Fused blocks 5 + 6 + both classifier heads (VMEM-resident activations).

    p5_ref : (4*B, 9*128) bf16 block-5 im2col patches, rows ordered (spatial, b)
    w6_ref : (4, 256, 512)  per-input-pixel block-6 weight (BN scale folded)
    hw_ref : (512, 128)     fused head weight, lane-padded:
                            col 0 -> sigmoid, cols 1..n_classes -> softmax
    """
    batch = out_ref.shape[0]

    # ---- block 5 -----------------------------------------------------------
    a5 = jnp.dot(p5_ref[...], w5_ref[...], preferred_element_type=jnp.float32)
    a5 = a5 + bs5_ref[0:1, :]
    a5 = jnp.maximum(a5, 0.2 * a5)
    a5_ref[...] = (a5 + bs5_ref[1:2, :]).astype(jnp.bfloat16)  # (4B, 256)

    # ---- block 6 -----------------------------------------------------------
    # 2x2 input + pad=1 + stride=2 + k=3: the single output pixel sees exactly
    # the four real input pixels (taps (1,1),(1,2),(2,1),(2,2)); the other five
    # taps land on zero padding.  So block 6 is four small GEMMs, no im2col.
    acc6 = jnp.zeros((batch, w6_ref.shape[2]), jnp.float32)
    for s in range(4):
        lhs = a5_ref[s * batch:(s + 1) * batch, :]             # (B, 256)
        acc6 = acc6 + jnp.dot(lhs, w6_ref[s],
                              preferred_element_type=jnp.float32)
    a6 = acc6 + bs6_ref[0:1, :]
    a6 = jnp.maximum(a6, 0.2 * a6)
    a6 = (a6 + bs6_ref[1:2, :]).astype(jnp.bfloat16)           # (B, 512) feats

    # ---- heads (single lane-padded GEMM, exact sigmoid / softmax) ----------
    r = jnp.dot(a6, hw_ref[...], preferred_element_type=jnp.float32)
    r = r + hb_ref[...]
    val = 1.0 / (1.0 + jnp.exp(-r[:, 0:1]))                    # sigmoid
    lc = r[:, 1:1 + n_classes]
    m = jnp.max(lc, axis=-1, keepdims=True)
    e = jnp.exp(lc - m)
    sm = e / jnp.sum(e, axis=-1, keepdims=True)                # softmax
    pad = jnp.zeros((batch, out_ref.shape[1] - 1 - n_classes), jnp.float32)
    out_ref[...] = jnp.concatenate([val, sm, pad], axis=-1)


# ---------------------------------------------------------------------------
# Wrappers
# ---------------------------------------------------------------------------
def conv_block(x_nhwc, blk):
    """Conv2d(3x3, s=2, p=1) + LeakyReLU(0.2) + BN affine (eval), lane-dense GEMM.

    blk["w"]  : (g*9*Cin, g*Co) bf16 block-diagonal weight (BN scale folded)
    blk["bs"] : (2, g*Co) f32  row0 = folded bias, row1 = BN shift
    """
    B, H, W, C = x_nhwc.shape
    Ho, Wo = H // 2, W // 2
    K = 9 * C
    Kg, N = blk["w"].shape
    g = Kg // K                      # rows grouped per GEMM row (128//Co if Co<128)
    Co = N // g
    M = B * Ho * Wo
    assert Kg == g * K and N == g * Co and M % g == 0

    # im2col (XLA glue): 9 strided taps, K ordered (kh, kw, cin); then group g
    # consecutive patch rows into one GEMM row (contiguous reshape).
    xp = jnp.pad(x_nhwc, ((0, 0), (1, 1), (1, 1), (0, 0)))
    cols = [xp[:, kh:kh + 2 * Ho:2, kw:kw + 2 * Wo:2, :]
            for kh in range(3) for kw in range(3)]
    a = (jnp.concatenate(cols, axis=-1)
         .reshape(M // g, Kg)
         .astype(jnp.bfloat16))

    Mg = M // g
    # single grid step on 1-TC chips; split M across v7x's two TensorCores
    tm = Mg // 2 if (_IS_V7X and Mg >= 64) else Mg
    grid = (Mg // tm,)

    out = pl.pallas_call(
        _conv_block_kernel,
        out_shape=jax.ShapeDtypeStruct((Mg, N), jnp.bfloat16),
        grid=grid,
        in_specs=[
            pl.BlockSpec((tm, Kg), lambda i: (i, 0)),
            pl.BlockSpec((Kg, N), lambda i: (0, 0)),
            pl.BlockSpec((2, N), lambda i: (0, 0)),
        ],
        out_specs=pl.BlockSpec((tm, N), lambda i: (i, 0)),
        compiler_params=pltpu.CompilerParams(
            dimension_semantics=("parallel",),
            vmem_limit_bytes=32 * 1024 * 1024,
        ),
    )(a, blk["w"], blk["bs"])
    # (Mg, g*Co) row-major == (M, Co) row-major == NHWC row-major
    return out.reshape(B, Ho, Wo, Co)


def tail_blocks_and_heads(x4_nhwc, prepped, n_classes):
    """Fused blocks 5 + 6 + heads.  Requires block-5 input spatial 4x4 and
    block-6 output spatial 1x1 (img_size == 64)."""
    B, H, W, C = x4_nhwc.shape
    assert (H, W) == (4, 4), "fused tail assumes img_size == 64"

    # block-5 im2col in the wrapper; rows ordered spatial-major (s, b) so the
    # kernel takes per-pixel contiguous row slices for block 6.
    xp = jnp.pad(x4_nhwc, ((0, 0), (1, 1), (1, 1), (0, 0)))
    cols = [xp[:, kh:kh + 4:2, kw:kw + 4:2, :]
            for kh in range(3) for kw in range(3)]
    patches = jnp.concatenate(cols, axis=-1)                   # (B, 2, 2, 9C)
    p5 = (jnp.transpose(patches, (1, 2, 0, 3))
          .reshape(4 * B, 9 * C)
          .astype(jnp.bfloat16))

    w5, bs5 = prepped["w5"], prepped["bs5"]
    w6, bs6 = prepped["w6"], prepped["bs6"]
    hw, hb = prepped["head_w"], prepped["head_b"]

    out = pl.pallas_call(
        functools.partial(_tail_kernel, n_classes=n_classes),
        out_shape=jax.ShapeDtypeStruct((B, 128), jnp.float32),
        grid=(1,),
        in_specs=[
            pl.BlockSpec(p5.shape, lambda i: (0, 0)),
            pl.BlockSpec(w5.shape, lambda i: (0, 0)),
            pl.BlockSpec(bs5.shape, lambda i: (0, 0)),
            pl.BlockSpec(w6.shape, lambda i: (0, 0, 0)),
            pl.BlockSpec(bs6.shape, lambda i: (0, 0)),
            pl.BlockSpec(hw.shape, lambda i: (0, 0)),
            pl.BlockSpec(hb.shape, lambda i: (0, 0)),
        ],
        out_specs=pl.BlockSpec((B, 128), lambda i: (0, 0)),
        scratch_shapes=[pltpu.VMEM((4 * B, w5.shape[1]), jnp.bfloat16)],
        compiler_params=pltpu.CompilerParams(
            dimension_semantics=("arbitrary",),
            vmem_limit_bytes=32 * 1024 * 1024,
        ),
    )(p5, w5, bs5, w6, bs6, hw, hb)

    validity = out[:, 0:1]
    label = out[:, 1:1 + n_classes]
    return validity, label


def prepare_params(params):
    """One-time prep: fold BN eval scale into conv weights/bias, pre-transpose
    to GEMM layout, build block-diagonal lane-dense weights for Co<128 blocks,
    build the fused-tail (block 5/6 + heads) weights, cast GEMM operands to
    bf16.  Must be called outside jit (uses concrete-value asserts)."""

    def fold(blk):
        co = blk["w"].shape[0]
        # PyTorch weight (Co, Cin, kh, kw) -> (kh, kw, Cin, Co) -> (9*Cin, Co)
        w_mat = jnp.transpose(blk["w"], (2, 3, 1, 0)).reshape(-1, co)
        scale = blk["scale"]   # gamma / sqrt(var + eps)
        assert bool(jnp.all(scale > 0)), \
            "BN scale must be > 0 to fold through LeakyReLU"
        return w_mat * scale[None, :], blk["b"] * scale, blk["shift"], co

    raw = params["blocks"]
    blocks = []
    for i in range(4):                                   # blocks 1-4 standalone
        w_f, b_f, shift, co = fold(raw[i])
        K = w_f.shape[0]
        g = max(1, 128 // co) if co < 128 else 1         # lane-dense grouping
        if g > 1:                                        # block-diagonal weight
            wg = jnp.zeros((g * K, g * co), jnp.float32)
            for j in range(g):
                wg = wg.at[j * K:(j + 1) * K, j * co:(j + 1) * co].set(w_f)
        else:
            wg = w_f
        bs = jnp.stack([jnp.tile(b_f, g), jnp.tile(shift, g)], axis=0)
        blocks.append(dict(w=wg.astype(jnp.bfloat16), bs=bs.astype(jnp.float32)))

    # ----- fused tail: block 5 -----
    w5, b5, s5, co5 = fold(raw[4])
    bs5 = jnp.stack([b5, s5], axis=0).astype(jnp.float32)

    # ----- fused tail: block 6 (2x2 input -> only the 4 interior taps) -----
    blk6 = raw[5]
    co6 = blk6["w"].shape[0]
    scale6, shift6 = blk6["scale"], blk6["shift"]
    assert bool(jnp.all(scale6 > 0))
    w6t = jnp.transpose(blk6["w"], (2, 3, 1, 0))         # (3, 3, Cin, Co)
    # input pixel (py, px) <-> tap (py+1, px+1); leading index s = py*2 + px
    w6_eff = (w6t[1:3, 1:3, :, :].reshape(4, co5, co6)
              * scale6[None, None, :])
    bs6 = jnp.stack([blk6["b"] * scale6, shift6], axis=0).astype(jnp.float32)

    # ----- heads: fused + lane-padded to 128 columns -----
    w_cat = jnp.concatenate([params["adv_w"], params["aux_w"]], axis=1)
    b_cat = jnp.concatenate([params["adv_b"], params["aux_b"]], axis=0)
    assert w_cat.shape[0] == co6, "heads fusion assumes ds_size == 1"
    npad = 128
    head_w = jnp.pad(w_cat, ((0, 0), (0, npad - w_cat.shape[1]))).astype(jnp.bfloat16)
    head_b = (jnp.pad(b_cat, (0, npad - b_cat.shape[0]))
              .astype(jnp.float32).reshape(1, npad))

    return dict(blocks=blocks,
                w5=w5.astype(jnp.bfloat16), bs5=bs5,
                w6=w6_eff.astype(jnp.bfloat16), bs6=bs6,
                head_w=head_w, head_b=head_b)


def discriminator_aux_gan(img_nchw, prepped, *, n_classes):
    """Forward pass. img_nchw: (B, C, H, W) float32 (PyTorch convention)."""
    x = jnp.transpose(img_nchw, (0, 2, 3, 1))            # NCHW -> NHWC
    for blk in prepped["blocks"]:                        # blocks 1-4
        x = conv_block(x, blk)
    # blocks 5 + 6 + both heads fused (ds_size == 1, so the NCHW flatten order
    # of PyTorch's out.view(B, -1) is trivially matched).
    return tail_blocks_and_heads(x, prepped, n_classes)


# ---------------------------------------------------------------------------
# Deterministic parameter construction (module-space parameters)
# ---------------------------------------------------------------------------
def init_params(key, img_size=64, channels=3, n_classes=2):
    widths = [channels, 16, 32, 64, 128, 256, 512]
    bn_flags = [False, True, True, True, True, True]
    eps = 0.8  # second positional arg of BatchNorm2d in the reference module
    blocks = []
    for i in range(6):
        cin, cout = widths[i], widths[i + 1]
        key, kw, kb = jax.random.split(key, 3)
        w = 0.02 * jax.random.normal(kw, (cout, cin, 3, 3), jnp.float32)
        b = 0.02 * jax.random.normal(kb, (cout,), jnp.float32)
        if bn_flags[i]:
            # eval-mode BN, default running stats (mean=0, var=1), gamma=1, beta=0
            scale = jnp.full((cout,), 1.0 / jnp.sqrt(1.0 + eps), jnp.float32)
            shift = jnp.zeros((cout,), jnp.float32)
        else:
            scale = jnp.ones((cout,), jnp.float32)
            shift = jnp.zeros((cout,), jnp.float32)
        blocks.append(dict(w=w, b=b, scale=scale, shift=shift))

    ds_size = img_size // 2 ** 6
    feat_dim = 512 * ds_size ** 2
    key, k1, k2, k3, k4 = jax.random.split(key, 5)
    return dict(
        blocks=blocks,
        adv_w=0.02 * jax.random.normal(k1, (feat_dim, 1), jnp.float32),
        adv_b=0.02 * jax.random.normal(k2, (1,), jnp.float32),
        aux_w=0.02 * jax.random.normal(k3, (feat_dim, n_classes), jnp.float32),
        aux_b=0.02 * jax.random.normal(k4, (n_classes,), jnp.float32),
    )


# ---------------------------------------------------------------------------
if __name__ == "__main__":
    key = jax.random.PRNGKey(0)
    img_size, channels, n_classes, batch = 64, 3, 2, 2

    key, kimg = jax.random.split(key)
    img = jax.random.normal(kimg, (batch, channels, img_size, img_size), jnp.float32)

    params = init_params(key, img_size=img_size, channels=channels,
                         n_classes=n_classes)
    prepped = prepare_params(params)

    fwd = jax.jit(discriminator_aux_gan, static_argnames=("n_classes",))
    validity, label = fwd(img, prepped, n_classes=n_classes)
    jax.block_until_ready((validity, label))

    assert validity.shape == (batch, 1)
    assert label.shape == (batch, n_classes)
    assert bool(jnp.all(jnp.isfinite(validity))) and bool(jnp.all(jnp.isfinite(label)))
    assert bool(jnp.all((validity >= 0.0) & (validity <= 1.0)))
    # exact softmax normalization now (no approx reciprocal) -> tight tolerance
    assert bool(jnp.allclose(jnp.sum(label, axis=-1), 1.0, atol=1e-3))

    print("KERNEL_OK")
</pallas_src>

<mosaic_0001>
module attributes {stable_mosaic.version = 11 : i64} {
  func.func @_conv_block_kernel(%arg0: i32, %arg1: memref<256x216xbf16, #tpu.memory_space<vmem>>, %arg2: memref<216x128xbf16, #tpu.memory_space<vmem>>, %arg3: memref<2x128xf32, #tpu.memory_space<vmem>>, %arg4: memref<256x128xbf16, #tpu.memory_space<vmem>>) attributes {dimension_semantics = [#tpu.dimension_semantics<parallel>], iteration_bounds = array<i64: 1>, scalar_prefetch = 0 : i64, scratch_operands = 0 : i64, tpu.core_type = #tpu.core_type<tc>, window_params = [{transform_indices = @transform_0, window_bounds = array<i64: 256, 216>}, {pipeline_mode = #tpu.pipeline_mode<synchronous>, transform_indices = @transform_1, window_bounds = array<i64: 216, 128>}, {pipeline_mode = #tpu.pipeline_mode<synchronous>, transform_indices = @transform_2, window_bounds = array<i64: 2, 128>}, {transform_indices = @transform_3, window_bounds = array<i64: 256, 128>}]} {
    %c0 = arith.constant 0 : index
    %c0_0 = arith.constant 0 : index
    %0 = vector.load %arg1[%c0, %c0_0] : memref<256x216xbf16, #tpu.memory_space<vmem>>, vector<256x216xbf16>
    %c0_1 = arith.constant 0 : index
    %c0_2 = arith.constant 0 : index
    %1 = vector.load %arg2[%c0_1, %c0_2] : memref<216x128xbf16, #tpu.memory_space<vmem>>, vector<216x128xbf16>
    %cst = arith.constant dense<0.000000e+00> : vector<256x128xf32>
    %2 = tpu.matmul %0, %1, %cst {dimension_numbers = #tpu.dot_dimension_numbers<[1], [0], [0], [1], [0, 0, 1, 1], [], []>} : vector<256x216xbf16>, vector<216x128xbf16>, vector<256x128xf32> -> vector<256x128xf32>
    %c0_3 = arith.constant 0 : index
    %c0_4 = arith.constant 0 : index
    %3 = vector.load %arg3[%c0_3, %c0_4] : memref<2x128xf32, #tpu.memory_space<vmem>>, vector<1x128xf32>
    %4 = vector.broadcast %3 : vector<1x128xf32> to vector<256x128xf32>
    %5 = arith.addf %2, %4 : vector<256x128xf32>
    %cst_5 = arith.constant 2.000000e-01 : f32
    %6 = vector.broadcast %cst_5 : f32 to vector<256x128xf32>
    %7 = arith.mulf %6, %5 : vector<256x128xf32>
    %8 = arith.maximumf %5, %7 : vector<256x128xf32>
    %c1 = arith.constant 1 : index
    %c0_6 = arith.constant 0 : index
    %9 = vector.load %arg3[%c1, %c0_6] : memref<2x128xf32, #tpu.memory_space<vmem>>, vector<1x128xf32>
    %10 = vector.broadcast %9 : vector<1x128xf32> to vector<256x128xf32>
    %11 = arith.addf %8, %10 : vector<256x128xf32>
    %12 = arith.truncf %11 : vector<256x128xf32> to vector<256x128xbf16>
    %c0_7 = arith.constant 0 : index
    %c0_8 = arith.constant 0 : index
    %13 = vector.load %arg4[%c0_7, %c0_8] : memref<256x128xbf16, #tpu.memory_space<vmem>>, vector<256x128xbf16>
    tpu.vector_store %arg4[%c0_7, %c0_8], %12 {strides = array<i32>} : memref<256x128xbf16, #tpu.memory_space<vmem>>, vector<256x128xbf16>,
    return
  }
  func.func @transform_0(%arg0: i32) -> (i32, i32) {
    %c0_i32 = arith.constant 0 : i32
    %c0_i32_0 = arith.constant 0 : i32
    return %arg0, %c0_i32 : i32, i32
  }
  func.func @transform_1(%arg0: i32) -> (i32, i32) {
    %c0_i32 = arith.constant 0 : i32
    %c0_i32_0 = arith.constant 0 : i32
    %c0_i32_1 = arith.constant 0 : i32
    return %c0_i32, %c0_i32_0 : i32, i32
  }
  func.func @transform_2(%arg0: i32) -> (i32, i32) {
    %c0_i32 = arith.constant 0 : i32
    %c0_i32_0 = arith.constant 0 : i32
    %c0_i32_1 = arith.constant 0 : i32
    return %c0_i32, %c0_i32_0 : i32, i32
  }
  func.func @transform_3(%arg0: i32) -> (i32, i32) {
    %c0_i32 = arith.constant 0 : i32
    %c0_i32_0 = arith.constant 0 : i32
    return %arg0, %c0_i32 : i32, i32
  }
}

module attributes {stable_mosaic.version = 11 : i64} {
  func.func @_conv_block_kernel(%arg0: i32, %arg1: memref<128x576xbf16, #tpu.memory_space<vmem>>, %arg2: memref<576x128xbf16, #tpu.memory_space<vmem>>, %arg3: memref<2x128xf32, #tpu.memory_space<vmem>>, %arg4: memref<128x128xbf16, #tpu.memory_space<vmem>>) attributes {dimension_semantics = [#tpu.dimension_semantics<parallel>], iteration_bounds = array<i64: 1>, scalar_prefetch = 0 : i64, scratch_operands = 0 : i64, tpu.core_type = #tpu.core_type<tc>, window_params = [{transform_indices = @transform_0, window_bounds = array<i64: 128, 576>}, {pipeline_mode = #tpu.pipeline_mode<synchronous>, transform_indices = @transform_1, window_bounds = array<i64: 576, 128>}, {pipeline_mode = #tpu.pipeline_mode<synchronous>, transform_indices = @transform_2, window_bounds = array<i64: 2, 128>}, {transform_indices = @transform_3, window_bounds = array<i64: 128, 128>}]} {
    %c0 = arith.constant 0 : index
    %c0_0 = arith.constant 0 : index
    %0 = vector.load %arg1[%c0, %c0_0] : memref<128x576xbf16, #tpu.memory_space<vmem>>, vector<128x576xbf16>
    %c0_1 = arith.constant 0 : index
    %c0_2 = arith.constant 0 : index
    %1 = vector.load %arg2[%c0_1, %c0_2] : memref<576x128xbf16, #tpu.memory_space<vmem>>, vector<576x128xbf16>
    %cst = arith.constant dense<0.000000e+00> : vector<128x128xf32>
    %2 = tpu.matmul %0, %1, %cst {dimension_numbers = #tpu.dot_dimension_numbers<[1], [0], [0], [1], [0, 0, 1, 1], [], []>} : vector<128x576xbf16>, vector<576x128xbf16>, vector<128x128xf32> -> vector<128x128xf32>
    %c0_3 = arith.constant 0 : index
    %c0_4 = arith.constant 0 : index
    %3 = vector.load %arg3[%c0_3, %c0_4] : memref<2x128xf32, #tpu.memory_space<vmem>>, vector<1x128xf32>
    %4 = vector.broadcast %3 : vector<1x128xf32> to vector<128x128xf32>
    %5 = arith.addf %2, %4 : vector<128x128xf32>
    %cst_5 = arith.constant 2.000000e-01 : f32
    %6 = vector.broadcast %cst_5 : f32 to vector<128x128xf32>
    %7 = arith.mulf %6, %5 : vector<128x128xf32>
    %8 = arith.maximumf %5, %7 : vector<128x128xf32>
    %c1 = arith.constant 1 : index
    %c0_6 = arith.constant 0 : index
    %9 = vector.load %arg3[%c1, %c0_6] : memref<2x128xf32, #tpu.memory_space<vmem>>, vector<1x128xf32>
    %10 = vector.broadcast %9 : vector<1x128xf32> to vector<128x128xf32>
    %11 = arith.addf %8, %10 : vector<128x128xf32>
    %12 = arith.truncf %11 : vector<128x128xf32> to vector<128x128xbf16>
    %c0_7 = arith.constant 0 : index
    %c0_8 = arith.constant 0 : index
    %13 = vector.load %arg4[%c0_7, %c0_8] : memref<128x128xbf16, #tpu.memory_space<vmem>>, vector<128x128xbf16>
    tpu.vector_store %arg4[%c0_7, %c0_8], %12 {strides = array<i32>} : memref<128x128xbf16, #tpu.memory_space<vmem>>, vector<128x128xbf16>,
    return
  }
  func.func @transform_0(%arg0: i32) -> (i32, i32) {
    %c0_i32 = arith.constant 0 : i32
    %c0_i32_0 = arith.constant 0 : i32
    return %arg0, %c0_i32 : i32, i32
  }
  func.func @transform_1(%arg0: i32) -> (i32, i32) {
    %c0_i32 = arith.constant 0 : i32
    %c0_i32_0 = arith.constant 0 : i32
    %c0_i32_1 = arith.constant 0 : i32
    return %c0_i32, %c0_i32_0 : i32, i32
  }
  func.func @transform_2(%arg0: i32) -> (i32, i32) {
    %c0_i32 = arith.constant 0 : i32
    %c0_i32_0 = arith.constant 0 : i32
    %c0_i32_1 = arith.constant 0 : i32
    return %c0_i32, %c0_i32_0 : i32, i32
  }
  func.func @transform_3(%arg0: i32) -> (i32, i32) {
    %c0_i32 = arith.constant 0 : i32
    %c0_i32_0 = arith.constant 0 : i32
    return %arg0, %c0_i32 : i32, i32
  }
}

module attributes {stable_mosaic.version = 11 : i64} {
  func.func @_conv_block_kernel(%arg0: i32, %arg1: memref<64x576xbf16, #tpu.memory_space<vmem>>, %arg2: memref<576x128xbf16, #tpu.memory_space<vmem>>, %arg3: memref<2x128xf32, #tpu.memory_space<vmem>>, %arg4: memref<64x128xbf16, #tpu.memory_space<vmem>>) attributes {dimension_semantics = [#tpu.dimension_semantics<parallel>], iteration_bounds = array<i64: 1>, scalar_prefetch = 0 : i64, scratch_operands = 0 : i64, tpu.core_type = #tpu.core_type<tc>, window_params = [{transform_indices = @transform_0, window_bounds = array<i64: 64, 576>}, {pipeline_mode = #tpu.pipeline_mode<synchronous>, transform_indices = @transform_1, window_bounds = array<i64: 576, 128>}, {pipeline_mode = #tpu.pipeline_mode<synchronous>, transform_indices = @transform_2, window_bounds = array<i64: 2, 128>}, {transform_indices = @transform_3, window_bounds = array<i64: 64, 128>}]} {
    %c0 = arith.constant 0 : index
    %c0_0 = arith.constant 0 : index
    %0 = vector.load %arg1[%c0, %c0_0] : memref<64x576xbf16, #tpu.memory_space<vmem>>, vector<64x576xbf16>
    %c0_1 = arith.constant 0 : index
    %c0_2 = arith.constant 0 : index
    %1 = vector.load %arg2[%c0_1, %c0_2] : memref<576x128xbf16, #tpu.memory_space<vmem>>, vector<576x128xbf16>
    %cst = arith.constant dense<0.000000e+00> : vector<64x128xf32>
    %2 = tpu.matmul %0, %1, %cst {dimension_numbers = #tpu.dot_dimension_numbers<[1], [0], [0], [1], [0, 0, 1, 1], [], []>} : vector<64x576xbf16>, vector<576x128xbf16>, vector<64x128xf32> -> vector<64x128xf32>
    %c0_3 = arith.constant 0 : index
    %c0_4 = arith.constant 0 : index
    %3 = vector.load %arg3[%c0_3, %c0_4] : memref<2x128xf32, #tpu.memory_space<vmem>>, vector<1x128xf32>
    %4 = vector.broadcast %3 : vector<1x128xf32> to vector<64x128xf32>
    %5 = arith.addf %2, %4 : vector<64x128xf32>
    %cst_5 = arith.constant 2.000000e-01 : f32
    %6 = vector.broadcast %cst_5 : f32 to vector<64x128xf32>
    %7 = arith.mulf %6, %5 : vector<64x128xf32>
    %8 = arith.maximumf %5, %7 : vector<64x128xf32>
    %c1 = arith.constant 1 : index
    %c0_6 = arith.constant 0 : index
    %9 = vector.load %arg3[%c1, %c0_6] : memref<2x128xf32, #tpu.memory_space<vmem>>, vector<1x128xf32>
    %10 = vector.broadcast %9 : vector<1x128xf32> to vector<64x128xf32>
    %11 = arith.addf %8, %10 : vector<64x128xf32>
    %12 = arith.truncf %11 : vector<64x128xf32> to vector<64x128xbf16>
    %c0_7 = arith.constant 0 : index
    %c0_8 = arith.constant 0 : index
    %13 = vector.load %arg4[%c0_7, %c0_8] : memref<64x128xbf16, #tpu.memory_space<vmem>>, vector<64x128xbf16>
    tpu.vector_store %arg4[%c0_7, %c0_8], %12 {strides = array<i32>} : memref<64x128xbf16, #tpu.memory_space<vmem>>, vector<64x128xbf16>,
    return
  }
  func.func @transform_0(%arg0: i32) -> (i32, i32) {
    %c0_i32 = arith.constant 0 : i32
    %c0_i32_0 = arith.constant 0 : i32
    return %arg0, %c0_i32 : i32, i32
  }
  func.func @transform_1(%arg0: i32) -> (i32, i32) {
    %c0_i32 = arith.constant 0 : i32
    %c0_i32_0 = arith.constant 0 : i32
    %c0_i32_1 = arith.constant 0 : i32
    return %c0_i32, %c0_i32_0 : i32, i32
  }
  func.func @transform_2(%arg0: i32) -> (i32, i32) {
    %c0_i32 = arith.constant 0 : i32
    %c0_i32_0 = arith.constant 0 : i32
    %c0_i32_1 = arith.constant 0 : i32
    return %c0_i32, %c0_i32_0 : i32, i32
  }
  func.func @transform_3(%arg0: i32) -> (i32, i32) {
    %c0_i32 = arith.constant 0 : i32
    %c0_i32_0 = arith.constant 0 : i32
    return %arg0, %c0_i32 : i32, i32
  }
}

module attributes {stable_mosaic.version = 11 : i64} {
  func.func @_conv_block_kernel(%arg0: i32, %arg1: memref<32x576xbf16, #tpu.memory_space<vmem>>, %arg2: memref<576x128xbf16, #tpu.memory_space<vmem>>, %arg3: memref<2x128xf32, #tpu.memory_space<vmem>>, %arg4: memref<32x128xbf16, #tpu.memory_space<vmem>>) attributes {dimension_semantics = [#tpu.dimension_semantics<parallel>], iteration_bounds = array<i64: 1>, scalar_prefetch = 0 : i64, scratch_operands = 0 : i64, tpu.core_type = #tpu.core_type<tc>, window_params = [{transform_indices = @transform_0, window_bounds = array<i64: 32, 576>}, {pipeline_mode = #tpu.pipeline_mode<synchronous>, transform_indices = @transform_1, window_bounds = array<i64: 576, 128>}, {pipeline_mode = #tpu.pipeline_mode<synchronous>, transform_indices = @transform_2, window_bounds = array<i64: 2, 128>}, {transform_indices = @transform_3, window_bounds = array<i64: 32, 128>}]} {
    %c0 = arith.constant 0 : index
    %c0_0 = arith.constant 0 : index
    %0 = vector.load %arg1[%c0, %c0_0] : memref<32x576xbf16, #tpu.memory_space<vmem>>, vector<32x576xbf16>
    %c0_1 = arith.constant 0 : index
    %c0_2 = arith.constant 0 : index
    %1 = vector.load %arg2[%c0_1, %c0_2] : memref<576x128xbf16, #tpu.memory_space<vmem>>, vector<576x128xbf16>
    %cst = arith.constant dense<0.000000e+00> : vector<32x128xf32>
    %2 = tpu.matmul %0, %1, %cst {dimension_numbers = #tpu.dot_dimension_numbers<[1], [0], [0], [1], [0, 0, 1, 1], [], []>} : vector<32x576xbf16>, vector<576x128xbf16>, vector<32x128xf32> -> vector<32x128xf32>
    %c0_3 = arith.constant 0 : index
    %c0_4 = arith.constant 0 : index
    %3 = vector.load %arg3[%c0_3, %c0_4] : memref<2x128xf32, #tpu.memory_space<vmem>>, vector<1x128xf32>
    %4 = vector.broadcast %3 : vector<1x128xf32> to vector<32x128xf32>
    %5 = arith.addf %2, %4 : vector<32x128xf32>
    %cst_5 = arith.constant 2.000000e-01 : f32
    %6 = vector.broadcast %cst_5 : f32 to vector<32x128xf32>
    %7 = arith.mulf %6, %5 : vector<32x128xf32>
    %8 = arith.maximumf %5, %7 : vector<32x128xf32>
    %c1 = arith.constant 1 : index
    %c0_6 = arith.constant 0 : index
    %9 = vector.load %arg3[%c1, %c0_6] : memref<2x128xf32, #tpu.memory_space<vmem>>, vector<1x128xf32>
    %10 = vector.broadcast %9 : vector<1x128xf32> to vector<32x128xf32>
    %11 = arith.addf %8, %10 : vector<32x128xf32>
    %12 = arith.truncf %11 : vector<32x128xf32> to vector<32x128xbf16>
    %c0_7 = arith.constant 0 : index
    %c0_8 = arith.constant 0 : index
    %13 = vector.load %arg4[%c0_7, %c0_8] : memref<32x128xbf16, #tpu.memory_space<vmem>>, vector<32x128xbf16>
    tpu.vector_store %arg4[%c0_7, %c0_8], %12 {strides = array<i32>} : memref<32x128xbf16, #tpu.memory_space<vmem>>, vector<32x128xbf16>,
    return
  }
  func.func @transform_0(%arg0: i32) -> (i32, i32) {
    %c0_i32 = arith.constant 0 : i32
    %c0_i32_0 = arith.constant 0 : i32
    return %arg0, %c0_i32 : i32, i32
  }
  func.func @transform_1(%arg0: i32) -> (i32, i32) {
    %c0_i32 = arith.constant 0 : i32
    %c0_i32_0 = arith.constant 0 : i32
    %c0_i32_1 = arith.constant 0 : i32
    return %c0_i32, %c0_i32_0 : i32, i32
  }
  func.func @transform_2(%arg0: i32) -> (i32, i32) {
    %c0_i32 = arith.constant 0 : i32
    %c0_i32_0 = arith.constant 0 : i32
    %c0_i32_1 = arith.constant 0 : i32
    return %c0_i32, %c0_i32_0 : i32, i32
  }
  func.func @transform_3(%arg0: i32) -> (i32, i32) {
    %c0_i32 = arith.constant 0 : i32
    %c0_i32_0 = arith.constant 0 : i32
    return %arg0, %c0_i32 : i32, i32
  }
}

module attributes {stable_mosaic.version = 11 : i64} {
  func.func @_tail_kernel(%arg0: i32, %arg1: memref<8x1152xbf16, #tpu.memory_space<vmem>>, %arg2: memref<1152x256xbf16, #tpu.memory_space<vmem>>, %arg3: memref<2x256xf32, #tpu.memory_space<vmem>>, %arg4: memref<4x256x512xbf16, #tpu.memory_space<vmem>>, %arg5: memref<2x512xf32, #tpu.memory_space<vmem>>, %arg6: memref<512x128xbf16, #tpu.memory_space<vmem>>, %arg7: memref<1x128xf32, #tpu.memory_space<vmem>>, %arg8: memref<2x128xf32, #tpu.memory_space<vmem>>, %arg9: memref<8x256xbf16, #tpu.memory_space<vmem>>) attributes {dimension_semantics = [#tpu.dimension_semantics<arbitrary>], iteration_bounds = array<i64: 1>, scalar_prefetch = 0 : i64, scratch_operands = 1 : i64, tpu.core_type = #tpu.core_type<tc>, window_params = [{pipeline_mode = #tpu.pipeline_mode<synchronous>, transform_indices = @transform_0, window_bounds = array<i64: 8, 1152>}, {pipeline_mode = #tpu.pipeline_mode<synchronous>, transform_indices = @transform_1, window_bounds = array<i64: 1152, 256>}, {pipeline_mode = #tpu.pipeline_mode<synchronous>, transform_indices = @transform_2, window_bounds = array<i64: 2, 256>}, {pipeline_mode = #tpu.pipeline_mode<synchronous>, transform_indices = @transform_3, window_bounds = array<i64: 4, 256, 512>}, {pipeline_mode = #tpu.pipeline_mode<synchronous>, transform_indices = @transform_4, window_bounds = array<i64: 2, 512>}, {pipeline_mode = #tpu.pipeline_mode<synchronous>, transform_indices = @transform_5, window_bounds = array<i64: 512, 128>}, {pipeline_mode = #tpu.pipeline_mode<synchronous>, transform_indices = @transform_6, window_bounds = array<i64: 1, 128>}, {pipeline_mode = #tpu.pipeline_mode<synchronous>, transform_indices = @transform_7, window_bounds = array<i64: 2, 128>}]} {
    %c0 = arith.constant 0 : index
    %c0_0 = arith.constant 0 : index
    %0 = vector.load %arg1[%c0, %c0_0] : memref<8x1152xbf16, #tpu.memory_space<vmem>>, vector<8x1152xbf16>
    %c0_1 = arith.constant 0 : index
    %c0_2 = arith.constant 0 : index
    %1 = vector.load %arg2[%c0_1, %c0_2] : memref<1152x256xbf16, #tpu.memory_space<vmem>>, vector<1152x256xbf16>
    %cst = arith.constant dense<0.000000e+00> : vector<8x256xf32>
    %2 = tpu.matmul %0, %1, %cst {dimension_numbers = #tpu.dot_dimension_numbers<[1], [0], [0], [1], [0, 0, 1, 1], [], []>} : vector<8x1152xbf16>, vector<1152x256xbf16>, vector<8x256xf32> -> vector<8x256xf32>
    %c0_3 = arith.constant 0 : index
    %c0_4 = arith.constant 0 : index
    %3 = vector.load %arg3[%c0_3, %c0_4] : memref<2x256xf32, #tpu.memory_space<vmem>>, vector<1x256xf32>
    %4 = vector.broadcast %3 : vector<1x256xf32> to vector<8x256xf32>
    %5 = arith.addf %2, %4 : vector<8x256xf32>
    %cst_5 = arith.constant 2.000000e-01 : f32
    %6 = vector.broadcast %cst_5 : f32 to vector<8x256xf32>
    %7 = arith.mulf %6, %5 : vector<8x256xf32>
    %8 = arith.maximumf %5, %7 : vector<8x256xf32>
    %c1 = arith.constant 1 : index
    %c0_6 = arith.constant 0 : index
    %9 = vector.load %arg3[%c1, %c0_6] : memref<2x256xf32, #tpu.memory_space<vmem>>, vector<1x256xf32>
    %10 = vector.broadcast %9 : vector<1x256xf32> to vector<8x256xf32>
    %11 = arith.addf %8, %10 : vector<8x256xf32>
    %12 = arith.truncf %11 : vector<8x256xf32> to vector<8x256xbf16>
    %c0_7 = arith.constant 0 : index
    %c0_8 = arith.constant 0 : index
    %13 = vector.load %arg9[%c0_7, %c0_8] : memref<8x256xbf16, #tpu.memory_space<vmem>>, vector<8x256xbf16>
    tpu.vector_store %arg9[%c0_7, %c0_8], %12 {strides = array<i32>} : memref<8x256xbf16, #tpu.memory_space<vmem>>, vector<8x256xbf16>,
    %cst_9 = arith.constant 0.000000e+00 : f32
    %14 = vector.broadcast %cst_9 : f32 to vector<2x512xf32>
    %c0_10 = arith.constant 0 : index
    %c0_11 = arith.constant 0 : index
    %15 = vector.load %arg9[%c0_10, %c0_11] : memref<8x256xbf16, #tpu.memory_space<vmem>>, vector<2x256xbf16>
    %c0_12 = arith.constant 0 : index
    %c0_13 = arith.constant 0 : index
    %c0_14 = arith.constant 0 : index
    %16 = vector.load %arg4[%c0_12, %c0_13, %c0_14] : memref<4x256x512xbf16, #tpu.memory_space<vmem>>, vector<1x256x512xbf16>
    %17 = vector.shape_cast %16 : vector<1x256x512xbf16> to vector<256x512xbf16>
    %cst_15 = arith.constant dense<0.000000e+00> : vector<2x512xf32>
    %18 = tpu.matmul %15, %17, %cst_15 {dimension_numbers = #tpu.dot_dimension_numbers<[1], [0], [0], [1], [0, 0, 1, 1], [], []>} : vector<2x256xbf16>, vector<256x512xbf16>, vector<2x512xf32> -> vector<2x512xf32>
    %19 = arith.addf %14, %18 : vector<2x512xf32>
    %c2 = arith.constant 2 : index
    %c0_16 = arith.constant 0 : index
    %20 = vector.load %arg9[%c2, %c0_16] : memref<8x256xbf16, #tpu.memory_space<vmem>>, vector<2x256xbf16>
    %c1_17 = arith.constant 1 : index
    %c0_18 = arith.constant 0 : index
    %c0_19 = arith.constant 0 : index
    %21 = vector.load %arg4[%c1_17, %c0_18, %c0_19] : memref<4x256x512xbf16, #tpu.memory_space<vmem>>, vector<1x256x512xbf16>
    %22 = vector.shape_cast %21 : vector<1x256x512xbf16> to vector<256x512xbf16>
    %cst_20 = arith.constant dense<0.000000e+00> : vector<2x512xf32>
    %23 = tpu.matmul %20, %22, %cst_20 {dimension_numbers = #tpu.dot_dimension_numbers<[1], [0], [0], [1], [0, 0, 1, 1], [], []>} : vector<2x256xbf16>, vector<256x512xbf16>, vector<2x512xf32> -> vector<2x512xf32>
    %24 = arith.addf %19, %23 : vector<2x512xf32>
    %c4 = arith.constant 4 : index
    %c0_21 = arith.constant 0 : index
    %25 = vector.load %arg9[%c4, %c0_21] : memref<8x256xbf16, #tpu.memory_space<vmem>>, vector<2x256xbf16>
    %c2_22 = arith.constant 2 : index
    %c0_23 = arith.constant 0 : index
    %c0_24 = arith.constant 0 : index
    %26 = vector.load %arg4[%c2_22, %c0_23, %c0_24] : memref<4x256x512xbf16, #tpu.memory_space<vmem>>, vector<1x256x512xbf16>
    %27 = vector.shape_cast %26 : vector<1x256x512xbf16> to vector<256x512xbf16>
    %cst_25 = arith.constant dense<0.000000e+00> : vector<2x512xf32>
    %28 = tpu.matmul %25, %27, %cst_25 {dimension_numbers = #tpu.dot_dimension_numbers<[1], [0], [0], [1], [0, 0, 1, 1], [], []>} : vector<2x256xbf16>, vector<256x512xbf16>, vector<2x512xf32> -> vector<2x512xf32>
    %29 = arith.addf %24, %28 : vector<2x512xf32>
    %c6 = arith.constant 6 : index
    %c0_26 = arith.constant 0 : index
    %30 = vector.load %arg9[%c6, %c0_26] : memref<8x256xbf16, #tpu.memory_space<vmem>>, vector<2x256xbf16>
    %c3 = arith.constant 3 : index
    %c0_27 = arith.constant 0 : index
    %c0_28 = arith.constant 0 : index
    %31 = vector.load %arg4[%c3, %c0_27, %c0_28] : memref<4x256x512xbf16, #tpu.memory_space<vmem>>, vector<1x256x512xbf16>
    %32 = vector.shape_cast %31 : vector<1x256x512xbf16> to vector<256x512xbf16>
    %cst_29 = arith.constant dense<0.000000e+00> : vector<2x512xf32>
    %33 = tpu.matmul %30, %32, %cst_29 {dimension_numbers = #tpu.dot_dimension_numbers<[1], [0], [0], [1], [0, 0, 1, 1], [], []>} : vector<2x256xbf16>, vector<256x512xbf16>, vector<2x512xf32> -> vector<2x512xf32>
    %34 = arith.addf %29, %33 : vector<2x512xf32>
    %c0_30 = arith.constant 0 : index
    %c0_31 = arith.constant 0 : index
    %35 = vector.load %arg5[%c0_30, %c0_31] : memref<2x512xf32, #tpu.memory_space<vmem>>, vector<1x512xf32>
    %36 = vector.broadcast %35 : vector<1x512xf32> to vector<2x512xf32>
    %37 = arith.addf %34, %36 : vector<2x512xf32>
    %cst_32 = arith.constant 2.000000e-01 : f32
    %38 = vector.broadcast %cst_32 : f32 to vector<2x512xf32>
    %39 = arith.mulf %38, %37 : vector<2x512xf32>
    %40 = arith.maximumf %37, %39 : vector<2x512xf32>
    %c1_33 = arith.constant 1 : index
    %c0_34 = arith.constant 0 : index
    %41 = vector.load %arg5[%c1_33, %c0_34] : memref<2x512xf32, #tpu.memory_space<vmem>>, vector<1x512xf32>
    %42 = vector.broadcast %41 : vector<1x512xf32> to vector<2x512xf32>
    %43 = arith.addf %40, %42 : vector<2x512xf32>
    %44 = arith.truncf %43 : vector<2x512xf32> to vector<2x512xbf16>
    %c0_35 = arith.constant 0 : index
    %c0_36 = arith.constant 0 : index
    %45 = vector.load %arg6[%c0_35, %c0_36] : memref<512x128xbf16, #tpu.memory_space<vmem>>, vector<512x128xbf16>
    %cst_37 = arith.constant dense<0.000000e+00> : vector<2x128xf32>
    %46 = tpu.matmul %44, %45, %cst_37 {dimension_numbers = #tpu.dot_dimension_numbers<[1], [0], [0], [1], [0, 0, 1, 1], [], []>} : vector<2x512xbf16>, vector<512x128xbf16>, vector<2x128xf32> -> vector<2x128xf32>
    %c0_38 = arith.constant 0 : index
    %c0_39 = arith.constant 0 : index
    %47 = vector.load %arg7[%c0_38, %c0_39] : memref<1x128xf32, #tpu.memory_space<vmem>>, vector<1x128xf32>
    %48 = vector.broadcast %47 : vector<1x128xf32> to vector<2x128xf32>
    %49 = arith.addf %46, %48 : vector<2x128xf32>
    %50 = vector.extract_strided_slice %49 {offsets = [0, 0], sizes = [2, 1], strides = [1, 1]} : vector<2x128xf32> to vector<2x1xf32>
    %cst_40 = arith.constant 0.000000e+00 : f32
    %51 = vector.broadcast %cst_40 : f32 to vector<2x1xf32>
    %52 = arith.subf %51, %50 : vector<2x1xf32>
    %53 = math.exp %52 : vector<2x1xf32>
    %cst_41 = arith.constant 1.000000e+00 : f32
    %54 = vector.broadcast %cst_41 : f32 to vector<2x1xf32>
    %55 = arith.addf %54, %53 : vector<2x1xf32>
    %cst_42 = arith.constant 1.000000e+00 : f32
    %56 = vector.broadcast %cst_42 : f32 to vector<2x1xf32>
    %57 = arith.divf %56, %55 : vector<2x1xf32>
    %58 = vector.extract_strided_slice %49 {offsets = [0, 1], sizes = [2, 2], strides = [1, 1]} : vector<2x128xf32> to vector<2x2xf32>
    %cst_43 = arith.constant dense<0xFF800000> : vector<2xf32>
    %59 = vector.multi_reduction <maximumf>, %58, %cst_43 [1] : vector<2x2xf32> to vector<2xf32>
    %60 = vector.shape_cast %59 : vector<2xf32> to vector<2x1xf32>
    %61 = vector.broadcast %60 : vector<2x1xf32> to vector<2x2xf32>
    %62 = arith.subf %58, %61 : vector<2x2xf32>
    %63 = math.exp %62 : vector<2x2xf32>
    %cst_44 = arith.constant dense<0.000000e+00> : vector<2xf32>
    %64 = vector.multi_reduction <add>, %63, %cst_44 [1] : vector<2x2xf32> to vector<2xf32>
    %65 = vector.shape_cast %64 : vector<2xf32> to vector<2x1xf32>
    %66 = vector.broadcast %65 : vector<2x1xf32> to vector<2x2xf32>
    %67 = arith.divf %63, %66 : vector<2x2xf32>
    %cst_45 = arith.constant 0.000000e+00 : f32
    %68 = vector.broadcast %cst_45 : f32 to vector<2x125xf32>
    %69 = tpu.concatenate %57, %67, %68 in 1 : vector<2x1xf32>, vector<2x2xf32>, vector<2x125xf32> -> vector<2x128xf32>
    %c0_46 = arith.constant 0 : index
    %c0_47 = arith.constant 0 : index
    %70 = vector.load %arg8[%c0_46, %c0_47] : memref<2x128xf32, #tpu.memory_space<vmem>>, vector<2x128xf32>
    tpu.vector_store %arg8[%c0_46, %c0_47], %69 {strides = array<i32>} : memref<2x128xf32, #tpu.memory_space<vmem>>, vector<2x128xf32>,
    return
  }
  func.func @transform_0(%arg0: i32) -> (i32, i32) {
    %c0_i32 = arith.constant 0 : i32
    %c0_i32_0 = arith.constant 0 : i32
    %c0_i32_1 = arith.constant 0 : i32
    return %c0_i32, %c0_i32_0 : i32, i32
  }
  func.func @transform_1(%arg0: i32) -> (i32, i32) {
    %c0_i32 = arith.constant 0 : i32
    %c0_i32_0 = arith.constant 0 : i32
    %c0_i32_1 = arith.constant 0 : i32
    return %c0_i32, %c0_i32_0 : i32, i32
  }
  func.func @transform_2(%arg0: i32) -> (i32, i32) {
    %c0_i32 = arith.constant 0 : i32
    %c0_i32_0 = arith.constant 0 : i32
    %c0_i32_1 = arith.constant 0 : i32
    return %c0_i32, %c0_i32_0 : i32, i32
  }
  func.func @transform_3(%arg0: i32) -> (i32, i32, i32) {
    %c0_i32 = arith.constant 0 : i32
    %c0_i32_0 = arith.constant 0 : i32
    %c0_i32_1 = arith.constant 0 : i32
    %c0_i32_2 = arith.constant 0 : i32
    return %c0_i32, %c0_i32_0, %c0_i32_1 : i32, i32, i32
  }
  func.func @transform_4(%arg0: i32) -> (i32, i32) {
    %c0_i32 = arith.constant 0 : i32
    %c0_i32_0 = arith.constant 0 : i32
    %c0_i32_1 = arith.constant 0 : i32
    return %c0_i32, %c0_i32_0 : i32, i32
  }
  func.func @transform_5(%arg0: i32) -> (i32, i32) {
    %c0_i32 = arith.constant 0 : i32
    %c0_i32_0 = arith.constant 0 : i32
    %c0_i32_1 = arith.constant 0 : i32
    return %c0_i32, %c0_i32_0 : i32, i32
  }
  func.func @transform_6(%arg0: i32) -> (i32, i32) {
    %c0_i32 = arith.constant 0 : i32
    %c0_i32_0 = arith.constant 0 : i32
    %c0_i32_1 = arith.constant 0 : i32
    return %c0_i32, %c0_i32_0 : i32, i32
  }
  func.func @transform_7(%arg0: i32) -> (i32, i32) {
    %c0_i32 = arith.constant 0 : i32
    %c0_i32_0 = arith.constant 0 : i32
    %c0_i32_1 = arith.constant 0 : i32
    return %c0_i32, %c0_i32_0 : i32, i32
  }
}

</mosaic_0001>

<bundles_post_ra>
// kernel: discriminator_aux_gan.5
= control target key start
LH: loop header
LB: loop body
LE: loop exit
PB: predicated region body
PF: predicated region fallthrough
CT: control target
= control target key end

     0   :  { %v1097_v0 = vmov 0   ;;  %vm304_vm0 = vcmask 719872   ;;  %vm353_vm1 = vcmask 1043456   ;;  %s1422_s1 = inlined_call_operand.vmem [shape: bf16[216,128], index: 1, kind: input, shape index: {}]   ;;  %s1423_s0 = inlined_call_operand.vmem [shape: bf16[256,216], index: 0, kind: input, shape index: {}]   ;;  %s1424_s2 = inlined_call_operand.vmem [shape: f32[2,128], index: 2, kind: input, shape index: {}]   ;;  %s1425_s3 = inlined_call_operand.vmem [shape: bf16[256,128], index: 3, kind: output, shape index: {}]  }
   0x1   :  { %357 = vmatprep.subr.bf16.mxu0 %v1097_v0  ;;  %1006 = vmatprep.subr.bf16.mxu1 %v1097_v0  ;;  %v1035_v1 = vld [vmem:[%s1422_s1] sm:$0xff]   ;;  %v1036_v2 = vld [vmem:[%s1422_s1 + $0x8] sm:$0xff]   ;;  %v1037_v3 = vld [vmem:[%s1422_s1 + $0x10] sm:$0xff]  }
   0x2   :  { %358 = vmatpush1.bf16.msra.mxu0 %v1035_v1  ;;  %1020 = vmatpush1.bf16.msra.mxu1 %v1035_v1  ;;  %v1038_v4 = vld [vmem:[%s1422_s1 + $0x18] sm:$0xff]   ;;  %v1039_v5 = vld [vmem:[%s1422_s1 + $0x20] sm:$0xff]   ;;  %v1040_v8 = vld [vmem:[%s1422_s1 + $0x28] sm:$0xff]  }
   0x3   :  { %359 = vmatprep.subr.bf16.mxu0 %v1097_v0  ;;  %1007 = vmatprep.subr.bf16.mxu1 %v1097_v0  ;;  %v1051_v6 = vld [vmem:[%s1423_s0 + $0x4] ss:$8 sps:$4 sm:$0xff]   ;;  %v1041_v9 = vld [vmem:[%s1422_s1 + $0x30] sm:$0xff]   ;;  %v1042_v10 = vld [vmem:[%s1422_s1 + $0x38] sm:$0xff]  }
   0x4   :  { %830 = vmatprep.mubr.msk.bf16.mxu0 %vm304_vm0, %v1051_v6  ;;  %v1054_v7 = vld [vmem:[%s1423_s0 + $0x84] ss:$8 sps:$4 sm:$0xff]   ;;  %v1045_v13 = vld [vmem:[%s1422_s1 + $0x50] sm:$0xff]   ;;  %v1046_v14 = vld [vmem:[%s1422_s1 + $0x58] sm:$0xff]  }
   0x5   :  { %838 = vmatprep.mubr.msk.bf16.mxu1 %vm304_vm0, %v1054_v7  ;;  %v1043_v11 = vld [vmem:[%s1422_s1 + $0x40] sm:$0xff]   ;;  %v1044_v12 = vld [vmem:[%s1422_s1 + $0x48] sm:$0xff]   ;;  %v1055_v20 = vld [vmem:[%s1423_s0 + $0x14] ss:$8 sps:$4 sm:$0xff]  }
   0x6   :  { %360 = vmatpush1.bf16.msra.mxu0 %v1036_v2  ;;  %1021 = vmatpush1.bf16.msra.mxu1 %v1036_v2  ;;  %v1047_v15 = vld [vmem:[%s1422_s1 + $0x60] sm:$0xff]   ;;  %v1048_v16 = vld [vmem:[%s1422_s1 + $0x68] ss:$0 sps:$4 sm:$0xff]   ;;  %v1057_v21 = vld [vmem:[%s1423_s0 + $0x94] ss:$8 sps:$4 sm:$0xff]  }
   0x7   :  { %361 = vmatprep.subr.bf16.mxu0 %v1097_v0  ;;  %1008 = vmatprep.subr.bf16.mxu1 %v1097_v0  ;;  %v355_v17 = vsel %vm353_vm1, %v1048_v16, 0  ;;  %v1049_v18 = vld [vmem:[%s1423_s0] ss:$8 sps:$4 sm:$0xff]   ;;  %v1059_v22 = vld [vmem:[%s1423_s0 + $0x10] ss:$8 sps:$4 sm:$0xff]  }
   0x8   :  { %v1052_v19 = vld [vmem:[%s1423_s0 + $0x80] ss:$8 sps:$4 sm:$0xff]   ;;  %v1060_v23 = vld [vmem:[%s1423_s0 + $0x90] ss:$8 sps:$4 sm:$0xff]   ;;  %v1061_v24 = vld [vmem:[%s1423_s0 + $0x24] ss:$8 sps:$4 sm:$0xff]  }
   0x9   :  { %v1063_v25 = vld [vmem:[%s1423_s0 + $0xa4] ss:$8 sps:$4 sm:$0xff]   ;;  %v1065_v26 = vld [vmem:[%s1423_s0 + $0x20] ss:$8 sps:$4 sm:$0xff]   ;;  %v1067_v28 = vld [vmem:[%s1423_s0 + $0x34] ss:$8 sps:$4 sm:$0xff]  }
   0xa   :  { %362 = vmatpush1.bf16.msra.mxu0 %v1037_v3  ;;  %1022 = vmatpush1.bf16.msra.mxu1 %v1037_v3  ;;  %v1066_v27 = vld [vmem:[%s1423_s0 + $0xa0] ss:$8 sps:$4 sm:$0xff]   ;;  %v1069_v29 = vld [vmem:[%s1423_s0 + $0xb4] ss:$8 sps:$4 sm:$0xff]   ;;  %v1071_v30 = vld [vmem:[%s1423_s0 + $0x30] ss:$8 sps:$4 sm:$0xff]  }
   0xb   :  { %363 = vmatprep.subr.bf16.mxu0 %v1097_v0  ;;  %1009 = vmatprep.subr.bf16.mxu1 %v1097_v0  ;;  %v1072_v31 = vld [vmem:[%s1423_s0 + $0xb0] ss:$8 sps:$4 sm:$0xff]   ;;  %v1073_v32 = vld [vmem:[%s1423_s0 + $0x44] ss:$8 sps:$4 sm:$0xff]   ;;  %v1077_v34 = vld [vmem:[%s1423_s0 + $0x40] ss:$8 sps:$4 sm:$0xff]  }
   0xc   :  { %v1075_v33 = vld [vmem:[%s1423_s0 + $0xc4] ss:$8 sps:$4 sm:$0xff]   ;;  %v1078_v35 = vld [vmem:[%s1423_s0 + $0xc0] ss:$8 sps:$4 sm:$0xff]   ;;  %v1079_v36 = vld [vmem:[%s1423_s0 + $0x54] ss:$8 sps:$4 sm:$0xff]  }
   0xd   :  { %v1081_v37 = vld [vmem:[%s1423_s0 + $0xd4] ss:$8 sps:$4 sm:$0xff]   ;;  %v1083_v38 = vld [vmem:[%s1423_s0 + $0x50] ss:$8 sps:$4 sm:$0xff]   ;;  %v1085_v40 = vld [vmem:[%s1423_s0 + $0x64] ss:$8 sps:$4 sm:$0xff]  }
   0xe   :  { %364 = vmatpush1.bf16.msra.mxu0 %v1038_v4  ;;  %1023 = vmatpush1.bf16.msra.mxu1 %v1038_v4  ;;  %v1084_v39 = vld [vmem:[%s1423_s0 + $0xd0] ss:$8 sps:$4 sm:$0xff]   ;;  %v1087_v41 = vld [vmem:[%s1423_s0 + $0xe4] ss:$8 sps:$4 sm:$0xff]   ;;  %v1089_v42 = vld [vmem:[%s1423_s0 + $0x60] ss:$8 sps:$4 sm:$0xff]  }
   0xf   :  { %365 = vmatprep.subr.bf16.mxu0 %v1097_v0  ;;  %1010 = vmatprep.subr.bf16.mxu1 %v1097_v0  ;;  %v1090_v43 = vld [vmem:[%s1423_s0 + $0xe0] ss:$8 sps:$4 sm:$0xff]   ;;  %v1091_v44 = vld [vmem:[%s1423_s0 + $0x74] ss:$8 sps:$4 sm:$0xff]   ;;  %v1095_v46 = vld [vmem:[%s1423_s0 + $0x70] ss:$8 sps:$4 sm:$0xff]  }
  0x10   :  { %v1093_v45 = vld [vmem:[%s1423_s0 + $0xf4] ss:$8 sps:$4 sm:$0xff]   ;;  %v1096_v47 = vld [vmem:[%s1423_s0 + $0xf0] ss:$8 sps:$4 sm:$0xff]   ;;  %v1303_v48 = vld [vmem:[%s1424_s2] ss:$0 sm:$0xff] }
  0x12   :  { %366 = vmatpush1.bf16.msra.mxu0 %v1039_v5  ;;  %1024 = vmatpush1.bf16.msra.mxu1 %v1039_v5 }
  0x13   :  { %367 = vmatprep.subr.bf16.mxu0 %v1097_v0  ;;  %1011 = vmatprep.subr.bf16.mxu1 %v1097_v0 }
  0x16   :  { %368 = vmatpush1.bf16.msra.mxu0 %v1040_v8  ;;  %1025 = vmatpush1.bf16.msra.mxu1 %v1040_v8 }
  0x17   :  { %369 = vmatprep.subr.bf16.mxu0 %v1097_v0  ;;  %1012 = vmatprep.subr.bf16.mxu1 %v1097_v0 }
  0x1a   :  { %370 = vmatpush1.bf16.msra.mxu0 %v1041_v9  ;;  %1026 = vmatpush1.bf16.msra.mxu1 %v1041_v9 }
  0x1b   :  { %371 = vmatprep.subr.bf16.mxu0 %v1097_v0  ;;  %1013 = vmatprep.subr.bf16.mxu1 %v1097_v0 }
  0x1e   :  { %372 = vmatpush1.bf16.msra.mxu0 %v1042_v10  ;;  %1027 = vmatpush1.bf16.msra.mxu1 %v1042_v10 }
  0x1f   :  { %373 = vmatprep.subr.bf16.mxu0 %v1097_v0  ;;  %1014 = vmatprep.subr.bf16.mxu1 %v1097_v0 }
  0x22   :  { %374 = vmatpush1.bf16.msra.mxu0 %v1043_v11  ;;  %1028 = vmatpush1.bf16.msra.mxu1 %v1043_v11 }
  0x23   :  { %375 = vmatprep.subr.bf16.mxu0 %v1097_v0  ;;  %1015 = vmatprep.subr.bf16.mxu1 %v1097_v0 }
  0x26   :  { %376 = vmatpush1.bf16.msra.mxu0 %v1044_v12  ;;  %1029 = vmatpush1.bf16.msra.mxu1 %v1044_v12 }
  0x27   :  { %377 = vmatprep.subr.bf16.mxu0 %v1097_v0  ;;  %1016 = vmatprep.subr.bf16.mxu1 %v1097_v0 }
  0x2a   :  { %378 = vmatpush1.bf16.msra.mxu0 %v1045_v13  ;;  %1030 = vmatpush1.bf16.msra.mxu1 %v1045_v13 }
  0x2b   :  { %379 = vmatprep.subr.bf16.mxu0 %v1097_v0  ;;  %1017 = vmatprep.subr.bf16.mxu1 %v1097_v0 }
  0x2e   :  { %380 = vmatpush1.bf16.msra.mxu0 %v1046_v14  ;;  %1031 = vmatpush1.bf16.msra.mxu1 %v1046_v14 }
  0x2f   :  { %381 = vmatprep.subr.bf16.mxu0 %v1097_v0  ;;  %1018 = vmatprep.subr.bf16.mxu1 %v1097_v0 }
  0x32   :  { %382 = vmatpush1.bf16.msra.mxu0 %v1047_v15  ;;  %1032 = vmatpush1.bf16.msra.mxu1 %v1047_v15 }
  0x33   :  { %383 = vmatprep.subr.bf16.mxu0 %v1097_v0  ;;  %1019 = vmatprep.subr.bf16.mxu1 %v1097_v0  ;;  %v1312_v0 = vld [vmem:[%s1424_s2 + $0x1] ss:$0 sm:$0xff] }
  0x36   :  { %384 = vmatpush1.bf16.msra.mxu0 %v355_v17  ;;  %1033 = vmatpush1.bf16.msra.mxu1 %v355_v17 }
  0x39   :  { %390 = vmatmul.mubr.bf16.vlgmr.msra.gmra.mrb[0].mxu0 %v1049_v18  ;;  %454 = vmatmul.mubr.bf16.vlgmr.msra.gmra.mrb[0].mxu1 %v1052_v19 }
  0x3a   :  { %831 = vmatprep.mubr.msk.bf16.mxu0 %vm304_vm0, %v1055_v20  ;;  %839 = vmatprep.mubr.msk.bf16.mxu1 %vm304_vm0, %v1057_v21 }
  0x41   :  { %398 = vmatmul.mubr.bf16.gmra.mrb[4].mxu0 %v1059_v22  ;;  %462 = vmatmul.mubr.bf16.gmra.mrb[4].mxu1 %v1060_v23 }
  0x42   :  { %832 = vmatprep.mubr.msk.bf16.mxu0 %vm304_vm0, %v1061_v24  ;;  %840 = vmatprep.mubr.msk.bf16.mxu1 %vm304_vm0, %v1063_v25 }
  0x49   :  { %406 = vmatmul.mubr.bf16.gmra.mrb[8].mxu0 %v1065_v26  ;;  %470 = vmatmul.mubr.bf16.gmra.mrb[8].mxu1 %v1066_v27 }
  0x4a   :  { %833 = vmatprep.mubr.msk.bf16.mxu0 %vm304_vm0, %v1067_v28  ;;  %841 = vmatprep.mubr.msk.bf16.mxu1 %vm304_vm0, %v1069_v29 }
  0x51   :  { %414 = vmatmul.mubr.bf16.gmra.mrb[12].mxu0 %v1071_v30  ;;  %478 = vmatmul.mubr.bf16.gmra.mrb[12].mxu1 %v1072_v31 }
  0x52   :  { %834 = vmatprep.mubr.msk.bf16.mxu0 %vm304_vm0, %v1073_v32  ;;  %842 = vmatprep.mubr.msk.bf16.mxu1 %vm304_vm0, %v1075_v33 }
  0x59   :  { %422 = vmatmul.mubr.bf16.gmra.mrb[16].mxu0 %v1077_v34  ;;  %486 = vmatmul.mubr.bf16.gmra.mrb[16].mxu1 %v1078_v35 }
  0x5a   :  { %835 = vmatprep.mubr.msk.bf16.mxu0 %vm304_vm0, %v1079_v36  ;;  %843 = vmatprep.mubr.msk.bf16.mxu1 %vm304_vm0, %v1081_v37 }
  0x61   :  { %430 = vmatmul.mubr.bf16.gmra.mrb[20].mxu0 %v1083_v38  ;;  %494 = vmatmul.mubr.bf16.gmra.mrb[20].mxu1 %v1084_v39 }
  0x62   :  { %836 = vmatprep.mubr.msk.bf16.mxu0 %vm304_vm0, %v1085_v40  ;;  %844 = vmatprep.mubr.msk.bf16.mxu1 %vm304_vm0, %v1087_v41 }
  0x69   :  { %438 = vmatmul.mubr.bf16.gmra.mrb[24].mxu0 %v1089_v42  ;;  %502 = vmatmul.mubr.bf16.gmra.mrb[24].mxu1 %v1090_v43 }
  0x6a   :  { %837 = vmatprep.mubr.msk.bf16.mxu0 %vm304_vm0, %v1091_v44  ;;  %845 = vmatprep.mubr.msk.bf16.mxu1 %vm304_vm0, %v1093_v45 }
  0x71   :  { %446 = vmatmul.mubr.bf16.gmra.mrb[28].mxu0 %v1095_v46  ;;  %510 = vmatmul.mubr.bf16.gmra.mrb[28].mxu1 %v1096_v47 }
 0x10c   :  { %v391_v49 = vpop.f32.mrb[0].mxu0  ;;  %v455_v50 = vpop.f32.mrb[0].mxu1 }
 0x10d   :  { %v392_v51 = vadd.f32 %v1303_v48, %v391_v49  ;;  %v456_v52 = vadd.f32 %v1303_v48, %v455_v50  ;;  %v393_v53 = vpop.f32.mrb[1].mxu0  ;;  %v457_v54 = vpop.f32.mrb[1].mxu1 }
 0x10e   :  { %v394_v55 = vpop.f32.mrb[2].mxu0  ;;  %v458_v56 = vpop.f32.mrb[2].mxu1 }
 0x10f   :  { %v518_v57 = vmul.f32 0.2, %v392_v51  ;;  %v534_v58 = vmul.f32 0.2, %v456_v52  ;;  %v395_v59 = vadd.f32 %v1303_v48, %v394_v55  ;;  %v459_v60 = vadd.f32 %v1303_v48, %v458_v56  ;;  %v396_v61 = vpop.f32.mrb[3].mxu0  ;;  %v460_v62 = vpop.f32.mrb[3].mxu1 }
 0x111   :  { %v550_v63 = vmax.f32 %v392_v51, %v518_v57  ;;  %v566_v1 = vmax.f32 %v456_v52, %v534_v58  ;;  %v519_v2 = vmul.f32 0.2, %v395_v59  ;;  %v535_v3 = vmul.f32 0.2, %v459_v60 }
 0x113   :  { %v551_v4 = vmax.f32 %v395_v59, %v519_v2  ;;  %v567_v5 = vmax.f32 %v459_v60, %v535_v3  ;;  %v587_v6 = vadd.f32 %v1312_v0, %v550_v63  ;;  %v603_v7 = vadd.f32 %v1312_v0, %v566_v1 }
 0x114   :  { %v399_v8 = vpop.f32.mrb[4].mxu0  ;;  %v463_v9 = vpop.f32.mrb[4].mxu1 }
 0x115   :  { %v588_v10 = vadd.f32 %v1312_v0, %v551_v4  ;;  %v604_v11 = vadd.f32 %v1312_v0, %v567_v5  ;;  %v400_v12 = vadd.f32 %v1303_v48, %v399_v8  ;;  %v464_v13 = vadd.f32 %v1303_v48, %v463_v9  ;;  %v401_v14 = vpop.f32.mrb[5].mxu0  ;;  %v465_v15 = vpop.f32.mrb[5].mxu1 }
 0x116   :  { %v402_v16 = vpop.f32.mrb[6].mxu0  ;;  %v466_v17 = vpop.f32.mrb[6].mxu1 }
 0x117   :  { %v914_v18 = vpack.c.bf16 %v588_v10, %v587_v6  ;;  %v954_v19 = vpack.c.bf16 %v604_v11, %v603_v7  ;;  %v520_v20 = vmul.f32 0.2, %v400_v12  ;;  %v536_v21 = vmul.f32 0.2, %v464_v13  ;;  %v404_v22 = vpop.f32.mrb[7].mxu0  ;;  %v468_v23 = vpop.f32.mrb[7].mxu1 }
 0x118   :  { %v403_v24 = vadd.f32 %v1303_v48, %v402_v16  ;;  %v467_v25 = vadd.f32 %v1303_v48, %v466_v17 }
 0x119   :  { %915 = vst [vmem:[%s1425_s3] sm:$0xff] %v914_v18   ;;  %998 = vst [vmem:[%s1425_s3 + $0x40] sm:$0xff] %v954_v19   ;;  %v552_v26 = vmax.f32 %v400_v12, %v520_v20  ;;  %v568_v27 = vmax.f32 %v464_v13, %v536_v21 }
 0x11a   :  { %v521_v28 = vmul.f32 0.2, %v403_v24  ;;  %v537_v29 = vmul.f32 0.2, %v467_v25 }
 0x11b   :  { %v589_v38 = vadd.f32 %v1312_v0, %v552_v26  ;;  %v605_v39 = vadd.f32 %v1312_v0, %v568_v27 }
 0x11c   :  { %v553_v30 = vmax.f32 %v403_v24, %v521_v28  ;;  %v569_v31 = vmax.f32 %v467_v25, %v537_v29  ;;  %v407_v32 = vpop.f32.mrb[8].mxu0  ;;  %v471_v33 = vpop.f32.mrb[8].mxu1 }
 0x11d   :  { %v408_v34 = vadd.f32 %v1303_v48, %v407_v32  ;;  %v472_v35 = vadd.f32 %v1303_v48, %v471_v33  ;;  %v409_v36 = vpop.f32.mrb[9].mxu0  ;;  %v473_v37 = vpop.f32.mrb[9].mxu1 }
 0x11e   :  { %v590_v40 = vadd.f32 %v1312_v0, %v553_v30  ;;  %v606_v41 = vadd.f32 %v1312_v0, %v569_v31  ;;  %v410_v42 = vpop.f32.mrb[10].mxu0  ;;  %v474_v43 = vpop.f32.mrb[10].mxu1 }
 0x11f   :  { %v522_v44 = vmul.f32 0.2, %v408_v34  ;;  %v538_v45 = vmul.f32 0.2, %v472_v35  ;;  %v411_v46 = vadd.f32 %v1303_v48, %v410_v42  ;;  %v475_v47 = vadd.f32 %v1303_v48, %v474_v43  ;;  %v412_v49 = vpop.f32.mrb[11].mxu0  ;;  %v476_v50 = vpop.f32.mrb[11].mxu1 }
 0x120   :  { %v919_v51 = vpack.c.bf16 %v590_v40, %v589_v38  ;;  %v959_v52 = vpack.c.bf16 %v606_v41, %v605_v39 }
 0x121   :  { %v554_v53 = vmax.f32 %v408_v34, %v522_v44  ;;  %v570_v54 = vmax.f32 %v472_v35, %v538_v45  ;;  %v523_v55 = vmul.f32 0.2, %v411_v46  ;;  %v539_v56 = vmul.f32 0.2, %v475_v47 }
 0x122   :  { %991 = vst [vmem:[%s1425_s3 + $0x8] sm:$0xff] %v919_v51   ;;  %999 = vst [vmem:[%s1425_s3 + $0x48] sm:$0xff] %v959_v52  }
 0x123   :  { %v555_v57 = vmax.f32 %v411_v46, %v523_v55  ;;  %v571_v58 = vmax.f32 %v475_v47, %v539_v56  ;;  %v591_v59 = vadd.f32 %v1312_v0, %v554_v53  ;;  %v607_v60 = vadd.f32 %v1312_v0, %v570_v54 }
 0x124   :  { %v415_v61 = vpop.f32.mrb[12].mxu0  ;;  %v479_v62 = vpop.f32.mrb[12].mxu1 }
 0x125   :  { %v592_v63 = vadd.f32 %v1312_v0, %v555_v57  ;;  %v608_v1 = vadd.f32 %v1312_v0, %v571_v58  ;;  %v416_v2 = vadd.f32 %v1303_v48, %v415_v61  ;;  %v480_v3 = vadd.f32 %v1303_v48, %v479_v62  ;;  %v417_v4 = vpop.f32.mrb[13].mxu0  ;;  %v481_v5 = vpop.f32.mrb[13].mxu1 }
 0x126   :  { %v418_v6 = vpop.f32.mrb[14].mxu0  ;;  %v482_v7 = vpop.f32.mrb[14].mxu1 }
 0x127   :  { %v924_v8 = vpack.c.bf16 %v592_v63, %v591_v59  ;;  %v964_v9 = vpack.c.bf16 %v608_v1, %v607_v60  ;;  %v524_v10 = vmul.f32 0.2, %v416_v2  ;;  %v540_v11 = vmul.f32 0.2, %v480_v3  ;;  %v420_v12 = vpop.f32.mrb[15].mxu0  ;;  %v484_v13 = vpop.f32.mrb[15].mxu1 }
 0x128   :  { %v419_v14 = vadd.f32 %v1303_v48, %v418_v6  ;;  %v483_v15 = vadd.f32 %v1303_v48, %v482_v7 }
 0x129   :  { %992 = vst [vmem:[%s1425_s3 + $0x10] sm:$0xff] %v924_v8   ;;  %1000 = vst [vmem:[%s1425_s3 + $0x50] sm:$0xff] %v964_v9   ;;  %v556_v16 = vmax.f32 %v416_v2, %v524_v10  ;;  %v572_v17 = vmax.f32 %v480_v3, %v540_v11 }
 0x12a   :  { %v525_v18 = vmul.f32 0.2, %v419_v14  ;;  %v541_v19 = vmul.f32 0.2, %v483_v15 }
 0x12b   :  { %v593_v28 = vadd.f32 %v1312_v0, %v556_v16  ;;  %v609_v29 = vadd.f32 %v1312_v0, %v572_v17 }
 0x12c   :  { %v557_v20 = vmax.f32 %v419_v14, %v525_v18  ;;  %v573_v21 = vmax.f32 %v483_v15, %v541_v19  ;;  %v423_v22 = vpop.f32.mrb[16].mxu0  ;;  %v487_v23 = vpop.f32.mrb[16].mxu1 }
 0x12d   :  { %v424_v24 = vadd.f32 %v1303_v48, %v423_v22  ;;  %v488_v25 = vadd.f32 %v1303_v48, %v487_v23  ;;  %v425_v26 = vpop.f32.mrb[17].mxu0  ;;  %v489_v27 = vpop.f32.mrb[17].mxu1 }
 0x12e   :  { %v594_v30 = vadd.f32 %v1312_v0, %v557_v20  ;;  %v610_v31 = vadd.f32 %v1312_v0, %v573_v21  ;;  %v426_v32 = vpop.f32.mrb[18].mxu0  ;;  %v490_v33 = vpop.f32.mrb[18].mxu1 }
 0x12f   :  { %v526_v34 = vmul.f32 0.2, %v424_v24  ;;  %v542_v35 = vmul.f32 0.2, %v488_v25  ;;  %v427_v36 = vadd.f32 %v1303_v48, %v426_v32  ;;  %v491_v37 = vadd.f32 %v1303_v48, %v490_v33  ;;  %v428_v38 = vpop.f32.mrb[19].mxu0  ;;  %v492_v39 = vpop.f32.mrb[19].mxu1 }
 0x130   :  { %v929_v40 = vpack.c.bf16 %v594_v30, %v593_v28  ;;  %v969_v41 = vpack.c.bf16 %v610_v31, %v609_v29 }
 0x131   :  { %v558_v42 = vmax.f32 %v424_v24, %v526_v34  ;;  %v574_v43 = vmax.f32 %v488_v25, %v542_v35  ;;  %v527_v44 = vmul.f32 0.2, %v427_v36  ;;  %v543_v45 = vmul.f32 0.2, %v491_v37 }
 0x132   :  { %993 = vst [vmem:[%s1425_s3 + $0x18] sm:$0xff] %v929_v40   ;;  %1001 = vst [vmem:[%s1425_s3 + $0x58] sm:$0xff] %v969_v41  }
 0x133   :  { %v559_v46 = vmax.f32 %v427_v36, %v527_v44  ;;  %v575_v47 = vmax.f32 %v491_v37, %v543_v45  ;;  %v595_v49 = vadd.f32 %v1312_v0, %v558_v42  ;;  %v611_v50 = vadd.f32 %v1312_v0, %v574_v43 }
 0x134   :  { %v431_v51 = vpop.f32.mrb[20].mxu0  ;;  %v495_v52 = vpop.f32.mrb[20].mxu1 }
 0x135   :  { %v596_v53 = vadd.f32 %v1312_v0, %v559_v46  ;;  %v612_v54 = vadd.f32 %v1312_v0, %v575_v47  ;;  %v432_v55 = vadd.f32 %v1303_v48, %v431_v51  ;;  %v496_v56 = vadd.f32 %v1303_v48, %v495_v52  ;;  %v433_v57 = vpop.f32.mrb[21].mxu0  ;;  %v497_v58 = vpop.f32.mrb[21].mxu1 }
 0x136   :  { %v434_v59 = vpop.f32.mrb[22].mxu0  ;;  %v498_v60 = vpop.f32.mrb[22].mxu1 }
 0x137   :  { %v934_v61 = vpack.c.bf16 %v596_v53, %v595_v49  ;;  %v974_v62 = vpack.c.bf16 %v612_v54, %v611_v50  ;;  %v528_v63 = vmul.f32 0.2, %v432_v55  ;;  %v544_v1 = vmul.f32 0.2, %v496_v56  ;;  %v436_v2 = vpop.f32.mrb[23].mxu0  ;;  %v500_v3 = vpop.f32.mrb[23].mxu1 }
 0x138   :  { %v435_v4 = vadd.f32 %v1303_v48, %v434_v59  ;;  %v499_v5 = vadd.f32 %v1303_v48, %v498_v60 }
 0x139   :  { %994 = vst [vmem:[%s1425_s3 + $0x20] sm:$0xff] %v934_v61   ;;  %1002 = vst [vmem:[%s1425_s3 + $0x60] sm:$0xff] %v974_v62   ;;  %v560_v6 = vmax.f32 %v432_v55, %v528_v63  ;;  %v576_v7 = vmax.f32 %v496_v56, %v544_v1 }
 0x13a   :  { %v529_v8 = vmul.f32 0.2, %v435_v4  ;;  %v545_v9 = vmul.f32 0.2, %v499_v5 }
 0x13b   :  { %v597_v18 = vadd.f32 %v1312_v0, %v560_v6  ;;  %v613_v19 = vadd.f32 %v1312_v0, %v576_v7 }
 0x13c   :  { %v561_v10 = vmax.f32 %v435_v4, %v529_v8  ;;  %v577_v11 = vmax.f32 %v499_v5, %v545_v9  ;;  %v439_v12 = vpop.f32.mrb[24].mxu0  ;;  %v503_v13 = vpop.f32.mrb[24].mxu1 }
 0x13d   :  { %v440_v14 = vadd.f32 %v1303_v48, %v439_v12  ;;  %v504_v15 = vadd.f32 %v1303_v48, %v503_v13  ;;  %v441_v16 = vpop.f32.mrb[25].mxu0  ;;  %v505_v17 = vpop.f32.mrb[25].mxu1 }
 0x13e   :  { %v598_v20 = vadd.f32 %v1312_v0, %v561_v10  ;;  %v614_v21 = vadd.f32 %v1312_v0, %v577_v11  ;;  %v442_v22 = vpop.f32.mrb[26].mxu0  ;;  %v506_v23 = vpop.f32.mrb[26].mxu1 }
 0x13f   :  { %v530_v24 = vmul.f32 0.2, %v440_v14  ;;  %v546_v25 = vmul.f32 0.2, %v504_v15  ;;  %v443_v26 = vadd.f32 %v1303_v48, %v442_v22  ;;  %v507_v27 = vadd.f32 %v1303_v48, %v506_v23  ;;  %v444_v28 = vpop.f32.mrb[27].mxu0  ;;  %v508_v29 = vpop.f32.mrb[27].mxu1 }
 0x140   :  { %v939_v30 = vpack.c.bf16 %v598_v20, %v597_v18  ;;  %v979_v31 = vpack.c.bf16 %v614_v21, %v613_v19 }
 0x141   :  { %v562_v32 = vmax.f32 %v440_v14, %v530_v24  ;;  %v578_v33 = vmax.f32 %v504_v15, %v546_v25  ;;  %v531_v34 = vmul.f32 0.2, %v443_v26  ;;  %v547_v35 = vmul.f32 0.2, %v507_v27 }
 0x142   :  { %995 = vst [vmem:[%s1425_s3 + $0x28] sm:$0xff] %v939_v30   ;;  %1003 = vst [vmem:[%s1425_s3 + $0x68] sm:$0xff] %v979_v31  }
 0x143   :  { %v563_v36 = vmax.f32 %v443_v26, %v531_v34  ;;  %v579_v37 = vmax.f32 %v507_v27, %v547_v35  ;;  %v599_v38 = vadd.f32 %v1312_v0, %v562_v32  ;;  %v615_v39 = vadd.f32 %v1312_v0, %v578_v33 }
 0x144   :  { %v447_v40 = vpop.f32.mrb[28].mxu0  ;;  %v511_v41 = vpop.f32.mrb[28].mxu1 }
 0x145   :  { %v600_v42 = vadd.f32 %v1312_v0, %v563_v36  ;;  %v616_v43 = vadd.f32 %v1312_v0, %v579_v37  ;;  %v448_v44 = vadd.f32 %v1303_v48, %v447_v40  ;;  %v512_v45 = vadd.f32 %v1303_v48, %v511_v41  ;;  %v449_v46 = vpop.f32.mrb[29].mxu0  ;;  %v513_v47 = vpop.f32.mrb[29].mxu1 }
 0x146   :  { %v450_v49 = vpop.f32.mrb[30].mxu0  ;;  %v514_v50 = vpop.f32.mrb[30].mxu1 }
 0x147   :  { %v944_v51 = vpack.c.bf16 %v600_v42, %v599_v38  ;;  %v984_v52 = vpack.c.bf16 %v616_v43, %v615_v39  ;;  %v532_v53 = vmul.f32 0.2, %v448_v44  ;;  %v548_v54 = vmul.f32 0.2, %v512_v45  ;;  %v452_v55 = vpop.f32.mrb[31].mxu0  ;;  %v516_v56 = vpop.f32.mrb[31].mxu1 }
 0x148   :  { %v451_v57 = vadd.f32 %v1303_v48, %v450_v49  ;;  %v515_v58 = vadd.f32 %v1303_v48, %v514_v50 }
 0x149   :  { %996 = vst [vmem:[%s1425_s3 + $0x30] sm:$0xff] %v944_v51   ;;  %1004 = vst [vmem:[%s1425_s3 + $0x70] sm:$0xff] %v984_v52   ;;  %v564_v59 = vmax.f32 %v448_v44, %v532_v53  ;;  %v580_v60 = vmax.f32 %v512_v45, %v548_v54 }
 0x14a   :  { %v533_v61 = vmul.f32 0.2, %v451_v57  ;;  %v549_v62 = vmul.f32 0.2, %v515_v58 }
 0x14b   :  { %v601_v2 = vadd.f32 %v1312_v0, %v564_v59  ;;  %v617_v3 = vadd.f32 %v1312_v0, %v580_v60 }
 0x14c   :  { %v565_v63 = vmax.f32 %v451_v57, %v533_v61  ;;  %v581_v1 = vmax.f32 %v515_v58, %v549_v62 }
 0x14e   :  { %v602_v48 = vadd.f32 %v1312_v0, %v565_v63  ;;  %v618_v4 = vadd.f32 %v1312_v0, %v581_v1 }
 0x150   :  { %v949_v5 = vpack.c.bf16 %v602_v48, %v601_v2  ;;  %v989_v6 = vpack.c.bf16 %v618_v4, %v617_v3 }
 0x152   :  { %997 = vst [vmem:[%s1425_s3 + $0x38] sm:$0xff] %v949_v5   ;;  %1005 = vst [vmem:[%s1425_s3 + $0x78] sm:$0xff] %v989_v6  }

// kernel: discriminator_aux_gan.6
= control target key start
LH: loop header
LB: loop body
LE: loop exit
PB: predicated region body
PF: predicated region fallthrough
CT: control target
= control target key end

     0   :  { %vm556_vm0 = vcmask 523264   ;;  %s1796_s1 = inlined_call_operand.vmem [shape: bf16[576,128], index: 1, kind: input, shape index: {}]   ;;  %s1797_s0 = inlined_call_operand.vmem [shape: bf16[128,576], index: 0, kind: input, shape index: {}]   ;;  %s1798_s2 = inlined_call_operand.vmem [shape: f32[2,128], index: 2, kind: input, shape index: {}]   ;;  %s1799_s3 = inlined_call_operand.vmem [shape: bf16[128,128], index: 3, kind: output, shape index: {}]  }
   0x1   :  { %v1346_v0 = vld [vmem:[%s1796_s1 + $0x40] sm:$0xff]   ;;  %v1350_v4 = vld [vmem:[%s1796_s1 + $0x48] sm:$0xff]   ;;  %v1354_v8 = vld [vmem:[%s1796_s1 + $0x50] sm:$0xff]  }
   0x2   :  { %v1347_v1 = vld [vmem:[%s1796_s1 + $0xc0] sm:$0xff]   ;;  %1174 = vmatprep.subr.bf16.mxu0 %v1346_v0  ;;  %v1351_v5 = vld [vmem:[%s1796_s1 + $0xc8] sm:$0xff]   ;;  %v1355_v9 = vld [vmem:[%s1796_s1 + $0xd0] sm:$0xff]  }
   0x3   :  { %v1348_v2 = vld [vmem:[%s1796_s1] sm:$0xff]   ;;  %1238 = vmatprep.subr.bf16.mxu1 %v1347_v1  ;;  %v1352_v6 = vld [vmem:[%s1796_s1 + $0x8] sm:$0xff]   ;;  %v1356_v10 = vld [vmem:[%s1796_s1 + $0x10] sm:$0xff]  }
   0x4   :  { %v1349_v3 = vld [vmem:[%s1796_s1 + $0x80] sm:$0xff]   ;;  %1175 = vmatpush3.bf16.msra.mxu0 %v1348_v2  ;;  %v1353_v7 = vld [vmem:[%s1796_s1 + $0x88] sm:$0xff]   ;;  %v1357_v11 = vld [vmem:[%s1796_s1 + $0x90] sm:$0xff]  }
   0x5   :  { %1239 = vmatpush3.bf16.msra.mxu1 %v1349_v3  ;;  %1176 = vmatprep.subr.bf16.mxu0 %v1350_v4  ;;  %v1358_v12 = vld [vmem:[%s1796_s1 + $0x58] sm:$0xff]   ;;  %v1362_v16 = vld [vmem:[%s1796_s1 + $0x60] sm:$0xff]   ;;  %v1366_v20 = vld [vmem:[%s1796_s1 + $0x68] sm:$0xff]  }
   0x6   :  { %1240 = vmatprep.subr.bf16.mxu1 %v1351_v5  ;;  %v1359_v13 = vld [vmem:[%s1796_s1 + $0xd8] sm:$0xff]   ;;  %v1363_v17 = vld [vmem:[%s1796_s1 + $0xe0] sm:$0xff]   ;;  %v1367_v21 = vld [vmem:[%s1796_s1 + $0xe8] sm:$0xff]  }
   0x7   :  { %v1360_v14 = vld [vmem:[%s1796_s1 + $0x18] sm:$0xff]   ;;  %v1364_v18 = vld [vmem:[%s1796_s1 + $0x20] sm:$0xff]   ;;  %v1368_v22 = vld [vmem:[%s1796_s1 + $0x28] sm:$0xff]  }
   0x8   :  { %1177 = vmatpush3.bf16.msra.mxu0 %v1352_v6  ;;  %v1361_v15 = vld [vmem:[%s1796_s1 + $0x98] sm:$0xff]   ;;  %v1365_v19 = vld [vmem:[%s1796_s1 + $0xa0] sm:$0xff]   ;;  %v1369_v23 = vld [vmem:[%s1796_s1 + $0xa8] sm:$0xff]  }
   0x9   :  { %1241 = vmatpush3.bf16.msra.mxu1 %v1353_v7  ;;  %1178 = vmatprep.subr.bf16.mxu0 %v1354_v8  ;;  %v1370_v24 = vld [vmem:[%s1796_s1 + $0x70] sm:$0xff]   ;;  %v1374_v28 = vld [vmem:[%s1796_s1 + $0x78] sm:$0xff]   ;;  %v1383_v35 = vld [vmem:[%s1797_s0 + $0xc] ss:$20 sps:$4 sm:$0xff]  }
   0xa   :  { %1242 = vmatprep.subr.bf16.mxu1 %v1355_v9  ;;  %v1371_v25 = vld [vmem:[%s1796_s1 + $0xf0] sm:$0xff]   ;;  %v1375_v29 = vld [vmem:[%s1796_s1 + $0xf8] sm:$0xff]   ;;  %v1384_v36 = vld [vmem:[%s1796_s1 + $0x100] sm:$0xff]   ;;  %710 = vmatprep.mubr.bf16.mxu1 %v1383_v35 }
   0xb   :  { %v1372_v26 = vld [vmem:[%s1796_s1 + $0x30] sm:$0xff]   ;;  %v1376_v30 = vld [vmem:[%s1796_s1 + $0x38] sm:$0xff]   ;;  %v1385_v37 = vld [vmem:[%s1797_s0 + $0x2c] ss:$20 sps:$4 sm:$0xff]  }
   0xc   :  { %1179 = vmatpush3.bf16.msra.mxu0 %v1356_v10  ;;  %v1373_v27 = vld [vmem:[%s1796_s1 + $0xb0] sm:$0xff]   ;;  %v1377_v31 = vld [vmem:[%s1796_s1 + $0xb8] sm:$0xff]   ;;  %v1397_v42 = vld [vmem:[%s1796_s1 + $0x108] sm:$0xff]  }
   0xd   :  { %1243 = vmatpush3.bf16.msra.mxu1 %v1357_v11  ;;  %1180 = vmatprep.subr.bf16.mxu0 %v1358_v12  ;;  %v1378_v32 = vld [vmem:[%s1797_s0] ss:$20 sps:$4 sm:$0xff]   ;;  %v1380_v33 = vld [vmem:[%s1797_s0 + $0x4] ss:$20 sps:$4 sm:$0xff]   ;;  %v1381_v34 = vld [vmem:[%s1797_s0 + $0x8] ss:$20 sps:$4 sm:$0xff]  }
   0xe   :  { %1244 = vmatprep.subr.bf16.mxu1 %v1359_v13  ;;  %613 = vmatprep.mubr.bf16.mxu0 %v1380_v33  ;;  %v1387_v38 = vld [vmem:[%s1797_s0 + $0x34] ss:$20 sps:$4 sm:$0xff]   ;;  %v1390_v40 = vld [vmem:[%s1797_s0 + $0x30] ss:$20 sps:$4 sm:$0xff]   ;;  %v1396_v45 = vld [vmem:[%s1797_s0 + $0x58] ss:$20 sps:$4 sm:$0xff]  }
   0xf   :  { %v1389_v39 = vld [vmem:[%s1797_s0 + $0x28] ss:$20 sps:$4 sm:$0xff]   ;;  %v1395_v44 = vld [vmem:[%s1797_s0 + $0x50] ss:$20 sps:$4 sm:$0xff]   ;;  %v1402_v50 = vld [vmem:[%s1797_s0 + $0x78] ss:$20 sps:$4 sm:$0xff]  }
  0x10   :  { %1181 = vmatpush3.bf16.msra.mxu0 %v1360_v14  ;;  %v1391_v41 = vld [vmem:[%s1797_s0 + $0x54] ss:$20 sps:$4 sm:$0xff]   ;;  %v1393_v43 = vld [vmem:[%s1797_s0 + $0x5c] ss:$20 sps:$4 sm:$0xff]   ;;  %v1400_v48 = vld [vmem:[%s1797_s0 + $0x84] ss:$20 sps:$4 sm:$0xff]  }
  0x11   :  { %1245 = vmatpush3.bf16.msra.mxu1 %v1361_v15  ;;  %1182 = vmatprep.subr.bf16.mxu0 %v1362_v16  ;;  %v1410_v46 = vld [vmem:[%s1796_s1 + $0x110] sm:$0xff]   ;;  %v1423_v49 = vld [vmem:[%s1796_s1 + $0x118] sm:$0xff]   ;;  %v1406_v53 = vld [vmem:[%s1797_s0 + $0xac] ss:$20 sps:$4 sm:$0xff]  }
  0x12   :  { %1246 = vmatprep.subr.bf16.mxu1 %v1363_v17  ;;  %v1398_v47 = vld [vmem:[%s1797_s0 + $0x7c] ss:$20 sps:$4 sm:$0xff]   ;;  %v1403_v51 = vld [vmem:[%s1797_s0 + $0x80] ss:$20 sps:$4 sm:$0xff]   ;;  %v1404_v52 = vld [vmem:[%s1797_s0 + $0xa4] ss:$20 sps:$4 sm:$0xff]  }
  0x13   :  { %v1408_v54 = vld [vmem:[%s1797_s0 + $0xa0] ss:$20 sps:$4 sm:$0xff]   ;;  %v1409_v55 = vld [vmem:[%s1797_s0 + $0xa8] ss:$20 sps:$4 sm:$0xff]   ;;  %v1416_v59 = vld [vmem:[%s1797_s0 + $0xd0] ss:$20 sps:$4 sm:$0xff]  }
  0x14   :  { %1183 = vmatpush3.bf16.msra.mxu0 %v1364_v18  ;;  %v1411_v56 = vld [vmem:[%s1797_s0 + $0xcc] ss:$20 sps:$4 sm:$0xff]   ;;  %v1413_v57 = vld [vmem:[%s1797_s0 + $0xd4] ss:$20 sps:$4 sm:$0xff]   ;;  %v1419_v61 = vld [vmem:[%s1797_s0 + $0xfc] ss:$20 sps:$4 sm:$0xff]  }
  0x15   :  { %1247 = vmatpush3.bf16.msra.mxu1 %v1365_v19  ;;  %1184 = vmatprep.subr.bf16.mxu0 %v1366_v20  ;;  %v1415_v58 = vld [vmem:[%s1797_s0 + $0xc8] ss:$20 sps:$4 sm:$0xff]   ;;  %v1421_v62 = vld [vmem:[%s1797_s0 + $0xf0] ss:$20 sps:$4 sm:$0xff]   ;;  %v1422_v63 = vld [vmem:[%s1797_s0 + $0xf8] ss:$20 sps:$4 sm:$0xff]  }
  0x16   :  { %1248 = vmatprep.subr.bf16.mxu1 %v1367_v21  ;;  %v1417_v60 = vld [vmem:[%s1797_s0 + $0xf4] ss:$20 sps:$4 sm:$0xff]   ;;  %v1424_v0 = vld [vmem:[%s1797_s0 + $0x11c] ss:$20 sps:$4 sm:$0xff]   ;;  %v1426_v1 = vld [vmem:[%s1797_s0 + $0x124] ss:$20 sps:$4 sm:$0xff]  }
  0x17   :  { %v1428_v2 = vld [vmem:[%s1797_s0 + $0x118] ss:$20 sps:$4 sm:$0xff]   ;;  %v1429_v3 = vld [vmem:[%s1797_s0 + $0x120] ss:$20 sps:$4 sm:$0xff]   ;;  %v1430_v4 = vld [vmem:[%s1797_s0 + $0x10] ss:$20 sps:$4 sm:$0xff]  }
  0x18   :  { %1185 = vmatpush3.bf16.msra.mxu0 %v1368_v22  ;;  %v1431_v5 = vld [vmem:[%s1797_s0 + $0xb0] ss:$20 sps:$4 sm:$0xff]   ;;  %v1432_v6 = vld [vmem:[%s1797_s0 + $0x38] ss:$20 sps:$4 sm:$0xff]   ;;  %v1434_v8 = vld [vmem:[%s1797_s0 + $0x60] ss:$20 sps:$4 sm:$0xff]  }
  0x19   :  { %1249 = vmatpush3.bf16.msra.mxu1 %v1369_v23  ;;  %1186 = vmatprep.subr.bf16.mxu0 %v1370_v24  ;;  %v1433_v7 = vld [vmem:[%s1797_s0 + $0xd8] ss:$20 sps:$4 sm:$0xff]   ;;  %v1435_v9 = vld [vmem:[%s1797_s0 + $0x100] ss:$20 sps:$4 sm:$0xff]   ;;  %v1436_v10 = vld [vmem:[%s1797_s0 + $0x88] ss:$20 sps:$4 sm:$0xff]  }
  0x1a   :  { %1250 = vmatprep.subr.bf16.mxu1 %v1371_v25  ;;  %v1437_v11 = vld [vmem:[%s1797_s0 + $0x128] ss:$20 sps:$4 sm:$0xff]   ;;  %v1697_v14 = vld [vmem:[%s1798_s2] ss:$0 sm:$0xff] }
  0x1c   :  { %1187 = vmatpush3.bf16.msra.mxu0 %v1372_v26 }
  0x1d   :  { %1251 = vmatpush3.bf16.msra.mxu1 %v1373_v27  ;;  %1188 = vmatprep.subr.bf16.mxu0 %v1374_v28 }
  0x1e   :  { %1252 = vmatprep.subr.bf16.mxu1 %v1375_v29 }
  0x20   :  { %1189 = vmatpush3.bf16.msra.mxu0 %v1376_v30 }
  0x21   :  { %1253 = vmatpush3.bf16.msra.mxu1 %v1377_v31  ;;  %1314 = vmatprep.subr.bf16.mxu0 %v1384_v36 }
  0x22   :  { %1338 = vmatprep.subr.bf16.mxu1 %v1384_v36 }
  0x23   :  { %614 = vmatmul.mubr.bf16.vlgmr.msra.gmra.mrb[0].mxu0 %v1378_v32 }
  0x24   :  { %711 = vmatmul.mubr.bf16.vlgmr.msra.gmra.mrb[0].mxu1 %v1381_v34  ;;  %1315 = vmatpush3.bf16.msra.mxu0 %v1384_v36 }
  0x25   :  { %1342 = vmatpush3.bf16.msra.mxu1 %v1384_v36  ;;  %621 = vmatprep.mubr.bf16.mxu0 %v1385_v37 }
  0x26   :  { %718 = vmatprep.mubr.bf16.mxu1 %v1387_v38  ;;  %1316 = vmatprep.subr.bf16.mxu0 %v1397_v42 }
  0x27   :  { %1339 = vmatprep.subr.bf16.mxu1 %v1397_v42 }
  0x28   :  { %1317 = vmatpush3.bf16.msra.mxu0 %v1397_v42 }
  0x29   :  { %1343 = vmatpush3.bf16.msra.mxu1 %v1397_v42  ;;  %1318 = vmatprep.subr.bf16.mxu0 %v1410_v46 }
  0x2a   :  { %1340 = vmatprep.subr.bf16.mxu1 %v1410_v46 }
  0x2b   :  { %622 = vmatmul.mubr.bf16.gmra.mrb[4].mxu0 %v1389_v39 }
  0x2c   :  { %719 = vmatmul.mubr.bf16.gmra.mrb[4].mxu1 %v1390_v40  ;;  %629 = vmatprep.mubr.bf16.mxu0 %v1391_v41 }
  0x2d   :  { %726 = vmatprep.mubr.bf16.mxu1 %v1393_v43  ;;  %1319 = vmatpush3.bf16.msra.mxu0 %v1410_v46 }
  0x2e   :  { %1344 = vmatpush3.bf16.msra.mxu1 %v1410_v46  ;;  %1320 = vmatprep.subr.bf16.mxu0 %v1423_v49 }
  0x2f   :  { %1341 = vmatprep.subr.bf16.mxu1 %v1423_v49 }
  0x31   :  { %1321 = vmatpush3.bf16.msra.mxu0 %v1423_v49 }
  0x32   :  { %1345 = vmatpush3.bf16.msra.mxu1 %v1423_v49 }
  0x33   :  { %630 = vmatmul.mubr.bf16.gmra.mrb[8].mxu0 %v1395_v44 }
  0x34   :  { %727 = vmatmul.mubr.bf16.gmra.mrb[8].mxu1 %v1396_v45  ;;  %637 = vmatprep.mubr.bf16.mxu0 %v1398_v47 }
  0x35   :  { %734 = vmatprep.mubr.bf16.mxu1 %v1400_v48 }
  0x3b   :  { %638 = vmatmul.mubr.bf16.gmra.mrb[12].mxu0 %v1402_v50 }
  0x3c   :  { %735 = vmatmul.mubr.bf16.gmra.mrb[12].mxu1 %v1403_v51  ;;  %645 = vmatprep.mubr.bf16.mxu0 %v1404_v52 }
  0x3d   :  { %742 = vmatprep.mubr.bf16.mxu1 %v1406_v53 }
  0x43   :  { %646 = vmatmul.mubr.bf16.gmra.mrb[16].mxu0 %v1408_v54 }
  0x44   :  { %743 = vmatmul.mubr.bf16.gmra.mrb[16].mxu1 %v1409_v55  ;;  %653 = vmatprep.mubr.bf16.mxu0 %v1411_v56 }
  0x45   :  { %750 = vmatprep.mubr.bf16.mxu1 %v1413_v57 }
  0x4b   :  { %654 = vmatmul.mubr.bf16.gmra.mrb[20].mxu0 %v1415_v58 }
  0x4c   :  { %751 = vmatmul.mubr.bf16.gmra.mrb[20].mxu1 %v1416_v59  ;;  %661 = vmatprep.mubr.bf16.mxu0 %v1417_v60 }
  0x4d   :  { %758 = vmatprep.mubr.bf16.mxu1 %v1419_v61 }
  0x53   :  { %662 = vmatmul.mubr.bf16.gmra.mrb[24].mxu0 %v1421_v62 }
  0x54   :  { %759 = vmatmul.mubr.bf16.gmra.mrb[24].mxu1 %v1422_v63  ;;  %669 = vmatprep.mubr.bf16.mxu0 %v1424_v0 }
  0x55   :  { %766 = vmatprep.mubr.bf16.mxu1 %v1426_v1 }
  0x5b   :  { %670 = vmatmul.mubr.bf16.gmra.mrb[28].mxu0 %v1428_v2 }
  0x5c   :  { %767 = vmatmul.mubr.bf16.gmra.mrb[28].mxu1 %v1429_v3  ;;  %1322 = vmatprep.mubr.msk.bf16.mxu0 %vm556_vm0, %v1430_v4 }
  0x5d   :  { %1330 = vmatprep.mubr.msk.bf16.mxu1 %vm556_vm0, %v1431_v5 }
  0x63   :  { %1323 = vmatmul.mubr.msk.bf16.vlgmr.msra.gmra.mrb[32].mxu0 %vm556_vm0, %v1432_v6 }
  0x64   :  { %1331 = vmatmul.mubr.msk.bf16.vlgmr.msra.gmra.mrb[32].mxu1 %vm556_vm0, %v1433_v7  ;;  %1326 = vmatprep.mubr.msk.bf16.mxu0 %vm556_vm0, %v1434_v8 }
  0x65   :  { %1334 = vmatprep.mubr.msk.bf16.mxu1 %vm556_vm0, %v1435_v9 }
  0x6b   :  { %1327 = vmatmul.mubr.msk.bf16.gmra.mrb[36].mxu0 %vm556_vm0, %v1436_v10 }
  0x6c   :  { %1335 = vmatmul.mubr.msk.bf16.gmra.mrb[36].mxu1 %vm556_vm0, %v1437_v11 }
  0xf6   :  { %v1190_v12 = vpop.f32.mrb[0].mxu0 }
  0xf7   :  { %v1254_v13 = vpop.f32.mrb[0].mxu1  ;;  %v1191_v15 = vpop.f32.mrb[1].mxu0 }
  0xf8   :  { %v1192_v16 = vadd.f32 %v1191_v15, %v1190_v12  ;;  %v1255_v17 = vpop.f32.mrb[1].mxu1  ;;  %v1193_v18 = vpop.f32.mrb[2].mxu0 }
  0xf9   :  { %v1256_v19 = vadd.f32 %v1255_v17, %v1254_v13  ;;  %v1257_v20 = vpop.f32.mrb[2].mxu1  ;;  %v1194_v21 = vpop.f32.mrb[3].mxu0 }
  0xfa   :  { %v616_v22 = vadd.f32 %v1192_v16, %v1697_v14  ;;  %v1195_v23 = vadd.f32 %v1194_v21, %v1193_v18  ;;  %v1258_v24 = vpop.f32.mrb[3].mxu1 }
  0xfb   :  { %v1259_v25 = vadd.f32 %v1258_v24, %v1257_v20 }
  0xfc   :  { %v619_v26 = vadd.f32 %v1195_v23, %v1697_v14  ;;  %v1701_v27 = vadd.f32 %v1256_v19, %v616_v22 }
  0xfe   :  { %v1196_v28 = vpop.f32.mrb[4].mxu0  ;;  %v1703_v29 = vadd.f32 %v1259_v25, %v619_v26 }
  0xff   :  { %v1260_v30 = vpop.f32.mrb[4].mxu1  ;;  %v1197_v31 = vpop.f32.mrb[5].mxu0 }
 0x100   :  { %v1198_v32 = vadd.f32 %v1197_v31, %v1196_v28  ;;  %v1261_v33 = vpop.f32.mrb[5].mxu1  ;;  %v1199_v34 = vpop.f32.mrb[6].mxu0 }
 0x101   :  { %v1262_v35 = vadd.f32 %v1261_v33, %v1260_v30  ;;  %v1263_v36 = vpop.f32.mrb[6].mxu1  ;;  %v1200_v37 = vpop.f32.mrb[7].mxu0 }
 0x102   :  { %v624_v38 = vadd.f32 %v1198_v32, %v1697_v14  ;;  %v1201_v39 = vadd.f32 %v1200_v37, %v1199_v34  ;;  %v1264_v40 = vpop.f32.mrb[7].mxu1 }
 0x103   :  { %v1265_v41 = vadd.f32 %v1264_v40, %v1263_v36 }
 0x104   :  { %v627_v42 = vadd.f32 %v1201_v39, %v1697_v14  ;;  %v1707_v43 = vadd.f32 %v1262_v35, %v624_v38 }
 0x106   :  { %v1202_v44 = vpop.f32.mrb[8].mxu0  ;;  %v1709_v45 = vadd.f32 %v1265_v41, %v627_v42 }
 0x107   :  { %v1266_v46 = vpop.f32.mrb[8].mxu1  ;;  %v1203_v47 = vpop.f32.mrb[9].mxu0 }
 0x108   :  { %v1204_v48 = vadd.f32 %v1203_v47, %v1202_v44  ;;  %v1267_v49 = vpop.f32.mrb[9].mxu1  ;;  %v1205_v50 = vpop.f32.mrb[10].mxu0 }
 0x109   :  { %v1268_v51 = vadd.f32 %v1267_v49, %v1266_v46  ;;  %v1269_v52 = vpop.f32.mrb[10].mxu1  ;;  %v1206_v53 = vpop.f32.mrb[11].mxu0 }
 0x10a   :  { %v632_v54 = vadd.f32 %v1204_v48, %v1697_v14  ;;  %v1207_v55 = vadd.f32 %v1206_v53, %v1205_v50  ;;  %v1270_v56 = vpop.f32.mrb[11].mxu1 }
 0x10b   :  { %v1271_v57 = vadd.f32 %v1270_v56, %v1269_v52 }
 0x10c   :  { %v635_v58 = vadd.f32 %v1207_v55, %v1697_v14  ;;  %v1713_v59 = vadd.f32 %v1268_v51, %v632_v54 }
 0x10e   :  { %v1208_v60 = vpop.f32.mrb[12].mxu0  ;;  %v1715_v61 = vadd.f32 %v1271_v57, %v635_v58 }
 0x10f   :  { %v1272_v62 = vpop.f32.mrb[12].mxu1  ;;  %v1209_v63 = vpop.f32.mrb[13].mxu0 }
 0x110   :  { %v1210_v0 = vadd.f32 %v1209_v63, %v1208_v60  ;;  %v1273_v1 = vpop.f32.mrb[13].mxu1  ;;  %v1211_v2 = vpop.f32.mrb[14].mxu0 }
 0x111   :  { %v1274_v3 = vadd.f32 %v1273_v1, %v1272_v62  ;;  %v1275_v4 = vpop.f32.mrb[14].mxu1  ;;  %v1212_v5 = vpop.f32.mrb[15].mxu0 }
 0x112   :  { %v640_v6 = vadd.f32 %v1210_v0, %v1697_v14  ;;  %v1213_v7 = vadd.f32 %v1212_v5, %v1211_v2  ;;  %v1276_v8 = vpop.f32.mrb[15].mxu1 }
 0x113   :  { %v1277_v9 = vadd.f32 %v1276_v8, %v1275_v4 }
 0x114   :  { %v643_v10 = vadd.f32 %v1213_v7, %v1697_v14  ;;  %v1719_v11 = vadd.f32 %v1274_v3, %v640_v6 }
 0x116   :  { %v1214_v12 = vpop.f32.mrb[16].mxu0  ;;  %v1721_v13 = vadd.f32 %v1277_v9, %v643_v10 }
 0x117   :  { %v1278_v15 = vpop.f32.mrb[16].mxu1  ;;  %v1215_v16 = vpop.f32.mrb[17].mxu0 }
 0x118   :  { %v1216_v17 = vadd.f32 %v1215_v16, %v1214_v12  ;;  %v1279_v18 = vpop.f32.mrb[17].mxu1  ;;  %v1217_v19 = vpop.f32.mrb[18].mxu0 }
 0x119   :  { %v1280_v20 = vadd.f32 %v1279_v18, %v1278_v15  ;;  %v1281_v21 = vpop.f32.mrb[18].mxu1  ;;  %v1218_v22 = vpop.f32.mrb[19].mxu0 }
 0x11a   :  { %v648_v23 = vadd.f32 %v1216_v17, %v1697_v14  ;;  %v1219_v24 = vadd.f32 %v1218_v22, %v1217_v19  ;;  %v1282_v25 = vpop.f32.mrb[19].mxu1 }
 0x11b   :  { %v1283_v26 = vadd.f32 %v1282_v25, %v1281_v21 }
 0x11c   :  { %v651_v28 = vadd.f32 %v1219_v24, %v1697_v14  ;;  %v745_v30 = vadd.f32 %v1280_v20, %v648_v23 }
 0x11e   :  { %v1220_v31 = vpop.f32.mrb[20].mxu0  ;;  %v1725_v32 = vadd.f32 %v1283_v26, %v651_v28 }
 0x11f   :  { %v1284_v33 = vpop.f32.mrb[20].mxu1  ;;  %v1221_v34 = vpop.f32.mrb[21].mxu0 }
 0x120   :  { %v1222_v35 = vadd.f32 %v1221_v34, %v1220_v31  ;;  %v1285_v36 = vpop.f32.mrb[21].mxu1  ;;  %v1223_v37 = vpop.f32.mrb[22].mxu0 }
 0x121   :  { %v1286_v38 = vadd.f32 %v1285_v36, %v1284_v33  ;;  %v1287_v39 = vpop.f32.mrb[22].mxu1  ;;  %v1224_v40 = vpop.f32.mrb[23].mxu0  ;;  %v1744_v36 = vld [vmem:[%s1798_s2 + $0x1] ss:$0 sm:$0xff] }
 0x122   :  { %v656_v41 = vadd.f32 %v1222_v35, %v1697_v14  ;;  %v1225_v42 = vadd.f32 %v1224_v40, %v1223_v37  ;;  %v1288_v44 = vpop.f32.mrb[23].mxu1 }
 0x123   :  { %v1289_v46 = vadd.f32 %v1288_v44, %v1287_v39 }
 0x124   :  { %v659_v47 = vadd.f32 %v1225_v42, %v1697_v14  ;;  %v753_v48 = vadd.f32 %v1286_v38, %v656_v41 }
 0x126   :  { %v1226_v49 = vpop.f32.mrb[24].mxu0  ;;  %v756_v50 = vadd.f32 %v1289_v46, %v659_v47 }
 0x127   :  { %v1290_v51 = vpop.f32.mrb[24].mxu1  ;;  %v1227_v52 = vpop.f32.mrb[25].mxu0 }
 0x128   :  { %v1228_v53 = vadd.f32 %v1227_v52, %v1226_v49  ;;  %v1291_v54 = vpop.f32.mrb[25].mxu1  ;;  %v1229_v55 = vpop.f32.mrb[26].mxu0 }
 0x129   :  { %v1292_v56 = vadd.f32 %v1291_v54, %v1290_v51  ;;  %v1293_v57 = vpop.f32.mrb[26].mxu1  ;;  %v1230_v58 = vpop.f32.mrb[27].mxu0 }
 0x12a   :  { %v664_v60 = vadd.f32 %v1228_v53, %v1697_v14  ;;  %v1231_v62 = vadd.f32 %v1230_v58, %v1229_v55  ;;  %v1294_v63 = vpop.f32.mrb[27].mxu1 }
 0x12b   :  { %v1295_v0 = vadd.f32 %v1294_v63, %v1293_v57 }
 0x12c   :  { %v667_v1 = vadd.f32 %v1231_v62, %v1697_v14  ;;  %v1731_v2 = vadd.f32 %v1292_v56, %v664_v60 }
 0x12e   :  { %v1232_v3 = vpop.f32.mrb[28].mxu0  ;;  %v1733_v4 = vadd.f32 %v1295_v0, %v667_v1 }
 0x12f   :  { %v1296_v5 = vpop.f32.mrb[28].mxu1  ;;  %v1233_v6 = vpop.f32.mrb[29].mxu0 }
 0x130   :  { %v1234_v7 = vadd.f32 %v1233_v6, %v1232_v3  ;;  %v1297_v8 = vpop.f32.mrb[29].mxu1  ;;  %v1235_v9 = vpop.f32.mrb[30].mxu0 }
 0x131   :  { %v1298_v10 = vadd.f32 %v1297_v8, %v1296_v5  ;;  %v1299_v12 = vpop.f32.mrb[30].mxu1  ;;  %v1236_v15 = vpop.f32.mrb[31].mxu0 }
 0x132   :  { %v672_v16 = vadd.f32 %v1234_v7, %v1697_v14  ;;  %v1237_v17 = vadd.f32 %v1236_v15, %v1235_v9  ;;  %v1300_v18 = vpop.f32.mrb[31].mxu1 }
 0x133   :  { %v1301_v19 = vadd.f32 %v1300_v18, %v1299_v12 }
 0x134   :  { %v675_v20 = vadd.f32 %v1237_v17, %v1697_v14  ;;  %v769_v21 = vadd.f32 %v1298_v10, %v672_v16 }
 0x136   :  { %v1324_v22 = vpop.f32.mrb[32].mxu0  ;;  %v1737_v23 = vadd.f32 %v1301_v19, %v675_v20 }
 0x137   :  { %v818_v24 = vadd.f32 %v1324_v22, %v1707_v43  ;;  %v1332_v25 = vpop.f32.mrb[32].mxu1  ;;  %v809_v26 = vpop.f32.mrb[33].mxu0 }
 0x138   :  { %v850_v28 = vadd.f32 %v1332_v25, %v753_v48  ;;  %v810_v31 = vadd.f32 %v809_v26, %v1701_v27  ;;  %v841_v33 = vpop.f32.mrb[33].mxu1  ;;  %v1325_v34 = vpop.f32.mrb[34].mxu0 }
 0x139   :  { %v874_v35 = vmul.f32 0.2, %v818_v24  ;;  %v842_v14 = vadd.f32 %v841_v33, %v745_v30  ;;  %v821_v37 = vadd.f32 %v1325_v34, %v1709_v45  ;;  %v1333_v38 = vpop.f32.mrb[34].mxu1  ;;  %v812_v39 = vpop.f32.mrb[35].mxu0 }
 0x13a   :  { %v882_v40 = vmul.f32 0.2, %v850_v28  ;;  %v872_v43 = vmul.f32 0.2, %v810_v31  ;;  %v853_v41 = vadd.f32 %v1333_v38, %v756_v50  ;;  %v813_v42 = vadd.f32 %v812_v39, %v1703_v29  ;;  %v844_v44 = vpop.f32.mrb[35].mxu1 }
 0x13b   :  { %v890_v27 = vmax.f32 %v818_v24, %v874_v35  ;;  %v880_v46 = vmul.f32 0.2, %v842_v14  ;;  %v875_v47 = vmul.f32 0.2, %v821_v37  ;;  %v845_v48 = vadd.f32 %v844_v44, %v1725_v32 }
 0x13c   :  { %v898_v49 = vmax.f32 %v850_v28, %v882_v40  ;;  %v888_v51 = vmax.f32 %v810_v31, %v872_v43  ;;  %v883_v52 = vmul.f32 0.2, %v853_v41  ;;  %v873_v53 = vmul.f32 0.2, %v813_v42 }
 0x13d   :  { %v911_v30 = vadd.f32 %v1744_v36, %v890_v27  ;;  %v896_v45 = vmax.f32 %v842_v14, %v880_v46  ;;  %v891_v54 = vmax.f32 %v821_v37, %v875_v47  ;;  %v881_v55 = vmul.f32 0.2, %v845_v48 }
 0x13e   :  { %v919_v56 = vadd.f32 %v1744_v36, %v898_v49  ;;  %v909_v50 = vadd.f32 %v1744_v36, %v888_v51  ;;  %v899_v29 = vmax.f32 %v853_v41, %v883_v52  ;;  %v889_v57 = vmax.f32 %v813_v42, %v873_v53  ;;  %v1328_v58 = vpop.f32.mrb[36].mxu0 }
 0x13f   :  { %v917_v60 = vadd.f32 %v1744_v36, %v896_v45  ;;  %v912_v32 = vadd.f32 %v1744_v36, %v891_v54  ;;  %v897_v62 = vmax.f32 %v845_v48, %v881_v55  ;;  %v834_v63 = vadd.f32 %v1328_v58, %v1719_v11  ;;  %v1336_v0 = vpop.f32.mrb[36].mxu1  ;;  %v825_v1 = vpop.f32.mrb[37].mxu0 }
 0x140   :  { %v920_v3 = vadd.f32 %v1744_v36, %v899_v29  ;;  %v910_v5 = vadd.f32 %v1744_v36, %v889_v57  ;;  %v866_v6 = vadd.f32 %v1336_v0, %v769_v21  ;;  %v826_v7 = vadd.f32 %v825_v1, %v1713_v59  ;;  %v857_v8 = vpop.f32.mrb[37].mxu1  ;;  %v1329_v9 = vpop.f32.mrb[38].mxu0 }
 0x141   :  { %v1135_v10 = vpack.c.bf16 %v912_v32, %v911_v30  ;;  %v918_v12 = vadd.f32 %v1744_v36, %v897_v62  ;;  %v878_v15 = vmul.f32 0.2, %v834_v63  ;;  %v858_v16 = vadd.f32 %v857_v8, %v1731_v2  ;;  %v1337_v17 = vpop.f32.mrb[38].mxu1  ;;  %v828_v18 = vpop.f32.mrb[39].mxu0 }
 0x142   :  { %v1155_v11 = vpack.c.bf16 %v920_v3, %v919_v56  ;;  %v1130_v19 = vpack.c.bf16 %v910_v5, %v909_v50  ;;  %v886_v20 = vmul.f32 0.2, %v866_v6  ;;  %v876_v22 = vmul.f32 0.2, %v826_v7  ;;  %v860_v24 = vpop.f32.mrb[39].mxu1 }
 0x143   :  { %1167 = vst [vmem:[%s1799_s3 + $0x8] sm:$0xff] %v1135_v10   ;;  %v1150_v59 = vpack.c.bf16 %v918_v12, %v917_v60  ;;  %v884_v21 = vmul.f32 0.2, %v858_v16  ;;  %v837_v25 = vadd.f32 %v1329_v9, %v1721_v13  ;;  %v869_v2 = vadd.f32 %v1337_v17, %v1737_v23 }
 0x144   :  { %1171 = vst [vmem:[%s1799_s3 + $0x28] sm:$0xff] %v1155_v11   ;;  %1131 = vst [vmem:[%s1799_s3] sm:$0xff] %v1130_v19   ;;  %v829_v26 = vadd.f32 %v828_v18, %v1715_v61  ;;  %v894_v28 = vmax.f32 %v834_v63, %v878_v15  ;;  %v861_v13 = vadd.f32 %v860_v24, %v1733_v4 }
 0x145   :  { %1170 = vst [vmem:[%s1799_s3 + $0x20] sm:$0xff] %v1150_v59   ;;  %v879_v31 = vmul.f32 0.2, %v837_v25  ;;  %v902_v33 = vmax.f32 %v866_v6, %v886_v20  ;;  %v892_v34 = vmax.f32 %v826_v7, %v876_v22  ;;  %v887_v35 = vmul.f32 0.2, %v869_v2 }
 0x146   :  { %v877_v14 = vmul.f32 0.2, %v829_v26  ;;  %v900_v37 = vmax.f32 %v858_v16, %v884_v21  ;;  %v885_v39 = vmul.f32 0.2, %v861_v13  ;;  %v915_v23 = vadd.f32 %v1744_v36, %v894_v28 }
 0x147   :  { %v895_v38 = vmax.f32 %v837_v25, %v879_v31  ;;  %v903_v40 = vmax.f32 %v869_v2, %v887_v35  ;;  %v923_v42 = vadd.f32 %v1744_v36, %v902_v33  ;;  %v913_v44 = vadd.f32 %v1744_v36, %v892_v34 }
 0x148   :  { %v893_v43 = vmax.f32 %v829_v26, %v877_v14  ;;  %v901_v41 = vmax.f32 %v861_v13, %v885_v39  ;;  %v921_v46 = vadd.f32 %v1744_v36, %v900_v37 }
 0x149   :  { %v916_v61 = vadd.f32 %v1744_v36, %v895_v38  ;;  %v924_v4 = vadd.f32 %v1744_v36, %v903_v40 }
 0x14a   :  { %v914_v27 = vadd.f32 %v1744_v36, %v893_v43  ;;  %v922_v48 = vadd.f32 %v1744_v36, %v901_v41 }
 0x14b   :  { %v1145_v47 = vpack.c.bf16 %v916_v61, %v915_v23  ;;  %v1165_v49 = vpack.c.bf16 %v924_v4, %v923_v42 }
 0x14c   :  { %v1140_v51 = vpack.c.bf16 %v914_v27, %v913_v44  ;;  %v1160_v52 = vpack.c.bf16 %v922_v48, %v921_v46 }
 0x14d   :  { %1169 = vst [vmem:[%s1799_s3 + $0x18] sm:$0xff] %v1145_v47   ;;  %1173 = vst [vmem:[%s1799_s3 + $0x38] sm:$0xff] %v1165_v49  }
 0x14e   :  { %1168 = vst [vmem:[%s1799_s3 + $0x10] sm:$0xff] %v1140_v51   ;;  %1172 = vst [vmem:[%s1799_s3 + $0x30] sm:$0xff] %v1160_v52  }

// kernel: discriminator_aux_gan.7
= control target key start
LH: loop header
LB: loop body
LE: loop exit
PB: predicated region body
PF: predicated region fallthrough
CT: control target
= control target key end

     0   :  { %vm432_vm0 = vcmask 523264   ;;  %s1199_s1 = inlined_call_operand.vmem [shape: bf16[576,128], index: 1, kind: input, shape index: {}]   ;;  %s1200_s0 = inlined_call_operand.vmem [shape: bf16[64,576], index: 0, kind: input, shape index: {}]   ;;  %s1201_s2 = inlined_call_operand.vmem [shape: f32[2,128], index: 2, kind: input, shape index: {}]   ;;  %s1202_s3 = inlined_call_operand.vmem [shape: bf16[64,128], index: 3, kind: output, shape index: {}]  }
   0x1   :  { %v926_v0 = vld [vmem:[%s1199_s1 + $0x40] sm:$0xff]   ;;  %v930_v4 = vld [vmem:[%s1199_s1 + $0x48] sm:$0xff]   ;;  %v934_v8 = vld [vmem:[%s1199_s1 + $0x50] sm:$0xff]  }
   0x2   :  { %v927_v1 = vld [vmem:[%s1199_s1 + $0xc0] sm:$0xff]   ;;  %814 = vmatprep.subr.bf16.mxu0 %v926_v0  ;;  %v931_v5 = vld [vmem:[%s1199_s1 + $0xc8] sm:$0xff]   ;;  %v935_v9 = vld [vmem:[%s1199_s1 + $0xd0] sm:$0xff]  }
   0x3   :  { %v928_v2 = vld [vmem:[%s1199_s1] sm:$0xff]   ;;  %854 = vmatprep.subr.bf16.mxu1 %v927_v1  ;;  %v932_v6 = vld [vmem:[%s1199_s1 + $0x8] sm:$0xff]   ;;  %v936_v10 = vld [vmem:[%s1199_s1 + $0x10] sm:$0xff]  }
   0x4   :  { %v929_v3 = vld [vmem:[%s1199_s1 + $0x80] sm:$0xff]   ;;  %815 = vmatpush3.bf16.msra.mxu0 %v928_v2  ;;  %v933_v7 = vld [vmem:[%s1199_s1 + $0x88] sm:$0xff]   ;;  %v937_v11 = vld [vmem:[%s1199_s1 + $0x90] sm:$0xff]  }
   0x5   :  { %855 = vmatpush3.bf16.msra.mxu1 %v929_v3  ;;  %816 = vmatprep.subr.bf16.mxu0 %v930_v4  ;;  %v938_v12 = vld [vmem:[%s1199_s1 + $0x58] sm:$0xff]   ;;  %v942_v16 = vld [vmem:[%s1199_s1 + $0x60] sm:$0xff]   ;;  %v946_v20 = vld [vmem:[%s1199_s1 + $0x68] sm:$0xff]  }
   0x6   :  { %856 = vmatprep.subr.bf16.mxu1 %v931_v5  ;;  %v939_v13 = vld [vmem:[%s1199_s1 + $0xd8] sm:$0xff]   ;;  %v943_v17 = vld [vmem:[%s1199_s1 + $0xe0] sm:$0xff]   ;;  %v947_v21 = vld [vmem:[%s1199_s1 + $0xe8] sm:$0xff]  }
   0x7   :  { %v940_v14 = vld [vmem:[%s1199_s1 + $0x18] sm:$0xff]   ;;  %v944_v18 = vld [vmem:[%s1199_s1 + $0x20] sm:$0xff]   ;;  %v948_v22 = vld [vmem:[%s1199_s1 + $0x28] sm:$0xff]  }
   0x8   :  { %817 = vmatpush3.bf16.msra.mxu0 %v932_v6  ;;  %v941_v15 = vld [vmem:[%s1199_s1 + $0x98] sm:$0xff]   ;;  %v945_v19 = vld [vmem:[%s1199_s1 + $0xa0] sm:$0xff]   ;;  %v949_v23 = vld [vmem:[%s1199_s1 + $0xa8] sm:$0xff]  }
   0x9   :  { %857 = vmatpush3.bf16.msra.mxu1 %v933_v7  ;;  %818 = vmatprep.subr.bf16.mxu0 %v934_v8  ;;  %v950_v24 = vld [vmem:[%s1199_s1 + $0x70] sm:$0xff]   ;;  %v954_v28 = vld [vmem:[%s1199_s1 + $0x78] sm:$0xff]   ;;  %v963_v35 = vld [vmem:[%s1200_s0 + $0xc] ss:$20 sps:$4 sm:$0xff]  }
   0xa   :  { %858 = vmatprep.subr.bf16.mxu1 %v935_v9  ;;  %v951_v25 = vld [vmem:[%s1199_s1 + $0xf0] sm:$0xff]   ;;  %v955_v29 = vld [vmem:[%s1199_s1 + $0xf8] sm:$0xff]   ;;  %v964_v36 = vld [vmem:[%s1199_s1 + $0x100] sm:$0xff]   ;;  %542 = vmatprep.mubr.bf16.mxu1 %v963_v35 }
   0xb   :  { %v952_v26 = vld [vmem:[%s1199_s1 + $0x30] sm:$0xff]   ;;  %v956_v30 = vld [vmem:[%s1199_s1 + $0x38] sm:$0xff]   ;;  %v965_v37 = vld [vmem:[%s1200_s0 + $0x2c] ss:$20 sps:$4 sm:$0xff]  }
   0xc   :  { %819 = vmatpush3.bf16.msra.mxu0 %v936_v10  ;;  %v953_v27 = vld [vmem:[%s1199_s1 + $0xb0] sm:$0xff]   ;;  %v957_v31 = vld [vmem:[%s1199_s1 + $0xb8] sm:$0xff]   ;;  %v971_v39 = vld [vmem:[%s1199_s1 + $0x108] sm:$0xff]  }
   0xd   :  { %859 = vmatpush3.bf16.msra.mxu1 %v937_v11  ;;  %820 = vmatprep.subr.bf16.mxu0 %v938_v12  ;;  %v958_v32 = vld [vmem:[%s1200_s0] ss:$20 sps:$4 sm:$0xff]   ;;  %v960_v33 = vld [vmem:[%s1200_s0 + $0x4] ss:$20 sps:$4 sm:$0xff]   ;;  %v961_v34 = vld [vmem:[%s1200_s0 + $0x8] ss:$20 sps:$4 sm:$0xff]  }
   0xe   :  { %860 = vmatprep.subr.bf16.mxu1 %v939_v13  ;;  %477 = vmatprep.mubr.bf16.mxu0 %v960_v33  ;;  %v967_v38 = vld [vmem:[%s1200_s0 + $0x34] ss:$20 sps:$4 sm:$0xff]   ;;  %v970_v41 = vld [vmem:[%s1200_s0 + $0x30] ss:$20 sps:$4 sm:$0xff]   ;;  %v985_v45 = vld [vmem:[%s1199_s1 + $0x118] sm:$0xff]  }
   0xf   :  { %v969_v40 = vld [vmem:[%s1200_s0 + $0x28] ss:$20 sps:$4 sm:$0xff]   ;;  %v978_v44 = vld [vmem:[%s1199_s1 + $0x110] sm:$0xff]   ;;  %v977_v47 = vld [vmem:[%s1200_s0 + $0x58] ss:$20 sps:$4 sm:$0xff]  }
  0x10   :  { %821 = vmatpush3.bf16.msra.mxu0 %v940_v14  ;;  %v972_v42 = vld [vmem:[%s1200_s0 + $0x54] ss:$20 sps:$4 sm:$0xff]   ;;  %v974_v43 = vld [vmem:[%s1200_s0 + $0x5c] ss:$20 sps:$4 sm:$0xff]   ;;  %v981_v49 = vld [vmem:[%s1200_s0 + $0x84] ss:$20 sps:$4 sm:$0xff]  }
  0x11   :  { %861 = vmatpush3.bf16.msra.mxu1 %v941_v15  ;;  %822 = vmatprep.subr.bf16.mxu0 %v942_v16  ;;  %v976_v46 = vld [vmem:[%s1200_s0 + $0x50] ss:$20 sps:$4 sm:$0xff]   ;;  %v983_v50 = vld [vmem:[%s1200_s0 + $0x78] ss:$20 sps:$4 sm:$0xff]   ;;  %v984_v51 = vld [vmem:[%s1200_s0 + $0x80] ss:$20 sps:$4 sm:$0xff]  }
  0x12   :  { %862 = vmatprep.subr.bf16.mxu1 %v943_v17  ;;  %v979_v48 = vld [vmem:[%s1200_s0 + $0x7c] ss:$20 sps:$4 sm:$0xff]   ;;  %v987_v53 = vld [vmem:[%s1200_s0 + $0x60] ss:$20 sps:$4 sm:$0xff]   ;;  %v988_v54 = vld [vmem:[%s1200_s0 + $0x38] ss:$20 sps:$4 sm:$0xff]  }
  0x13   :  { %v986_v52 = vld [vmem:[%s1200_s0 + $0x10] ss:$20 sps:$4 sm:$0xff]   ;;  %v989_v55 = vld [vmem:[%s1200_s0 + $0x88] ss:$20 sps:$4 sm:$0xff]   ;;  %v713_v58 = vld [vmem:[%s1201_s2] ss:$0 sm:$0xff] }
  0x14   :  { %823 = vmatpush3.bf16.msra.mxu0 %v944_v18 }
  0x15   :  { %863 = vmatpush3.bf16.msra.mxu1 %v945_v19  ;;  %824 = vmatprep.subr.bf16.mxu0 %v946_v20 }
  0x16   :  { %864 = vmatprep.subr.bf16.mxu1 %v947_v21 }
  0x18   :  { %825 = vmatpush3.bf16.msra.mxu0 %v948_v22 }
  0x19   :  { %865 = vmatpush3.bf16.msra.mxu1 %v949_v23  ;;  %826 = vmatprep.subr.bf16.mxu0 %v950_v24 }
  0x1a   :  { %866 = vmatprep.subr.bf16.mxu1 %v951_v25 }
  0x1c   :  { %827 = vmatpush3.bf16.msra.mxu0 %v952_v26 }
  0x1d   :  { %867 = vmatpush3.bf16.msra.mxu1 %v953_v27  ;;  %828 = vmatprep.subr.bf16.mxu0 %v954_v28 }
  0x1e   :  { %868 = vmatprep.subr.bf16.mxu1 %v955_v29 }
  0x20   :  { %829 = vmatpush3.bf16.msra.mxu0 %v956_v30 }
  0x21   :  { %869 = vmatpush3.bf16.msra.mxu1 %v957_v31  ;;  %902 = vmatprep.subr.bf16.mxu0 %v964_v36 }
  0x22   :  { %918 = vmatprep.subr.bf16.mxu1 %v964_v36 }
  0x23   :  { %478 = vmatmul.mubr.bf16.vlgmr.msra.gmra.mrb[0].mxu0 %v958_v32 }
  0x24   :  { %543 = vmatmul.mubr.bf16.vlgmr.msra.gmra.mrb[0].mxu1 %v961_v34  ;;  %903 = vmatpush3.bf16.msra.mxu0 %v964_v36 }
  0x25   :  { %922 = vmatpush3.bf16.msra.mxu1 %v964_v36  ;;  %485 = vmatprep.mubr.bf16.mxu0 %v965_v37 }
  0x26   :  { %550 = vmatprep.mubr.bf16.mxu1 %v967_v38  ;;  %904 = vmatprep.subr.bf16.mxu0 %v971_v39 }
  0x27   :  { %919 = vmatprep.subr.bf16.mxu1 %v971_v39 }
  0x28   :  { %905 = vmatpush3.bf16.msra.mxu0 %v971_v39 }
  0x29   :  { %923 = vmatpush3.bf16.msra.mxu1 %v971_v39  ;;  %906 = vmatprep.subr.bf16.mxu0 %v978_v44 }
  0x2a   :  { %920 = vmatprep.subr.bf16.mxu1 %v978_v44 }
  0x2b   :  { %486 = vmatmul.mubr.bf16.gmra.mrb[4].mxu0 %v969_v40 }
  0x2c   :  { %551 = vmatmul.mubr.bf16.gmra.mrb[4].mxu1 %v970_v41  ;;  %493 = vmatprep.mubr.bf16.mxu0 %v972_v42 }
  0x2d   :  { %558 = vmatprep.mubr.bf16.mxu1 %v974_v43  ;;  %907 = vmatpush3.bf16.msra.mxu0 %v978_v44 }
  0x2e   :  { %924 = vmatpush3.bf16.msra.mxu1 %v978_v44  ;;  %908 = vmatprep.subr.bf16.mxu0 %v985_v45 }
  0x2f   :  { %921 = vmatprep.subr.bf16.mxu1 %v985_v45 }
  0x31   :  { %909 = vmatpush3.bf16.msra.mxu0 %v985_v45 }
  0x32   :  { %925 = vmatpush3.bf16.msra.mxu1 %v985_v45 }
  0x33   :  { %494 = vmatmul.mubr.bf16.gmra.mrb[8].mxu0 %v976_v46 }
  0x34   :  { %559 = vmatmul.mubr.bf16.gmra.mrb[8].mxu1 %v977_v47  ;;  %501 = vmatprep.mubr.bf16.mxu0 %v979_v48 }
  0x35   :  { %566 = vmatprep.mubr.bf16.mxu1 %v981_v49 }
  0x3b   :  { %502 = vmatmul.mubr.bf16.gmra.mrb[12].mxu0 %v983_v50 }
  0x3c   :  { %567 = vmatmul.mubr.bf16.gmra.mrb[12].mxu1 %v984_v51  ;;  %910 = vmatprep.mubr.msk.bf16.mxu0 %vm432_vm0, %v986_v52 }
  0x3d   :  { %914 = vmatprep.mubr.msk.bf16.mxu1 %vm432_vm0, %v987_v53 }
  0x43   :  { %911 = vmatmul.mubr.msk.bf16.vlgmr.msra.gmra.mrb[16].mxu0 %vm432_vm0, %v988_v54 }
  0x44   :  { %915 = vmatmul.mubr.msk.bf16.vlgmr.msra.gmra.mrb[16].mxu1 %vm432_vm0, %v989_v55 }
  0xf6   :  { %v830_v56 = vpop.f32.mrb[0].mxu0 }
  0xf7   :  { %v870_v57 = vpop.f32.mrb[0].mxu1  ;;  %v831_v59 = vpop.f32.mrb[1].mxu0 }
  0xf8   :  { %v832_v60 = vadd.f32 %v831_v59, %v830_v56  ;;  %v871_v61 = vpop.f32.mrb[1].mxu1  ;;  %v833_v62 = vpop.f32.mrb[2].mxu0 }
  0xf9   :  { %v872_v63 = vadd.f32 %v871_v61, %v870_v57  ;;  %v873_v0 = vpop.f32.mrb[2].mxu1  ;;  %v834_v1 = vpop.f32.mrb[3].mxu0 }
  0xfa   :  { %v480_v2 = vadd.f32 %v832_v60, %v713_v58  ;;  %v835_v3 = vadd.f32 %v834_v1, %v833_v62  ;;  %v874_v4 = vpop.f32.mrb[3].mxu1 }
  0xfb   :  { %v875_v5 = vadd.f32 %v874_v4, %v873_v0 }
  0xfc   :  { %v483_v6 = vadd.f32 %v835_v3, %v713_v58  ;;  %v545_v7 = vadd.f32 %v872_v63, %v480_v2 }
  0xfe   :  { %v836_v8 = vpop.f32.mrb[4].mxu0  ;;  %v1181_v9 = vadd.f32 %v875_v5, %v483_v6 }
  0xff   :  { %v876_v10 = vpop.f32.mrb[4].mxu1  ;;  %v837_v11 = vpop.f32.mrb[5].mxu0 }
 0x100   :  { %v838_v12 = vadd.f32 %v837_v11, %v836_v8  ;;  %v877_v13 = vpop.f32.mrb[5].mxu1  ;;  %v839_v14 = vpop.f32.mrb[6].mxu0 }
 0x101   :  { %v878_v15 = vadd.f32 %v877_v13, %v876_v10  ;;  %v879_v16 = vpop.f32.mrb[6].mxu1  ;;  %v840_v17 = vpop.f32.mrb[7].mxu0 }
 0x102   :  { %v488_v18 = vadd.f32 %v838_v12, %v713_v58  ;;  %v841_v19 = vadd.f32 %v840_v17, %v839_v14  ;;  %v880_v20 = vpop.f32.mrb[7].mxu1 }
 0x103   :  { %v881_v21 = vadd.f32 %v880_v20, %v879_v16 }
 0x104   :  { %v491_v22 = vadd.f32 %v841_v19, %v713_v58  ;;  %v553_v23 = vadd.f32 %v878_v15, %v488_v18 }
 0x106   :  { %v842_v24 = vpop.f32.mrb[8].mxu0  ;;  %v556_v25 = vadd.f32 %v881_v21, %v491_v22 }
 0x107   :  { %v882_v26 = vpop.f32.mrb[8].mxu1  ;;  %v843_v27 = vpop.f32.mrb[9].mxu0 }
 0x108   :  { %v844_v28 = vadd.f32 %v843_v27, %v842_v24  ;;  %v883_v29 = vpop.f32.mrb[9].mxu1  ;;  %v845_v30 = vpop.f32.mrb[10].mxu0 }
 0x109   :  { %v884_v31 = vadd.f32 %v883_v29, %v882_v26  ;;  %v885_v32 = vpop.f32.mrb[10].mxu1  ;;  %v846_v33 = vpop.f32.mrb[11].mxu0 }
 0x10a   :  { %v496_v34 = vadd.f32 %v844_v28, %v713_v58  ;;  %v847_v35 = vadd.f32 %v846_v33, %v845_v30  ;;  %v886_v36 = vpop.f32.mrb[11].mxu1 }
 0x10b   :  { %v887_v37 = vadd.f32 %v886_v36, %v885_v32 }
 0x10c   :  { %v499_v38 = vadd.f32 %v847_v35, %v713_v58  ;;  %v561_v39 = vadd.f32 %v884_v31, %v496_v34 }
 0x10e   :  { %v848_v40 = vpop.f32.mrb[12].mxu0  ;;  %v564_v41 = vadd.f32 %v887_v37, %v499_v38 }
 0x10f   :  { %v888_v42 = vpop.f32.mrb[12].mxu1  ;;  %v849_v43 = vpop.f32.mrb[13].mxu0 }
 0x110   :  { %v850_v44 = vadd.f32 %v849_v43, %v848_v40  ;;  %v889_v45 = vpop.f32.mrb[13].mxu1  ;;  %v851_v46 = vpop.f32.mrb[14].mxu0 }
 0x111   :  { %v890_v47 = vadd.f32 %v889_v45, %v888_v42  ;;  %v891_v48 = vpop.f32.mrb[14].mxu1  ;;  %v852_v49 = vpop.f32.mrb[15].mxu0 }
 0x112   :  { %v504_v50 = vadd.f32 %v850_v44, %v713_v58  ;;  %v853_v51 = vadd.f32 %v852_v49, %v851_v46  ;;  %v892_v52 = vpop.f32.mrb[15].mxu1 }
 0x113   :  { %v893_v53 = vadd.f32 %v892_v52, %v891_v48 }
 0x114   :  { %v507_v54 = vadd.f32 %v853_v51, %v713_v58  ;;  %v569_v55 = vadd.f32 %v890_v47, %v504_v50 }
 0x116   :  { %v912_v56 = vpop.f32.mrb[16].mxu0  ;;  %v572_v57 = vadd.f32 %v893_v53, %v507_v54 }
 0x117   :  { %v618_v59 = vadd.f32 %v912_v56, %v553_v23  ;;  %v916_v60 = vpop.f32.mrb[16].mxu1  ;;  %v609_v61 = vpop.f32.mrb[17].mxu0 }
 0x118   :  { %v634_v62 = vadd.f32 %v916_v60, %v569_v55  ;;  %v610_v63 = vadd.f32 %v609_v61, %v545_v7  ;;  %v625_v0 = vpop.f32.mrb[17].mxu1  ;;  %v913_v1 = vpop.f32.mrb[18].mxu0  ;;  %v774_v7 = vld [vmem:[%s1201_s2 + $0x1] ss:$0 sm:$0xff] }
 0x119   :  { %v642_v2 = vmul.f32 0.2, %v618_v59  ;;  %v626_v3 = vadd.f32 %v625_v0, %v561_v39  ;;  %v621_v4 = vadd.f32 %v913_v1, %v556_v25  ;;  %v917_v5 = vpop.f32.mrb[18].mxu1  ;;  %v612_v6 = vpop.f32.mrb[19].mxu0 }
 0x11a   :  { %v646_v8 = vmul.f32 0.2, %v634_v62  ;;  %v640_v10 = vmul.f32 0.2, %v610_v63  ;;  %v637_v11 = vadd.f32 %v917_v5, %v572_v57  ;;  %v613_v58 = vadd.f32 %v612_v6, %v1181_v9  ;;  %v628_v12 = vpop.f32.mrb[19].mxu1 }
 0x11b   :  { %v650_v13 = vmax.f32 %v618_v59, %v642_v2  ;;  %v644_v14 = vmul.f32 0.2, %v626_v3  ;;  %v643_v15 = vmul.f32 0.2, %v621_v4  ;;  %v629_v16 = vadd.f32 %v628_v12, %v564_v41 }
 0x11c   :  { %v654_v17 = vmax.f32 %v634_v62, %v646_v8  ;;  %v648_v18 = vmax.f32 %v610_v63, %v640_v10  ;;  %v647_v19 = vmul.f32 0.2, %v637_v11  ;;  %v641_v20 = vmul.f32 0.2, %v613_v58 }
 0x11d   :  { %v652_v21 = vmax.f32 %v626_v3, %v644_v14  ;;  %v651_v22 = vmax.f32 %v621_v4, %v643_v15  ;;  %v645_v23 = vmul.f32 0.2, %v629_v16  ;;  %v663_v26 = vadd.f32 %v774_v7, %v650_v13 }
 0x11e   :  { %v655_v24 = vmax.f32 %v637_v11, %v647_v19  ;;  %v649_v25 = vmax.f32 %v613_v58, %v641_v20  ;;  %v667_v28 = vadd.f32 %v774_v7, %v654_v17  ;;  %v661_v29 = vadd.f32 %v774_v7, %v648_v18 }
 0x11f   :  { %v664_v9 = vadd.f32 %v774_v7, %v651_v22  ;;  %v653_v27 = vmax.f32 %v629_v16, %v645_v23  ;;  %v665_v32 = vadd.f32 %v774_v7, %v652_v21 }
 0x120   :  { %v668_v30 = vadd.f32 %v774_v7, %v655_v24  ;;  %v662_v31 = vadd.f32 %v774_v7, %v649_v25 }
 0x121   :  { %v799_v33 = vpack.c.bf16 %v664_v9, %v663_v26  ;;  %v666_v34 = vadd.f32 %v774_v7, %v653_v27 }
 0x122   :  { %v809_v35 = vpack.c.bf16 %v668_v30, %v667_v28  ;;  %v794_v36 = vpack.c.bf16 %v662_v31, %v661_v29 }
 0x123   :  { %811 = vst [vmem:[%s1202_s3 + $0x8] sm:$0xff] %v799_v33   ;;  %v804_v37 = vpack.c.bf16 %v666_v34, %v665_v32 }
 0x124   :  { %813 = vst [vmem:[%s1202_s3 + $0x18] sm:$0xff] %v809_v35   ;;  %795 = vst [vmem:[%s1202_s3] sm:$0xff] %v794_v36  }
 0x125   :  { %812 = vst [vmem:[%s1202_s3 + $0x10] sm:$0xff] %v804_v37  }

// kernel: discriminator_aux_gan.8
= control target key start
LH: loop header
LB: loop body
LE: loop exit
PB: predicated region body
PF: predicated region fallthrough
CT: control target
= control target key end

     0   :  { %vm370_vm0 = vcmask 523264   ;;  %s928_s1 = inlined_call_operand.vmem [shape: bf16[576,128], index: 1, kind: input, shape index: {}]   ;;  %s929_s0 = inlined_call_operand.vmem [shape: bf16[32,576], index: 0, kind: input, shape index: {}]   ;;  %s930_s2 = inlined_call_operand.vmem [shape: f32[2,128], index: 2, kind: input, shape index: {}]   ;;  %s931_s3 = inlined_call_operand.vmem [shape: bf16[32,128], index: 3, kind: output, shape index: {}]  }
   0x1   :  { %v708_v0 = vld [vmem:[%s928_s1 + $0x40] sm:$0xff]   ;;  %v712_v4 = vld [vmem:[%s928_s1 + $0x48] sm:$0xff]   ;;  %v716_v8 = vld [vmem:[%s928_s1 + $0x50] sm:$0xff]  }
   0x2   :  { %v709_v1 = vld [vmem:[%s928_s1] sm:$0xff]   ;;  %634 = vmatprep.subr.bf16.mxu0 %v708_v0  ;;  %v713_v5 = vld [vmem:[%s928_s1 + $0x8] sm:$0xff]   ;;  %v717_v9 = vld [vmem:[%s928_s1 + $0x10] sm:$0xff]  }
   0x3   :  { %v710_v2 = vld [vmem:[%s928_s1 + $0xc0] sm:$0xff]   ;;  %635 = vmatpush3.bf16.msra.mxu0 %v709_v1  ;;  %v714_v6 = vld [vmem:[%s928_s1 + $0xc8] sm:$0xff]   ;;  %v718_v10 = vld [vmem:[%s928_s1 + $0xd0] sm:$0xff]  }
   0x4   :  { %v711_v3 = vld [vmem:[%s928_s1 + $0x80] sm:$0xff]   ;;  %662 = vmatprep.subr.bf16.mxu1 %v710_v2  ;;  %636 = vmatprep.subr.bf16.mxu0 %v712_v4  ;;  %v715_v7 = vld [vmem:[%s928_s1 + $0x88] sm:$0xff]   ;;  %v719_v11 = vld [vmem:[%s928_s1 + $0x90] sm:$0xff]  }
   0x5   :  { %663 = vmatpush3.bf16.msra.mxu1 %v711_v3  ;;  %v720_v12 = vld [vmem:[%s928_s1 + $0x58] sm:$0xff]   ;;  %v724_v16 = vld [vmem:[%s928_s1 + $0x60] sm:$0xff]   ;;  %v728_v20 = vld [vmem:[%s928_s1 + $0x68] sm:$0xff]  }
   0x6   :  { %664 = vmatprep.subr.bf16.mxu1 %v714_v6  ;;  %v721_v13 = vld [vmem:[%s928_s1 + $0x18] sm:$0xff]   ;;  %v725_v17 = vld [vmem:[%s928_s1 + $0x20] sm:$0xff]   ;;  %v729_v21 = vld [vmem:[%s928_s1 + $0x28] sm:$0xff]  }
   0x7   :  { %637 = vmatpush3.bf16.msra.mxu0 %v713_v5  ;;  %v722_v14 = vld [vmem:[%s928_s1 + $0xd8] sm:$0xff]   ;;  %v726_v18 = vld [vmem:[%s928_s1 + $0xe0] sm:$0xff]   ;;  %v730_v22 = vld [vmem:[%s928_s1 + $0xe8] sm:$0xff]  }
   0x8   :  { %638 = vmatprep.subr.bf16.mxu0 %v716_v8  ;;  %v723_v15 = vld [vmem:[%s928_s1 + $0x98] sm:$0xff]   ;;  %v727_v19 = vld [vmem:[%s928_s1 + $0xa0] sm:$0xff]   ;;  %v731_v23 = vld [vmem:[%s928_s1 + $0xa8] sm:$0xff]  }
   0x9   :  { %665 = vmatpush3.bf16.msra.mxu1 %v715_v7  ;;  %v732_v24 = vld [vmem:[%s928_s1 + $0x70] sm:$0xff]   ;;  %v736_v28 = vld [vmem:[%s928_s1 + $0x78] sm:$0xff]   ;;  %v743_v34 = vld [vmem:[%s928_s1 + $0x100] sm:$0xff]  }
   0xa   :  { %666 = vmatprep.subr.bf16.mxu1 %v718_v10  ;;  %v733_v25 = vld [vmem:[%s928_s1 + $0x30] sm:$0xff]   ;;  %v737_v29 = vld [vmem:[%s928_s1 + $0x38] sm:$0xff]   ;;  %v746_v36 = vld [vmem:[%s929_s0 + $0xc] ss:$20 sps:$4 sm:$0xff]  }
   0xb   :  { %639 = vmatpush3.bf16.msra.mxu0 %v717_v9  ;;  %v734_v26 = vld [vmem:[%s928_s1 + $0xf0] sm:$0xff]   ;;  %v738_v30 = vld [vmem:[%s928_s1 + $0xf8] sm:$0xff]   ;;  %v747_v37 = vld [vmem:[%s928_s1 + $0x108] sm:$0xff]   ;;  %458 = vmatprep.mubr.bf16.mxu1 %v746_v36 }
   0xc   :  { %640 = vmatprep.subr.bf16.mxu0 %v720_v12  ;;  %v735_v27 = vld [vmem:[%s928_s1 + $0xb0] sm:$0xff]   ;;  %v741_v32 = vld [vmem:[%s929_s0 + $0x4] ss:$20 sps:$4 sm:$0xff]   ;;  %v744_v35 = vld [vmem:[%s929_s0 + $0x8] ss:$20 sps:$4 sm:$0xff]  }
   0xd   :  { %667 = vmatpush3.bf16.msra.mxu1 %v719_v11  ;;  %v739_v31 = vld [vmem:[%s929_s0] ss:$20 sps:$4 sm:$0xff]   ;;  %v742_v33 = vld [vmem:[%s928_s1 + $0xb8] sm:$0xff]   ;;  %409 = vmatprep.mubr.bf16.mxu0 %v741_v32  ;;  %v754_v42 = vld [vmem:[%s929_s0 + $0x30] ss:$20 sps:$4 sm:$0xff]  }
   0xe   :  { %668 = vmatprep.subr.bf16.mxu1 %v722_v14  ;;  %v748_v38 = vld [vmem:[%s929_s0 + $0x2c] ss:$20 sps:$4 sm:$0xff]   ;;  %v750_v39 = vld [vmem:[%s929_s0 + $0x28] ss:$20 sps:$4 sm:$0xff]   ;;  %v751_v40 = vld [vmem:[%s928_s1 + $0x110] sm:$0xff]  }
   0xf   :  { %641 = vmatpush3.bf16.msra.mxu0 %v721_v13  ;;  %v752_v41 = vld [vmem:[%s929_s0 + $0x34] ss:$20 sps:$4 sm:$0xff]   ;;  %v755_v43 = vld [vmem:[%s928_s1 + $0x118] sm:$0xff]   ;;  %v756_v44 = vld [vmem:[%s929_s0 + $0x10] ss:$20 sps:$4 sm:$0xff]  }
  0x10   :  { %642 = vmatprep.subr.bf16.mxu0 %v724_v16  ;;  %v757_v45 = vld [vmem:[%s929_s0 + $0x38] ss:$20 sps:$4 sm:$0xff]   ;;  %v565_v47 = vld [vmem:[%s930_s2] ss:$0 sm:$0xff] }
  0x11   :  { %669 = vmatpush3.bf16.msra.mxu1 %v723_v15 }
  0x12   :  { %670 = vmatprep.subr.bf16.mxu1 %v726_v18 }
  0x13   :  { %643 = vmatpush3.bf16.msra.mxu0 %v725_v17 }
  0x14   :  { %644 = vmatprep.subr.bf16.mxu0 %v728_v20 }
  0x15   :  { %671 = vmatpush3.bf16.msra.mxu1 %v727_v19 }
  0x16   :  { %672 = vmatprep.subr.bf16.mxu1 %v730_v22 }
  0x17   :  { %645 = vmatpush3.bf16.msra.mxu0 %v729_v21 }
  0x18   :  { %646 = vmatprep.subr.bf16.mxu0 %v732_v24 }
  0x19   :  { %673 = vmatpush3.bf16.msra.mxu1 %v731_v23 }
  0x1a   :  { %674 = vmatprep.subr.bf16.mxu1 %v734_v26 }
  0x1b   :  { %647 = vmatpush3.bf16.msra.mxu0 %v733_v25 }
  0x1c   :  { %648 = vmatprep.subr.bf16.mxu0 %v736_v28 }
  0x1d   :  { %675 = vmatpush3.bf16.msra.mxu1 %v735_v27  ;;  %v614_v27 = vld [vmem:[%s930_s2 + $0x1] ss:$0 sm:$0xff] }
  0x1e   :  { %676 = vmatprep.subr.bf16.mxu1 %v738_v30 }
  0x1f   :  { %649 = vmatpush3.bf16.msra.mxu0 %v737_v29 }
  0x20   :  { %696 = vmatprep.subr.bf16.mxu0 %v743_v34 }
  0x21   :  { %677 = vmatpush3.bf16.msra.mxu1 %v742_v33 }
  0x22   :  { %410 = vmatmul.mubr.bf16.vlgmr.msra.gmra.mrb[0].mxu0 %v739_v31 }
  0x23   :  { %697 = vmatpush3.bf16.msra.mxu0 %v743_v34  ;;  %417 = vmatprep.mubr.bf16.mxu0 %v748_v38 }
  0x24   :  { %459 = vmatmul.mubr.bf16.vlgmr.msra.gmra.mrb[0].mxu1 %v744_v35  ;;  %698 = vmatprep.subr.bf16.mxu0 %v747_v37 }
  0x25   :  { %466 = vmatprep.mubr.bf16.mxu1 %v752_v41 }
  0x27   :  { %699 = vmatpush3.bf16.msra.mxu0 %v747_v37 }
  0x28   :  { %700 = vmatprep.subr.bf16.mxu0 %v751_v40 }
  0x2a   :  { %418 = vmatmul.mubr.bf16.gmra.mrb[4].mxu0 %v750_v39 }
  0x2b   :  { %704 = vmatprep.mubr.msk.bf16.mxu0 %vm370_vm0, %v756_v44  ;;  %701 = vmatpush3.bf16.msra.mxu0 %v751_v40 }
  0x2c   :  { %467 = vmatmul.mubr.bf16.gmra.mrb[4].mxu1 %v754_v42  ;;  %702 = vmatprep.subr.bf16.mxu0 %v755_v43 }
  0x2f   :  { %703 = vmatpush3.bf16.msra.mxu0 %v755_v43 }
  0x32   :  { %705 = vmatmul.mubr.msk.bf16.vlgmr.msra.gmra.mrb[8].mxu0 %vm370_vm0, %v757_v45 }
  0xf5   :  { %v650_v46 = vpop.f32.mrb[0].mxu0 }
  0xf6   :  { %v651_v48 = vpop.f32.mrb[1].mxu0 }
  0xf7   :  { %v652_v49 = vadd.f32 %v651_v48, %v650_v46  ;;  %v653_v50 = vpop.f32.mrb[2].mxu0  ;;  %v678_v51 = vpop.f32.mrb[0].mxu1 }
  0xf8   :  { %v654_v52 = vpop.f32.mrb[3].mxu0  ;;  %v679_v55 = vpop.f32.mrb[1].mxu1 }
  0xf9   :  { %v412_v53 = vadd.f32 %v652_v49, %v565_v47  ;;  %v655_v54 = vadd.f32 %v654_v52, %v653_v50  ;;  %v680_v56 = vadd.f32 %v679_v55, %v678_v51  ;;  %v681_v57 = vpop.f32.mrb[2].mxu1 }
  0xfa   :  { %v682_v59 = vpop.f32.mrb[3].mxu1 }
  0xfb   :  { %v415_v58 = vadd.f32 %v655_v54, %v565_v47  ;;  %v683_v60 = vadd.f32 %v682_v59, %v681_v57  ;;  %v461_v61 = vadd.f32 %v680_v56, %v412_v53 }
  0xfd   :  { %v656_v62 = vpop.f32.mrb[4].mxu0  ;;  %v464_v0 = vadd.f32 %v683_v60, %v415_v58 }
  0xfe   :  { %v657_v63 = vpop.f32.mrb[5].mxu0 }
  0xff   :  { %v658_v1 = vadd.f32 %v657_v63, %v656_v62  ;;  %v659_v2 = vpop.f32.mrb[6].mxu0  ;;  %v684_v3 = vpop.f32.mrb[4].mxu1 }
 0x100   :  { %v660_v4 = vpop.f32.mrb[7].mxu0  ;;  %v685_v7 = vpop.f32.mrb[5].mxu1 }
 0x101   :  { %v420_v5 = vadd.f32 %v658_v1, %v565_v47  ;;  %v661_v6 = vadd.f32 %v660_v4, %v659_v2  ;;  %v686_v8 = vadd.f32 %v685_v7, %v684_v3  ;;  %v687_v9 = vpop.f32.mrb[6].mxu1 }
 0x102   :  { %v688_v11 = vpop.f32.mrb[7].mxu1 }
 0x103   :  { %v423_v10 = vadd.f32 %v661_v6, %v565_v47  ;;  %v689_v12 = vadd.f32 %v688_v11, %v687_v9  ;;  %v469_v13 = vadd.f32 %v686_v8, %v420_v5 }
 0x105   :  { %v706_v14 = vpop.f32.mrb[8].mxu0  ;;  %v472_v15 = vadd.f32 %v689_v12, %v423_v10 }
 0x106   :  { %v518_v16 = vadd.f32 %v706_v14, %v469_v13  ;;  %v509_v17 = vpop.f32.mrb[9].mxu0 }
 0x107   :  { %v510_v18 = vadd.f32 %v509_v17, %v461_v61  ;;  %v707_v19 = vpop.f32.mrb[10].mxu0 }
 0x108   :  { %v526_v20 = vmul.f32 0.2, %v518_v16  ;;  %v521_v21 = vadd.f32 %v707_v19, %v472_v15  ;;  %v512_v22 = vpop.f32.mrb[11].mxu0 }
 0x109   :  { %v524_v23 = vmul.f32 0.2, %v510_v18  ;;  %v513_v24 = vadd.f32 %v512_v22, %v464_v0 }
 0x10a   :  { %v530_v25 = vmax.f32 %v518_v16, %v526_v20  ;;  %v527_v26 = vmul.f32 0.2, %v521_v21 }
 0x10b   :  { %v528_v28 = vmax.f32 %v510_v18, %v524_v23  ;;  %v525_v29 = vmul.f32 0.2, %v513_v24 }
 0x10c   :  { %v531_v30 = vmax.f32 %v521_v21, %v527_v26  ;;  %v539_v32 = vadd.f32 %v614_v27, %v530_v25 }
 0x10d   :  { %v529_v31 = vmax.f32 %v513_v24, %v525_v29  ;;  %v537_v34 = vadd.f32 %v614_v27, %v528_v28 }
 0x10e   :  { %v540_v33 = vadd.f32 %v614_v27, %v531_v30 }
 0x10f   :  { %v538_v35 = vadd.f32 %v614_v27, %v529_v31 }
 0x110   :  { %v631_v36 = vpack.c.bf16 %v540_v33, %v539_v32 }
 0x111   :  { %v626_v37 = vpack.c.bf16 %v538_v35, %v537_v34 }
 0x112   :  { %633 = vst [vmem:[%s931_s3 + $0x8] sm:$0xff] %v631_v36  }
 0x113   :  { %627 = vst [vmem:[%s931_s3] sm:$0xff] %v626_v37  }

// kernel: discriminator_aux_gan.9
= control target key start
LH: loop header
LB: loop body
LE: loop exit
PB: predicated region body
PF: predicated region fallthrough
CT: control target
= control target key end

     0   :  { %vm3500_vm0 = vcmask 17416   ;;  %s4894_s16 = smov 127   ;;  %vm3511_vm1 = vcmask 9216   ;;  %vm3517_vm2 = vcmask 7168   ;;  %vm3519_vm3 = vcmask 23552   ;;  %s6370_s1 = inlined_call_operand.vmem [shape: bf16[1152,256], index: 1, kind: input, shape index: {}]   ;;  %s6371_s0 = inlined_call_operand.vmem [shape: bf16[8,1152], index: 0, kind: input, shape index: {}]   ;;  %s6372_s3 = inlined_call_operand.vmem [shape: bf16[4,256,512], index: 3, kind: input, shape index: {}]   ;;  %s6373_s2 = inlined_call_operand.vmem [shape: f32[2,256], index: 2, kind: input, shape index: {}]   ;;  %s6374_s5 = inlined_call_operand.vmem [shape: bf16[512,128], index: 5, kind: input, shape index: {}]   ;;  %s6375_s4 = inlined_call_operand.vmem [shape: f32[2,512], index: 4, kind: input, shape index: {}]   ;;  %s6376_s6 = inlined_call_operand.vmem [shape: f32[1,128], index: 6, kind: input, shape index: {}]   ;;  %s6377_s7 = inlined_call_operand.vmem [shape: f32[2,128], index: 7, kind: output, shape index: {}]  }
   0x1   :  { %v4236_v0 = vld [vmem:[%s6370_s1 + $0x4] ss:$8 sps:$4 sm:$0xff]   ;;  %v4238_v1 = vld [vmem:[%s6370_s1] ss:$8 sps:$4 sm:$0xff]   ;;  %v4239_v2 = vld [vmem:[%s6370_s1 + $0x14] ss:$8 sps:$4 sm:$0xff]  }
   0x2   :  { %940 = vmatprep.subr.bf16.mxu0 %v4236_v0  ;;  %v4241_v3 = vld [vmem:[%s6370_s1 + $0x10] ss:$8 sps:$4 sm:$0xff]   ;;  %v4242_v4 = vld [vmem:[%s6370_s1 + $0x24] ss:$8 sps:$4 sm:$0xff]   ;;  %v4244_v5 = vld [vmem:[%s6370_s1 + $0x20] ss:$8 sps:$4 sm:$0xff]  }
   0x3   :  { %941 = vmatpush1.bf16.msra.mxu0 %v4238_v1  ;;  %v4245_v6 = vld [vmem:[%s6370_s1 + $0x34] ss:$8 sps:$4 sm:$0xff]   ;;  %v4247_v7 = vld [vmem:[%s6370_s1 + $0x30] ss:$8 sps:$4 sm:$0xff]   ;;  %v4248_v8 = vld [vmem:[%s6370_s1 + $0x44] ss:$8 sps:$4 sm:$0xff]  }
   0x4   :  { %942 = vmatprep.subr.bf16.mxu0 %v4239_v2  ;;  %v4250_v9 = vld [vmem:[%s6370_s1 + $0x40] ss:$8 sps:$4 sm:$0xff]   ;;  %v4251_v10 = vld [vmem:[%s6370_s1 + $0x54] ss:$8 sps:$4 sm:$0xff]   ;;  %v4253_v11 = vld [vmem:[%s6370_s1 + $0x50] ss:$8 sps:$4 sm:$0xff]  }
   0x5   :  { %v4254_v12 = vld [vmem:[%s6370_s1 + $0x64] ss:$8 sps:$4 sm:$0xff]   ;;  %v4256_v15 = vld [vmem:[%s6370_s1 + $0x60] ss:$8 sps:$4 sm:$0xff]   ;;  %v4257_v16 = vld [vmem:[%s6370_s1 + $0x74] ss:$8 sps:$4 sm:$0xff]  }
   0x6   :  { %v27_v13 = vld [vmem:[%s6371_s0] sm:$0xff]  ;;  %v4259_v17 = vld [vmem:[%s6370_s1 + $0x70] ss:$8 sps:$4 sm:$0xff]   ;;  %v4263_v20 = vld [vmem:[%s6370_s1 + $0x94] ss:$8 sps:$4 sm:$0xff]  }
   0x7   :  { %943 = vmatpush1.bf16.msra.mxu0 %v4241_v3  ;;  %v3527_v14 = vcombine.high %v27_v13, %v27_v13  ;;  %v4260_v18 = vld [vmem:[%s6370_s1 + $0x84] ss:$8 sps:$4 sm:$0xff]   ;;  %v4262_v19 = vld [vmem:[%s6370_s1 + $0x80] ss:$8 sps:$4 sm:$0xff]   ;;  %v4265_v21 = vld [vmem:[%s6370_s1 + $0x90] ss:$8 sps:$4 sm:$0xff]   ;;  %v3526_v36 = vcombine.low %v27_v13, %v27_v13 }
   0x8   :  { %944 = vmatprep.subr.bf16.mxu0 %v4242_v4  ;;  %v4266_v22 = vld [vmem:[%s6370_s1 + $0xa4] ss:$8 sps:$4 sm:$0xff]   ;;  %v4268_v23 = vld [vmem:[%s6370_s1 + $0xa0] ss:$8 sps:$4 sm:$0xff]   ;;  %v4269_v24 = vld [vmem:[%s6370_s1 + $0xb4] ss:$8 sps:$4 sm:$0xff]  }
   0x9   :  { %972 = vmatprep.mubr.bf16.mxu0 %v3527_v14  ;;  %v4271_v25 = vld [vmem:[%s6370_s1 + $0xb0] ss:$8 sps:$4 sm:$0xff]   ;;  %v4272_v26 = vld [vmem:[%s6370_s1 + $0xc4] ss:$8 sps:$4 sm:$0xff]   ;;  %v4274_v27 = vld [vmem:[%s6370_s1 + $0xc0] ss:$8 sps:$4 sm:$0xff]  }
   0xa   :  { %v4275_v28 = vld [vmem:[%s6370_s1 + $0xd4] ss:$8 sps:$4 sm:$0xff]   ;;  %v4277_v29 = vld [vmem:[%s6370_s1 + $0xd0] ss:$8 sps:$4 sm:$0xff]   ;;  %v4278_v30 = vld [vmem:[%s6370_s1 + $0xe4] ss:$8 sps:$4 sm:$0xff]  }
   0xb   :  { %945 = vmatpush1.bf16.msra.mxu0 %v4244_v5  ;;  %v4280_v31 = vld [vmem:[%s6370_s1 + $0xe0] ss:$8 sps:$4 sm:$0xff]   ;;  %v4281_v32 = vld [vmem:[%s6370_s1 + $0xf4] ss:$8 sps:$4 sm:$0xff]   ;;  %v4283_v33 = vld [vmem:[%s6370_s1 + $0xf0] ss:$8 sps:$4 sm:$0xff]  }
   0xc   :  { %946 = vmatprep.subr.bf16.mxu0 %v4245_v6  ;;  %v4288_v34 = vld [vmem:[%s6370_s1 + $0x104] ss:$8 sps:$4 sm:$0xff]   ;;  %v4286_v37 = vld [vmem:[%s6370_s1 + $0x100] ss:$8 sps:$4 sm:$0xff]   ;;  %v4291_v39 = vld [vmem:[%s6370_s1 + $0x114] ss:$8 sps:$4 sm:$0xff]  }
   0xd   :  { %v5040_v35 = vld [vmem:[%s6371_s0 + $0x8] sm:$0xff]  ;;  %v4289_v40 = vld [vmem:[%s6370_s1 + $0x110] ss:$8 sps:$4 sm:$0xff]   ;;  %v4297_v43 = vld [vmem:[%s6370_s1 + $0x134] ss:$8 sps:$4 sm:$0xff]  }
   0xe   :  { %v3529_v38 = vcombine.high %v5040_v35, %v5040_v35  ;;  %v4294_v41 = vld [vmem:[%s6370_s1 + $0x124] ss:$8 sps:$4 sm:$0xff]   ;;  %v4292_v42 = vld [vmem:[%s6370_s1 + $0x120] ss:$8 sps:$4 sm:$0xff]   ;;  %v4295_v44 = vld [vmem:[%s6370_s1 + $0x130] ss:$8 sps:$4 sm:$0xff]  }
   0xf   :  { %947 = vmatpush1.bf16.msra.mxu0 %v4247_v7  ;;  %v4300_v45 = vld [vmem:[%s6370_s1 + $0x144] ss:$8 sps:$4 sm:$0xff]   ;;  %v4298_v46 = vld [vmem:[%s6370_s1 + $0x140] ss:$8 sps:$4 sm:$0xff]   ;;  %v4303_v47 = vld [vmem:[%s6370_s1 + $0x154] ss:$8 sps:$4 sm:$0xff]   ;;  %v3528_v7 = vcombine.low %v5040_v35, %v5040_v35 }
  0x10   :  { %948 = vmatprep.subr.bf16.mxu0 %v4248_v8  ;;  %v4301_v48 = vld [vmem:[%s6370_s1 + $0x150] ss:$8 sps:$4 sm:$0xff]   ;;  %v4306_v49 = vld [vmem:[%s6370_s1 + $0x164] ss:$8 sps:$4 sm:$0xff]   ;;  %v4304_v50 = vld [vmem:[%s6370_s1 + $0x160] ss:$8 sps:$4 sm:$0xff]  }
  0x11   :  { %v4309_v51 = vld [vmem:[%s6370_s1 + $0x174] ss:$8 sps:$4 sm:$0xff]   ;;  %v4307_v52 = vld [vmem:[%s6370_s1 + $0x170] ss:$8 sps:$4 sm:$0xff]   ;;  %v4312_v53 = vld [vmem:[%s6370_s1 + $0x184] ss:$8 sps:$4 sm:$0xff]  }
  0x12   :  { %v4310_v54 = vld [vmem:[%s6370_s1 + $0x180] ss:$8 sps:$4 sm:$0xff]   ;;  %v4315_v55 = vld [vmem:[%s6370_s1 + $0x194] ss:$8 sps:$4 sm:$0xff]   ;;  %v4313_v56 = vld [vmem:[%s6370_s1 + $0x190] ss:$8 sps:$4 sm:$0xff]  }
  0x13   :  { %949 = vmatpush1.bf16.msra.mxu0 %v4250_v9  ;;  %v4318_v57 = vld [vmem:[%s6370_s1 + $0x1a4] ss:$8 sps:$4 sm:$0xff]   ;;  %v4316_v58 = vld [vmem:[%s6370_s1 + $0x1a0] ss:$8 sps:$4 sm:$0xff]   ;;  %v4321_v59 = vld [vmem:[%s6370_s1 + $0x1b4] ss:$8 sps:$4 sm:$0xff]  }
  0x14   :  { %950 = vmatprep.subr.bf16.mxu0 %v4251_v10  ;;  %v4319_v60 = vld [vmem:[%s6370_s1 + $0x1b0] ss:$8 sps:$4 sm:$0xff]   ;;  %v4324_v61 = vld [vmem:[%s6370_s1 + $0x1c4] ss:$8 sps:$4 sm:$0xff]   ;;  %v4322_v62 = vld [vmem:[%s6370_s1 + $0x1c0] ss:$8 sps:$4 sm:$0xff]  }
  0x15   :  { %v4327_v63 = vld [vmem:[%s6370_s1 + $0x1d4] ss:$8 sps:$4 sm:$0xff]   ;;  %v4325_v0 = vld [vmem:[%s6370_s1 + $0x1d0] ss:$8 sps:$4 sm:$0xff]   ;;  %v4330_v1 = vld [vmem:[%s6370_s1 + $0x1e4] ss:$8 sps:$4 sm:$0xff]  }
  0x16   :  { %v4328_v2 = vld [vmem:[%s6370_s1 + $0x1e0] ss:$8 sps:$4 sm:$0xff]   ;;  %v4333_v3 = vld [vmem:[%s6370_s1 + $0x1f4] ss:$8 sps:$4 sm:$0xff]   ;;  %v4331_v4 = vld [vmem:[%s6370_s1 + $0x1f0] ss:$8 sps:$4 sm:$0xff]  }
  0x17   :  { %951 = vmatpush1.bf16.msra.mxu0 %v4253_v11  ;;  %v4338_v5 = vld [vmem:[%s6370_s1 + $0x204] ss:$8 sps:$4 sm:$0xff]   ;;  %v5143_v6 = vld [vmem:[%s6371_s0 + $0x10] sm:$0xff]  ;;  %v4336_v8 = vld [vmem:[%s6370_s1 + $0x200] ss:$8 sps:$4 sm:$0xff]  }
  0x18   :  { %952 = vmatprep.subr.bf16.mxu0 %v4254_v12  ;;  %v3531_v9 = vcombine.high %v5143_v6, %v5143_v6  ;;  %v4341_v10 = vld [vmem:[%s6370_s1 + $0x214] ss:$8 sps:$4 sm:$0xff]   ;;  %v4339_v11 = vld [vmem:[%s6370_s1 + $0x210] ss:$8 sps:$4 sm:$0xff]   ;;  %v4344_v12 = vld [vmem:[%s6370_s1 + $0x224] ss:$8 sps:$4 sm:$0xff]  }
  0x19   :  { %v4342_v13 = vld [vmem:[%s6370_s1 + $0x220] ss:$8 sps:$4 sm:$0xff]   ;;  %v4347_v14 = vld [vmem:[%s6370_s1 + $0x234] ss:$8 sps:$4 sm:$0xff]  }
  0x1a   :  { %v4473_v35 = vld [vmem:[%s6372_s3 + $0x244] ss:$16 sps:$4 sm:$0xff]  }
  0x1b   :  { %953 = vmatpush1.bf16.msra.mxu0 %v4256_v15  ;;  %v4345_v15 = vld [vmem:[%s6370_s1 + $0x230] ss:$8 sps:$4 sm:$0xff]  }
  0x1c   :  { %954 = vmatprep.subr.bf16.mxu0 %v4257_v16  ;;  %v4350_v16 = vld [vmem:[%s6370_s1 + $0x244] ss:$8 sps:$4 sm:$0xff]  }
  0x1f   :  { %955 = vmatpush1.bf16.msra.mxu0 %v4259_v17  ;;  %v4348_v17 = vld [vmem:[%s6370_s1 + $0x240] ss:$8 sps:$4 sm:$0xff]  }
  0x20   :  { %956 = vmatprep.subr.bf16.mxu0 %v4260_v18  ;;  %v4353_v18 = vld [vmem:[%s6370_s1 + $0x254] ss:$8 sps:$4 sm:$0xff]  }
  0x23   :  { %957 = vmatpush1.bf16.msra.mxu0 %v4262_v19  ;;  %v4351_v19 = vld [vmem:[%s6370_s1 + $0x250] ss:$8 sps:$4 sm:$0xff]  }
  0x24   :  { %958 = vmatprep.subr.bf16.mxu0 %v4263_v20  ;;  %v4356_v20 = vld [vmem:[%s6370_s1 + $0x264] ss:$8 sps:$4 sm:$0xff]  }
  0x27   :  { %959 = vmatpush1.bf16.msra.mxu0 %v4265_v21  ;;  %v4354_v21 = vld [vmem:[%s6370_s1 + $0x260] ss:$8 sps:$4 sm:$0xff]  }
  0x28   :  { %960 = vmatprep.subr.bf16.mxu0 %v4266_v22  ;;  %v4359_v22 = vld [vmem:[%s6370_s1 + $0x274] ss:$8 sps:$4 sm:$0xff]  }
  0x2b   :  { %961 = vmatpush1.bf16.msra.mxu0 %v4268_v23  ;;  %v4357_v23 = vld [vmem:[%s6370_s1 + $0x270] ss:$8 sps:$4 sm:$0xff]  }
  0x2c   :  { %962 = vmatprep.subr.bf16.mxu0 %v4269_v24  ;;  %v4362_v24 = vld [vmem:[%s6370_s1 + $0x284] ss:$8 sps:$4 sm:$0xff]  }
  0x2f   :  { %963 = vmatpush1.bf16.msra.mxu0 %v4271_v25  ;;  %v4360_v25 = vld [vmem:[%s6370_s1 + $0x280] ss:$8 sps:$4 sm:$0xff]  }
  0x30   :  { %964 = vmatprep.subr.bf16.mxu0 %v4272_v26  ;;  %v4365_v26 = vld [vmem:[%s6370_s1 + $0x294] ss:$8 sps:$4 sm:$0xff]  }
  0x33   :  { %965 = vmatpush1.bf16.msra.mxu0 %v4274_v27  ;;  %v4363_v27 = vld [vmem:[%s6370_s1 + $0x290] ss:$8 sps:$4 sm:$0xff]  }
  0x34   :  { %966 = vmatprep.subr.bf16.mxu0 %v4275_v28  ;;  %v4461_v28 = vld [vmem:[%s6372_s3 + $0x204] ss:$16 sps:$4 sm:$0xff]  }
  0x35   :  { %1633 = vmatprep.subr.bf16.mxu1 %v4461_v28  ;;  %v4428_v28 = vld [vmem:[%s6370_s1 + $0x3e0] ss:$8 sps:$4 sm:$0xff]  }
  0x37   :  { %967 = vmatpush1.bf16.msra.mxu0 %v4277_v29  ;;  %v4368_v29 = vld [vmem:[%s6370_s1 + $0x2a4] ss:$8 sps:$4 sm:$0xff]  }
  0x38   :  { %968 = vmatprep.subr.bf16.mxu0 %v4278_v30  ;;  %v4466_v30 = vld [vmem:[%s6372_s3 + $0x200] ss:$16 sps:$4 sm:$0xff]  }
  0x39   :  { %1634 = vmatpush1.bf16.msra.mxu1 %v4466_v30  ;;  %v4431_v30 = vld [vmem:[%s6370_s1 + $0x3f0] ss:$8 sps:$4 sm:$0xff]  }
  0x3b   :  { %969 = vmatpush1.bf16.msra.mxu0 %v4280_v31  ;;  %v4467_v31 = vld [vmem:[%s6372_s3 + $0x224] ss:$16 sps:$4 sm:$0xff]  }
  0x3c   :  { %970 = vmatprep.subr.bf16.mxu0 %v4281_v32  ;;  %v4366_v32 = vld [vmem:[%s6370_s1 + $0x2a0] ss:$8 sps:$4 sm:$0xff]   ;;  %1635 = vmatprep.subr.bf16.mxu1 %v4467_v31  ;;  %v4438_v31 = vld [vmem:[%s6370_s1 + $0x404] ss:$8 sps:$4 sm:$0xff]  }
  0x3f   :  { %971 = vmatpush1.bf16.msra.mxu0 %v4283_v33  ;;  %v4371_v33 = vld [vmem:[%s6370_s1 + $0x2b4] ss:$8 sps:$4 sm:$0xff]  }
  0x40   :  { %981 = vmatprep.subr.bf16.mxu0 %v4288_v34  ;;  %v4472_v34 = vld [vmem:[%s6372_s3 + $0x220] ss:$16 sps:$4 sm:$0xff]  }
  0x41   :  { %1636 = vmatpush1.bf16.msra.mxu1 %v4472_v34  ;;  %v4441_v34 = vld [vmem:[%s6370_s1 + $0x414] ss:$8 sps:$4 sm:$0xff]  }
  0x42   :  { %973 = vmatmul.mubr.bf16.vlgmr.msra.gmra.mrb[0].mxu0 %v3526_v36  ;;  %v4369_v36 = vld [vmem:[%s6370_s1 + $0x2b0] ss:$8 sps:$4 sm:$0xff]   ;;  %1637 = vmatprep.subr.bf16.mxu1 %v4473_v35 }
  0x43   :  { %982 = vmatpush1.bf16.msra.mxu0 %v4286_v37  ;;  %1013 = vmatprep.mubr.bf16.mxu0 %v3529_v38  ;;  %v4374_v37 = vld [vmem:[%s6370_s1 + $0x2c4] ss:$8 sps:$4 sm:$0xff]   ;;  %v4478_v38 = vld [vmem:[%s6372_s3 + $0x240] ss:$16 sps:$4 sm:$0xff]  }
  0x44   :  { %983 = vmatprep.subr.bf16.mxu0 %v4291_v39  ;;  %v4479_v39 = vld [vmem:[%s6372_s3 + $0x264] ss:$16 sps:$4 sm:$0xff]   ;;  %v4439_v35 = vld [vmem:[%s6370_s1 + $0x410] ss:$8 sps:$4 sm:$0xff]  }
  0x45   :  { %1638 = vmatpush1.bf16.msra.mxu1 %v4478_v38  ;;  %v4442_v38 = vld [vmem:[%s6370_s1 + $0x420] ss:$8 sps:$4 sm:$0xff]  }
  0x46   :  { %1639 = vmatprep.subr.bf16.mxu1 %v4479_v39  ;;  %v4447_v39 = vld [vmem:[%s6370_s1 + $0x434] ss:$8 sps:$4 sm:$0xff]  }
  0x47   :  { %984 = vmatpush1.bf16.msra.mxu0 %v4289_v40  ;;  %v4372_v40 = vld [vmem:[%s6370_s1 + $0x2c0] ss:$8 sps:$4 sm:$0xff]  }
  0x48   :  { %985 = vmatprep.subr.bf16.mxu0 %v4294_v41  ;;  %v4377_v41 = vld [vmem:[%s6370_s1 + $0x2d4] ss:$8 sps:$4 sm:$0xff]  }
  0x4b   :  { %986 = vmatpush1.bf16.msra.mxu0 %v4292_v42  ;;  %v4484_v42 = vld [vmem:[%s6372_s3 + $0x260] ss:$16 sps:$4 sm:$0xff]  }
  0x4c   :  { %987 = vmatprep.subr.bf16.mxu0 %v4297_v43  ;;  %v4485_v43 = vld [vmem:[%s6372_s3 + $0x284] ss:$16 sps:$4 sm:$0xff]   ;;  %1640 = vmatpush1.bf16.msra.mxu1 %v4484_v42  ;;  %v4448_v42 = vld [vmem:[%s6370_s1 + $0x440] ss:$8 sps:$4 sm:$0xff]  }
  0x4d   :  { %1641 = vmatprep.subr.bf16.mxu1 %v4485_v43  ;;  %v4453_v43 = vld [vmem:[%s6370_s1 + $0x454] ss:$8 sps:$4 sm:$0xff]  }
  0x4f   :  { %988 = vmatpush1.bf16.msra.mxu0 %v4295_v44  ;;  %v4375_v44 = vld [vmem:[%s6370_s1 + $0x2d0] ss:$8 sps:$4 sm:$0xff]  }
  0x50   :  { %989 = vmatprep.subr.bf16.mxu0 %v4300_v45  ;;  %v4380_v45 = vld [vmem:[%s6370_s1 + $0x2e4] ss:$8 sps:$4 sm:$0xff]  }
  0x53   :  { %990 = vmatpush1.bf16.msra.mxu0 %v4298_v46  ;;  %v4490_v46 = vld [vmem:[%s6372_s3 + $0x280] ss:$16 sps:$4 sm:$0xff]  }
  0x54   :  { %991 = vmatprep.subr.bf16.mxu0 %v4303_v47  ;;  %v4491_v47 = vld [vmem:[%s6372_s3 + $0x2a4] ss:$16 sps:$4 sm:$0xff]   ;;  %1642 = vmatpush1.bf16.msra.mxu1 %v4490_v46  ;;  %v4454_v46 = vld [vmem:[%s6370_s1 + $0x460] ss:$8 sps:$4 sm:$0xff]  }
  0x55   :  { %1643 = vmatprep.subr.bf16.mxu1 %v4491_v47  ;;  %v4459_v47 = vld [vmem:[%s6370_s1 + $0x474] ss:$8 sps:$4 sm:$0xff]  }
  0x57   :  { %992 = vmatpush1.bf16.msra.mxu0 %v4301_v48  ;;  %v4378_v48 = vld [vmem:[%s6370_s1 + $0x2e0] ss:$8 sps:$4 sm:$0xff]  }
  0x58   :  { %993 = vmatprep.subr.bf16.mxu0 %v4306_v49  ;;  %v4383_v49 = vld [vmem:[%s6370_s1 + $0x2f4] ss:$8 sps:$4 sm:$0xff]  }
  0x5b   :  { %994 = vmatpush1.bf16.msra.mxu0 %v4304_v50  ;;  %v4496_v50 = vld [vmem:[%s6372_s3 + $0x2a0] ss:$16 sps:$4 sm:$0xff]  }
  0x5c   :  { %995 = vmatprep.subr.bf16.mxu0 %v4309_v51  ;;  %v4497_v51 = vld [vmem:[%s6372_s3 + $0x2c4] ss:$16 sps:$4 sm:$0xff]   ;;  %1644 = vmatpush1.bf16.msra.mxu1 %v4496_v50  ;;  %v4460_v50 = vld [vmem:[%s6371_s0 + $0x20] ss:$0 sps:$4 sm:$0xff]  }
  0x5d   :  { %1645 = vmatprep.subr.bf16.mxu1 %v4497_v51  ;;  %v4463_v51 = vld [vmem:[%s6372_s3 + $0x408] ss:$16 sps:$4 sm:$0xff]  }
  0x5f   :  { %996 = vmatpush1.bf16.msra.mxu0 %v4307_v52  ;;  %v4381_v52 = vld [vmem:[%s6370_s1 + $0x2f0] ss:$8 sps:$4 sm:$0xff]  }
  0x60   :  { %997 = vmatprep.subr.bf16.mxu0 %v4312_v53  ;;  %v4388_v53 = vld [vmem:[%s6370_s1 + $0x304] ss:$8 sps:$4 sm:$0xff]  }
  0x63   :  { %998 = vmatpush1.bf16.msra.mxu0 %v4310_v54  ;;  %v5287_v54 = vld [vmem:[%s6371_s0 + $0x18] sm:$0xff] }
  0x64   :  { %999 = vmatprep.subr.bf16.mxu0 %v4315_v55  ;;  %v4502_v55 = vld [vmem:[%s6372_s3 + $0x2c0] ss:$16 sps:$4 sm:$0xff]  }
  0x65   :  { %1646 = vmatpush1.bf16.msra.mxu1 %v4502_v55  ;;  %v4475_v55 = vld [vmem:[%s6372_s3 + $0x448] ss:$16 sps:$4 sm:$0xff]  }
  0x67   :  { %1000 = vmatpush1.bf16.msra.mxu0 %v4313_v56  ;;  %v4503_v56 = vld [vmem:[%s6372_s3 + $0x2e4] ss:$16 sps:$4 sm:$0xff]  }
  0x68   :  { %1001 = vmatprep.subr.bf16.mxu0 %v4318_v57  ;;  %v3530_v57 = vcombine.low %v5143_v6, %v5143_v6  ;;  %1647 = vmatprep.subr.bf16.mxu1 %v4503_v56  ;;  %v4395_v6 = vld [vmem:[%s6370_s1 + $0x330] ss:$8 sps:$4 sm:$0xff]   ;;  %v4483_v56 = vld [vmem:[%s6372_s3 + $0x46c] ss:$16 sps:$4 sm:$0xff]  }
  0x6b   :  { %1002 = vmatpush1.bf16.msra.mxu0 %v4316_v58  ;;  %v4386_v58 = vld [vmem:[%s6370_s1 + $0x300] ss:$8 sps:$4 sm:$0xff]  }
  0x6c   :  { %1003 = vmatprep.subr.bf16.mxu0 %v4321_v59  ;;  %v4391_v59 = vld [vmem:[%s6370_s1 + $0x314] ss:$8 sps:$4 sm:$0xff]  }
  0x6f   :  { %1004 = vmatpush1.bf16.msra.mxu0 %v4319_v60  ;;  %v3533_v60 = vcombine.high %v5287_v54, %v5287_v54 }
  0x70   :  { %1005 = vmatprep.subr.bf16.mxu0 %v4324_v61  ;;  %v4508_v61 = vld [vmem:[%s6372_s3 + $0x2e0] ss:$16 sps:$4 sm:$0xff]  }
  0x71   :  { %1648 = vmatpush1.bf16.msra.mxu1 %v4508_v61  ;;  %v4493_v61 = vld [vmem:[%s6372_s3 + $0x4a8] ss:$16 sps:$4 sm:$0xff]  }
  0x73   :  { %1006 = vmatpush1.bf16.msra.mxu0 %v4322_v62  ;;  %v4509_v62 = vld [vmem:[%s6372_s3 + $0x304] ss:$16 sps:$4 sm:$0xff]  }
  0x74   :  { %1007 = vmatprep.subr.bf16.mxu0 %v4327_v63  ;;  %v4389_v63 = vld [vmem:[%s6370_s1 + $0x310] ss:$8 sps:$4 sm:$0xff]   ;;  %1649 = vmatprep.subr.bf16.mxu1 %v4509_v62  ;;  %v4501_v62 = vld [vmem:[%s6372_s3 + $0x4cc] ss:$16 sps:$4 sm:$0xff]  }
  0x77   :  { %1008 = vmatpush1.bf16.msra.mxu0 %v4325_v0  ;;  %v4394_v0 = vld [vmem:[%s6370_s1 + $0x324] ss:$8 sps:$4 sm:$0xff]  }
  0x78   :  { %1009 = vmatprep.subr.bf16.mxu0 %v4330_v1  ;;  %v4514_v1 = vld [vmem:[%s6372_s3 + $0x300] ss:$16 sps:$4 sm:$0xff]  }
  0x79   :  { %1650 = vmatpush1.bf16.msra.mxu1 %v4514_v1  ;;  %v4505_v1 = vld [vmem:[%s6372_s3 + $0x4e8] ss:$16 sps:$4 sm:$0xff]  }
  0x7b   :  { %1010 = vmatpush1.bf16.msra.mxu0 %v4328_v2  ;;  %v4515_v2 = vld [vmem:[%s6372_s3 + $0x324] ss:$16 sps:$4 sm:$0xff]  }
  0x7c   :  { %1011 = vmatprep.subr.bf16.mxu0 %v4333_v3  ;;  %v4392_v3 = vld [vmem:[%s6370_s1 + $0x320] ss:$8 sps:$4 sm:$0xff]   ;;  %1651 = vmatprep.subr.bf16.mxu1 %v4515_v2  ;;  %v4513_v2 = vld [vmem:[%s6372_s3 + $0x50c] ss:$16 sps:$4 sm:$0xff]  }
  0x7f   :  { %1012 = vmatpush1.bf16.msra.mxu0 %v4331_v4  ;;  %v4397_v4 = vld [vmem:[%s6370_s1 + $0x334] ss:$8 sps:$4 sm:$0xff]  }
  0x80   :  { %1022 = vmatprep.subr.bf16.mxu0 %v4338_v5  ;;  %v4520_v5 = vld [vmem:[%s6372_s3 + $0x320] ss:$16 sps:$4 sm:$0xff]  }
  0x81   :  { %1652 = vmatpush1.bf16.msra.mxu1 %v4520_v5  ;;  %v4517_v5 = vld [vmem:[%s6372_s3 + $0x528] ss:$16 sps:$4 sm:$0xff]  }
  0x82   :  { %1014 = vmatmul.mubr.bf16.vlgmr.msra.gmra.mrb[0].mxu0 %v3528_v7  ;;  %v4400_v7 = vld [vmem:[%s6370_s1 + $0x344] ss:$8 sps:$4 sm:$0xff]  }
  0x83   :  { %1023 = vmatpush1.bf16.msra.mxu0 %v4336_v8  ;;  %1054 = vmatprep.mubr.bf16.mxu0 %v3531_v9  ;;  %v4398_v8 = vld [vmem:[%s6370_s1 + $0x340] ss:$8 sps:$4 sm:$0xff]   ;;  %v4403_v9 = vld [vmem:[%s6370_s1 + $0x354] ss:$8 sps:$4 sm:$0xff]  }
  0x84   :  { %1024 = vmatprep.subr.bf16.mxu0 %v4341_v10  ;;  %v4401_v10 = vld [vmem:[%s6370_s1 + $0x350] ss:$8 sps:$4 sm:$0xff]  }
  0x87   :  { %1025 = vmatpush1.bf16.msra.mxu0 %v4339_v11  ;;  %v4406_v11 = vld [vmem:[%s6370_s1 + $0x364] ss:$8 sps:$4 sm:$0xff]  }
  0x88   :  { %1026 = vmatprep.subr.bf16.mxu0 %v4344_v12  ;;  %v4404_v12 = vld [vmem:[%s6370_s1 + $0x360] ss:$8 sps:$4 sm:$0xff]  }
  0x8b   :  { %1027 = vmatpush1.bf16.msra.mxu0 %v4342_v13  ;;  %v4409_v13 = vld [vmem:[%s6370_s1 + $0x374] ss:$8 sps:$4 sm:$0xff]  }
  0x8c   :  { %1028 = vmatprep.subr.bf16.mxu0 %v4347_v14  ;;  %v4407_v14 = vld [vmem:[%s6370_s1 + $0x370] ss:$8 sps:$4 sm:$0xff]  }
  0x8f   :  { %1029 = vmatpush1.bf16.msra.mxu0 %v4345_v15  ;;  %v4412_v15 = vld [vmem:[%s6370_s1 + $0x384] ss:$8 sps:$4 sm:$0xff]  }
  0x90   :  { %1030 = vmatprep.subr.bf16.mxu0 %v4350_v16  ;;  %v4410_v16 = vld [vmem:[%s6370_s1 + $0x380] ss:$8 sps:$4 sm:$0xff]  }
  0x93   :  { %1031 = vmatpush1.bf16.msra.mxu0 %v4348_v17  ;;  %v4415_v17 = vld [vmem:[%s6370_s1 + $0x394] ss:$8 sps:$4 sm:$0xff]  }
  0x94   :  { %1032 = vmatprep.subr.bf16.mxu0 %v4353_v18  ;;  %v4413_v18 = vld [vmem:[%s6370_s1 + $0x390] ss:$8 sps:$4 sm:$0xff]  }
  0x97   :  { %1033 = vmatpush1.bf16.msra.mxu0 %v4351_v19  ;;  %v4418_v19 = vld [vmem:[%s6370_s1 + $0x3a4] ss:$8 sps:$4 sm:$0xff]  }
  0x98   :  { %1034 = vmatprep.subr.bf16.mxu0 %v4356_v20  ;;  %v4416_v20 = vld [vmem:[%s6370_s1 + $0x3a0] ss:$8 sps:$4 sm:$0xff]  }
  0x9b   :  { %1035 = vmatpush1.bf16.msra.mxu0 %v4354_v21  ;;  %v4421_v21 = vld [vmem:[%s6370_s1 + $0x3b4] ss:$8 sps:$4 sm:$0xff]  }
  0x9c   :  { %1036 = vmatprep.subr.bf16.mxu0 %v4359_v22  ;;  %v4419_v22 = vld [vmem:[%s6370_s1 + $0x3b0] ss:$8 sps:$4 sm:$0xff]  }
  0x9f   :  { %1037 = vmatpush1.bf16.msra.mxu0 %v4357_v23  ;;  %v4424_v23 = vld [vmem:[%s6370_s1 + $0x3c4] ss:$8 sps:$4 sm:$0xff]  }
  0xa0   :  { %1038 = vmatprep.subr.bf16.mxu0 %v4362_v24  ;;  %v4422_v24 = vld [vmem:[%s6370_s1 + $0x3c0] ss:$8 sps:$4 sm:$0xff]  }
  0xa3   :  { %1039 = vmatpush1.bf16.msra.mxu0 %v4360_v25  ;;  %v4427_v25 = vld [vmem:[%s6370_s1 + $0x3d4] ss:$8 sps:$4 sm:$0xff]  }
  0xa4   :  { %1040 = vmatprep.subr.bf16.mxu0 %v4365_v26  ;;  %v4425_v26 = vld [vmem:[%s6370_s1 + $0x3d0] ss:$8 sps:$4 sm:$0xff]  }
  0xa7   :  { %1041 = vmatpush1.bf16.msra.mxu0 %v4363_v27  ;;  %v4430_v27 = vld [vmem:[%s6370_s1 + $0x3e4] ss:$8 sps:$4 sm:$0xff]  }
  0xa8   :  { %1042 = vmatprep.subr.bf16.mxu0 %v4368_v29  ;;  %v4433_v29 = vld [vmem:[%s6370_s1 + $0x3f4] ss:$8 sps:$4 sm:$0xff]  }
  0xab   :  { %1043 = vmatpush1.bf16.msra.mxu0 %v4366_v32  ;;  %v4436_v32 = vld [vmem:[%s6370_s1 + $0x400] ss:$8 sps:$4 sm:$0xff]  }
  0xac   :  { %1044 = vmatprep.subr.bf16.mxu0 %v4371_v33  ;;  %v3532_v33 = vcombine.low %v5287_v54, %v5287_v54  ;;  %v4477_v54 = vld [vmem:[%s6372_s3 + $0x44c] ss:$16 sps:$4 sm:$0xff]  }
  0xaf   :  { %1045 = vmatpush1.bf16.msra.mxu0 %v4369_v36  ;;  %v4444_v36 = vld [vmem:[%s6370_s1 + $0x424] ss:$8 sps:$4 sm:$0xff]  }
  0xb0   :  { %1046 = vmatprep.subr.bf16.mxu0 %v4374_v37  ;;  %v4893_v37 = vmov 0  }
  0xb3   :  { %1047 = vmatpush1.bf16.msra.mxu0 %v4372_v40  ;;  %v4445_v40 = vld [vmem:[%s6370_s1 + $0x430] ss:$8 sps:$4 sm:$0xff]  }
  0xb4   :  { %1048 = vmatprep.subr.bf16.mxu0 %v4377_v41  ;;  %v4450_v41 = vld [vmem:[%s6370_s1 + $0x444] ss:$8 sps:$4 sm:$0xff]  }
  0xb7   :  { %1049 = vmatpush1.bf16.msra.mxu0 %v4375_v44  ;;  %v4451_v44 = vld [vmem:[%s6370_s1 + $0x450] ss:$8 sps:$4 sm:$0xff]  }
  0xb8   :  { %1050 = vmatprep.subr.bf16.mxu0 %v4380_v45  ;;  %v4456_v45 = vld [vmem:[%s6370_s1 + $0x464] ss:$8 sps:$4 sm:$0xff]  }
  0xbb   :  { %1051 = vmatpush1.bf16.msra.mxu0 %v4378_v48  ;;  %v4457_v48 = vld [vmem:[%s6370_s1 + $0x470] ss:$8 sps:$4 sm:$0xff]  }
  0xbc   :  { %1052 = vmatprep.subr.bf16.mxu0 %v4383_v49  ;;  %v4465_v49 = vld [vmem:[%s6372_s3 + $0x40c] ss:$16 sps:$4 sm:$0xff]  }
  0xbf   :  { %1053 = vmatpush1.bf16.msra.mxu0 %v4381_v52  ;;  %v4471_v52 = vld [vmem:[%s6372_s3 + $0x42c] ss:$16 sps:$4 sm:$0xff]  }
  0xc0   :  { %1063 = vmatprep.subr.bf16.mxu0 %v4388_v53  ;;  %v4469_v53 = vld [vmem:[%s6372_s3 + $0x428] ss:$16 sps:$4 sm:$0xff]  }
  0xc2   :  { %1055 = vmatmul.mubr.bf16.vlgmr.msra.gmra.mrb[0].mxu0 %v3530_v57  ;;  %v4481_v57 = vld [vmem:[%s6372_s3 + $0x468] ss:$16 sps:$4 sm:$0xff]  }
  0xc3   :  { %1064 = vmatpush1.bf16.msra.mxu0 %v4386_v58  ;;  %1095 = vmatprep.mubr.bf16.mxu0 %v3533_v60  ;;  %v4489_v58 = vld [vmem:[%s6372_s3 + $0x48c] ss:$16 sps:$4 sm:$0xff]  }
  0xc4   :  { %1065 = vmatprep.subr.bf16.mxu0 %v4391_v59  ;;  %v4487_v59 = vld [vmem:[%s6372_s3 + $0x488] ss:$16 sps:$4 sm:$0xff]   ;;  %v4495_v60 = vld [vmem:[%s6372_s3 + $0x4ac] ss:$16 sps:$4 sm:$0xff]  }
  0xc7   :  { %1066 = vmatpush1.bf16.msra.mxu0 %v4389_v63  ;;  %v4499_v63 = vld [vmem:[%s6372_s3 + $0x4c8] ss:$16 sps:$4 sm:$0xff]  }
  0xc8   :  { %1067 = vmatprep.subr.bf16.mxu0 %v4394_v0  ;;  %v4507_v0 = vld [vmem:[%s6372_s3 + $0x4ec] ss:$16 sps:$4 sm:$0xff]  }
  0xcb   :  { %1068 = vmatpush1.bf16.msra.mxu0 %v4392_v3  ;;  %v4511_v3 = vld [vmem:[%s6372_s3 + $0x508] ss:$16 sps:$4 sm:$0xff]  }
  0xcc   :  { %1069 = vmatprep.subr.bf16.mxu0 %v4397_v4  ;;  %v4519_v4 = vld [vmem:[%s6372_s3 + $0x52c] ss:$16 sps:$4 sm:$0xff]  }
  0xcf   :  { %1070 = vmatpush1.bf16.msra.mxu0 %v4395_v6  ;;  %v4521_v6 = vld [vmem:[%s6372_s3 + $0x344] ss:$16 sps:$4 sm:$0xff]  }
  0xd0   :  { %1071 = vmatprep.subr.bf16.mxu0 %v4400_v7  ;;  %v4525_v7 = vld [vmem:[%s6372_s3 + $0x54c] ss:$16 sps:$4 sm:$0xff]   ;;  %1653 = vmatprep.subr.bf16.mxu1 %v4521_v6 }
  0xd1   :  { %v4574_v6 = vld [vmem:[%s6372_s3 + $0x62c] ss:$16 sps:$4 sm:$0xff]  }
  0xd3   :  { %1072 = vmatpush1.bf16.msra.mxu0 %v4398_v8  ;;  %v4523_v8 = vld [vmem:[%s6372_s3 + $0x548] ss:$16 sps:$4 sm:$0xff]  }
  0xd4   :  { %1073 = vmatprep.subr.bf16.mxu0 %v4403_v9  ;;  %v4526_v9 = vld [vmem:[%s6372_s3 + $0x340] ss:$16 sps:$4 sm:$0xff]  }
  0xd5   :  { %1654 = vmatpush1.bf16.msra.mxu1 %v4526_v9  ;;  %v4572_v9 = vld [vmem:[%s6372_s3 + $0x628] ss:$16 sps:$4 sm:$0xff]  }
  0xd7   :  { %1074 = vmatpush1.bf16.msra.mxu0 %v4401_v10  ;;  %v4527_v10 = vld [vmem:[%s6372_s3 + $0x364] ss:$16 sps:$4 sm:$0xff]  }
  0xd8   :  { %1075 = vmatprep.subr.bf16.mxu0 %v4406_v11  ;;  %v4531_v11 = vld [vmem:[%s6372_s3 + $0x56c] ss:$16 sps:$4 sm:$0xff]   ;;  %1655 = vmatprep.subr.bf16.mxu1 %v4527_v10 }
  0xd9   :  { %v4577_v10 = vld [vmem:[%s6372_s3 + $0x24c] ss:$16 sps:$4 sm:$0xff]  }
  0xdb   :  { %1076 = vmatpush1.bf16.msra.mxu0 %v4404_v12  ;;  %v4529_v12 = vld [vmem:[%s6372_s3 + $0x568] ss:$16 sps:$4 sm:$0xff]  }
  0xdc   :  { %1077 = vmatprep.subr.bf16.mxu0 %v4409_v13  ;;  %v4532_v13 = vld [vmem:[%s6372_s3 + $0x360] ss:$16 sps:$4 sm:$0xff]  }
  0xdd   :  { %1656 = vmatpush1.bf16.msra.mxu1 %v4532_v13  ;;  %v4578_v13 = vld [vmem:[%s6372_s3 + $0x648] ss:$16 sps:$4 sm:$0xff]  }
  0xdf   :  { %1078 = vmatpush1.bf16.msra.mxu0 %v4407_v14  ;;  %v4533_v14 = vld [vmem:[%s6372_s3 + $0x384] ss:$16 sps:$4 sm:$0xff]  }
  0xe0   :  { %1079 = vmatprep.subr.bf16.mxu0 %v4412_v15  ;;  %v4537_v15 = vld [vmem:[%s6372_s3 + $0x58c] ss:$16 sps:$4 sm:$0xff]   ;;  %1657 = vmatprep.subr.bf16.mxu1 %v4533_v14 }
  0xe1   :  { %v4583_v14 = vld [vmem:[%s6372_s3 + $0x26c] ss:$16 sps:$4 sm:$0xff]  }
  0xe3   :  { %1080 = vmatpush1.bf16.msra.mxu0 %v4410_v16  ;;  %v4535_v16 = vld [vmem:[%s6372_s3 + $0x588] ss:$16 sps:$4 sm:$0xff]  }
  0xe4   :  { %1081 = vmatprep.subr.bf16.mxu0 %v4415_v17  ;;  %v4538_v17 = vld [vmem:[%s6372_s3 + $0x380] ss:$16 sps:$4 sm:$0xff]  }
  0xe5   :  { %1658 = vmatpush1.bf16.msra.mxu1 %v4538_v17  ;;  %v4584_v17 = vld [vmem:[%s6372_s3 + $0x668] ss:$16 sps:$4 sm:$0xff]  }
  0xe7   :  { %1082 = vmatpush1.bf16.msra.mxu0 %v4413_v18  ;;  %v4539_v18 = vld [vmem:[%s6372_s3 + $0x3a4] ss:$16 sps:$4 sm:$0xff]  }
  0xe8   :  { %1083 = vmatprep.subr.bf16.mxu0 %v4418_v19  ;;  %v4543_v19 = vld [vmem:[%s6372_s3 + $0x5ac] ss:$16 sps:$4 sm:$0xff]   ;;  %1659 = vmatprep.subr.bf16.mxu1 %v4539_v18 }
  0xe9   :  { %v4589_v18 = vld [vmem:[%s6372_s3 + $0x28c] ss:$16 sps:$4 sm:$0xff]  }
  0xeb   :  { %1084 = vmatpush1.bf16.msra.mxu0 %v4416_v20  ;;  %v4541_v20 = vld [vmem:[%s6372_s3 + $0x5a8] ss:$16 sps:$4 sm:$0xff]  }
  0xec   :  { %1085 = vmatprep.subr.bf16.mxu0 %v4421_v21  ;;  %v4544_v21 = vld [vmem:[%s6372_s3 + $0x3a0] ss:$16 sps:$4 sm:$0xff]  }
  0xed   :  { %1660 = vmatpush1.bf16.msra.mxu1 %v4544_v21  ;;  %v4590_v21 = vld [vmem:[%s6372_s3 + $0x688] ss:$16 sps:$4 sm:$0xff]  }
  0xef   :  { %1086 = vmatpush1.bf16.msra.mxu0 %v4419_v22  ;;  %v4545_v22 = vld [vmem:[%s6372_s3 + $0x3c4] ss:$16 sps:$4 sm:$0xff]  }
  0xf0   :  { %1087 = vmatprep.subr.bf16.mxu0 %v4424_v23  ;;  %v4549_v23 = vld [vmem:[%s6372_s3 + $0x5cc] ss:$16 sps:$4 sm:$0xff]   ;;  %1661 = vmatprep.subr.bf16.mxu1 %v4545_v22 }
  0xf1   :  { %v4595_v22 = vld [vmem:[%s6372_s3 + $0x2ac] ss:$16 sps:$4 sm:$0xff]  }
  0xf3   :  { %1088 = vmatpush1.bf16.msra.mxu0 %v4422_v24  ;;  %v4547_v24 = vld [vmem:[%s6372_s3 + $0x5c8] ss:$16 sps:$4 sm:$0xff]  }
  0xf4   :  { %1089 = vmatprep.subr.bf16.mxu0 %v4427_v25  ;;  %v4550_v25 = vld [vmem:[%s6372_s3 + $0x3c0] ss:$16 sps:$4 sm:$0xff]  }
  0xf5   :  { %1662 = vmatpush1.bf16.msra.mxu1 %v4550_v25  ;;  %v4596_v25 = vld [vmem:[%s6372_s3 + $0x6a8] ss:$16 sps:$4 sm:$0xff]  }
  0xf7   :  { %1090 = vmatpush1.bf16.msra.mxu0 %v4425_v26  ;;  %v4551_v26 = vld [vmem:[%s6372_s3 + $0x3e4] ss:$16 sps:$4 sm:$0xff]  }
  0xf8   :  { %1091 = vmatprep.subr.bf16.mxu0 %v4430_v27  ;;  %v4555_v27 = vld [vmem:[%s6372_s3 + $0x5ec] ss:$16 sps:$4 sm:$0xff]   ;;  %1663 = vmatprep.subr.bf16.mxu1 %v4551_v26 }
  0xf9   :  { %v4601_v26 = vld [vmem:[%s6372_s3 + $0x2cc] ss:$16 sps:$4 sm:$0xff]  }
  0xfb   :  { %1092 = vmatpush1.bf16.msra.mxu0 %v4428_v28  ;;  %v4553_v28 = vld [vmem:[%s6372_s3 + $0x5e8] ss:$16 sps:$4 sm:$0xff]  }
  0xfc   :  { %1093 = vmatprep.subr.bf16.mxu0 %v4433_v29  ;;  %v4556_v29 = vld [vmem:[%s6372_s3 + $0x3e0] ss:$16 sps:$4 sm:$0xff]  }
  0xfd   :  { %1664 = vmatpush1.bf16.msra.mxu1 %v4556_v29  ;;  %v4602_v29 = vld [vmem:[%s6372_s3 + $0x6c8] ss:$16 sps:$4 sm:$0xff]  }
  0xff   :  { %1094 = vmatpush1.bf16.msra.mxu0 %v4431_v30  ;;  %v4561_v30 = vld [vmem:[%s6372_s3 + $0x20c] ss:$16 sps:$4 sm:$0xff]  }
 0x100   :  { %1104 = vmatprep.subr.bf16.mxu0 %v4438_v31  ;;  %v4566_v31 = vld [vmem:[%s6372_s3 + $0x60c] ss:$16 sps:$4 sm:$0xff]   ;;  %1674 = vmatprep.subr.bf16.mxu1 %v4561_v30 }
 0x101   :  { %v4607_v30 = vld [vmem:[%s6372_s3 + $0x2ec] ss:$16 sps:$4 sm:$0xff]  }
 0x102   :  { %1096 = vmatmul.mubr.bf16.vlgmr.msra.gmra.mrb[0].mxu0 %v3532_v33 }
 0x103   :  { %1105 = vmatpush1.bf16.msra.mxu0 %v4436_v32  ;;  %1136 = vmatprep.mubr.bf16.mxu0 %v4893_v37  ;;  %v178_v32 = vlaneseq }
 0x104   :  { %1106 = vmatprep.subr.bf16.mxu0 %v4441_v34 }
 0x105   :  { %v5598_v33 = vshrl.u32 %v178_v32, 7  ;;  %v4605_v32 = vld [vmem:[%s6372_s3 + $0x2e8] ss:$16 sps:$4 sm:$0xff]  }
 0x107   :  { %1107 = vmatpush1.bf16.msra.mxu0 %v4439_v35  ;;  %v5601_v34 = vsub.s32 0, %v5598_v33  ;;  %v176_v35 = vld [vmem:[%s6373_s2] ss:$2 sm:$0x3] }
 0x108   :  { %1108 = vmatprep.subr.bf16.mxu0 %v4444_v36  ;;  %v5607_v36 = vsub.s32 1, %v5598_v33 }
 0x109   :  { %v181_v37 = vrot.slane %v176_v35, %v5601_v34 }
 0x10b   :  { %1109 = vmatpush1.bf16.msra.mxu0 %v4442_v38  ;;  %v185_v38 = vrot.slane %v176_v35, %v5607_v36  ;;  %v4608_v35 = vld [vmem:[%s6372_s3 + $0x6e8] ss:$16 sps:$4 sm:$0xff]  }
 0x10c   :  { %1110 = vmatprep.subr.bf16.mxu0 %v4447_v39 }
 0x10f   :  { %1111 = vmatpush1.bf16.msra.mxu0 %v4445_v40  ;;  %v3679_v40 = vld [vmem:[%s6373_s2 + $0x1] ss:$2 sm:$0x3] }
 0x110   :  { %1112 = vmatprep.subr.bf16.mxu0 %v4450_v41 }
 0x113   :  { %1113 = vmatpush1.bf16.msra.mxu0 %v4448_v42 }
 0x114   :  { %1114 = vmatprep.subr.bf16.mxu0 %v4453_v43 }
 0x117   :  { %1115 = vmatpush1.bf16.msra.mxu0 %v4451_v44 }
 0x118   :  { %1116 = vmatprep.subr.bf16.mxu0 %v4456_v45 }
 0x11b   :  { %1117 = vmatpush1.bf16.msra.mxu0 %v4454_v46  ;;  %v1155_v46 = vrot.slane %v3679_v40, %v5601_v34 }
 0x11c   :  { %1118 = vmatprep.subr.bf16.mxu0 %v4459_v47 }
 0x11f   :  { %1119 = vmatpush1.bf16.msra.mxu0 %v4457_v48 }
 0x120   :  { %2560 = vmatprep.subr.bf16.mxu0 %v4465_v49  ;;  %v1159_v49 = vrot.slane %v3679_v40, %v5607_v36  ;;  %v4614_v40 = vld [vmem:[%s6372_s3 + $0x708] ss:$16 sps:$4 sm:$0xff]  }
 0x122   :  { %1137 = vmatmul.mubr.bf16.vlgmr.msra.gmra.mrb[0].mxu0 %v4460_v50 }
 0x123   :  { %2561 = vmatpush1.bf16.msra.mxu0 %v4463_v51 }
 0x124   :  { %2562 = vmatprep.subr.bf16.mxu0 %v4471_v52 }
 0x127   :  { %2563 = vmatpush1.bf16.msra.mxu0 %v4469_v53 }
 0x128   :  { %2564 = vmatprep.subr.bf16.mxu0 %v4477_v54 }
 0x12b   :  { %2565 = vmatpush1.bf16.msra.mxu0 %v4475_v55 }
 0x12c   :  { %2566 = vmatprep.subr.bf16.mxu0 %v4483_v56 }
 0x12f   :  { %2567 = vmatpush1.bf16.msra.mxu0 %v4481_v57 }
 0x130   :  { %2568 = vmatprep.subr.bf16.mxu0 %v4489_v58 }
 0x133   :  { %2569 = vmatpush1.bf16.msra.mxu0 %v4487_v59 }
 0x134   :  { %2570 = vmatprep.subr.bf16.mxu0 %v4495_v60 }
 0x137   :  { %2571 = vmatpush1.bf16.msra.mxu0 %v4493_v61 }
 0x138   :  { %2572 = vmatprep.subr.bf16.mxu0 %v4501_v62  ;;  %v4559_v62 = vld [vmem:[%s6372_s3 + $0x208] ss:$16 sps:$4 sm:$0xff]  }
 0x13b   :  { %2573 = vmatpush1.bf16.msra.mxu0 %v4499_v63 }
 0x13c   :  { %2574 = vmatprep.subr.bf16.mxu0 %v4507_v0 }
 0x13f   :  { %2575 = vmatpush1.bf16.msra.mxu0 %v4505_v1 }
 0x140   :  { %2576 = vmatprep.subr.bf16.mxu0 %v4513_v2 }
 0x143   :  { %2577 = vmatpush1.bf16.msra.mxu0 %v4511_v3  ;;  %v4564_v3 = vld [vmem:[%s6372_s3 + $0x608] ss:$16 sps:$4 sm:$0xff]  }
 0x144   :  { %2578 = vmatprep.subr.bf16.mxu0 %v4519_v4 }
 0x147   :  { %2579 = vmatpush1.bf16.msra.mxu0 %v4517_v5  ;;  %v4571_v5 = vld [vmem:[%s6372_s3 + $0x22c] ss:$16 sps:$4 sm:$0xff]  }
 0x148   :  { %2580 = vmatprep.subr.bf16.mxu0 %v4525_v7 }
 0x14b   :  { %2581 = vmatpush1.bf16.msra.mxu0 %v4523_v8  ;;  %v4569_v8 = vld [vmem:[%s6372_s3 + $0x228] ss:$16 sps:$4 sm:$0xff]  }
 0x14c   :  { %2582 = vmatprep.subr.bf16.mxu0 %v4531_v11  ;;  %v4580_v11 = vld [vmem:[%s6372_s3 + $0x64c] ss:$16 sps:$4 sm:$0xff]  }
 0x14f   :  { %2583 = vmatpush1.bf16.msra.mxu0 %v4529_v12  ;;  %v4575_v12 = vld [vmem:[%s6372_s3 + $0x248] ss:$16 sps:$4 sm:$0xff]  }
 0x150   :  { %2584 = vmatprep.subr.bf16.mxu0 %v4537_v15  ;;  %v4586_v15 = vld [vmem:[%s6372_s3 + $0x66c] ss:$16 sps:$4 sm:$0xff]  }
 0x153   :  { %2585 = vmatpush1.bf16.msra.mxu0 %v4535_v16  ;;  %v4581_v16 = vld [vmem:[%s6372_s3 + $0x268] ss:$16 sps:$4 sm:$0xff]  }
 0x154   :  { %2586 = vmatprep.subr.bf16.mxu0 %v4543_v19  ;;  %v4592_v19 = vld [vmem:[%s6372_s3 + $0x68c] ss:$16 sps:$4 sm:$0xff]  }
 0x157   :  { %2587 = vmatpush1.bf16.msra.mxu0 %v4541_v20  ;;  %v4587_v20 = vld [vmem:[%s6372_s3 + $0x288] ss:$16 sps:$4 sm:$0xff]  }
 0x158   :  { %2588 = vmatprep.subr.bf16.mxu0 %v4549_v23  ;;  %v4598_v23 = vld [vmem:[%s6372_s3 + $0x6ac] ss:$16 sps:$4 sm:$0xff]  }
 0x15b   :  { %2589 = vmatpush1.bf16.msra.mxu0 %v4547_v24  ;;  %v4593_v24 = vld [vmem:[%s6372_s3 + $0x2a8] ss:$16 sps:$4 sm:$0xff]  }
 0x15c   :  { %2590 = vmatprep.subr.bf16.mxu0 %v4555_v27  ;;  %v4604_v27 = vld [vmem:[%s6372_s3 + $0x6cc] ss:$16 sps:$4 sm:$0xff]  }
 0x15f   :  { %2591 = vmatpush1.bf16.msra.mxu0 %v4553_v28  ;;  %v4599_v28 = vld [vmem:[%s6372_s3 + $0x2c8] ss:$16 sps:$4 sm:$0xff]  }
 0x160   :  { %3041 = vmatprep.subr.bf16.mxu0 %v4566_v31  ;;  %v4610_v31 = vld [vmem:[%s6372_s3 + $0x6ec] ss:$16 sps:$4 sm:$0xff]  }
 0x1f5   :  { %v1138_v39 = vpop.f32.mrb[0].mxu0 }
 0x1f6   :  { %v4216_v41 = vadd.f32 %v1138_v39, %v181_v37  ;;  %v1140_v42 = vpop.f32.mrb[1].mxu0  ;;  %v4613_v37 = vld [vmem:[%s6372_s3 + $0x30c] ss:$16 sps:$4 sm:$0xff]   ;;  %v4611_v39 = vld [vmem:[%s6372_s3 + $0x308] ss:$16 sps:$4 sm:$0xff]  }
 0x1f7   :  { %v4217_v43 = vadd.f32 %v1140_v42, %v185_v38  ;;  %v1142_v44 = vpop.f32.mrb[2].mxu0  ;;  %v4616_v38 = vld [vmem:[%s6372_s3 + $0x70c] ss:$16 sps:$4 sm:$0xff]  }
 0x1f8   :  { %v1145_v45 = vmul.f32 0.2, %v4216_v41  ;;  %v1143_v47 = vpop.f32.mrb[3].mxu0  ;;  %v4622_v42 = vld [vmem:[%s6372_s3 + $0x72c] ss:$16 sps:$4 sm:$0xff]  }
 0x1f9   :  { %v1146_v48 = vmul.f32 0.2, %v4217_v43  ;;  %v4620_v44 = vld [vmem:[%s6372_s3 + $0x728] ss:$16 sps:$4 sm:$0xff]  }
 0x1fa   :  { %v1147_v50 = vmax.f32 %v4216_v41, %v1145_v45  ;;  %v4619_v41 = vld [vmem:[%s6372_s3 + $0x32c] ss:$16 sps:$4 sm:$0xff]   ;;  %v4623_v47 = vld [vmem:[%s6372_s3 + $0x348] ss:$16 sps:$4 sm:$0xff]  }
 0x1fb   :  { %v1148_v51 = vmax.f32 %v4217_v43, %v1146_v48  ;;  %v4617_v43 = vld [vmem:[%s6372_s3 + $0x328] ss:$16 sps:$4 sm:$0xff]   ;;  %v4625_v45 = vld [vmem:[%s6372_s3 + $0x34c] ss:$16 sps:$4 sm:$0xff]  }
 0x1fc   :  { %v1162_v52 = vadd.f32 %v1155_v46, %v1147_v50  ;;  %v4628_v46 = vld [vmem:[%s6372_s3 + $0x74c] ss:$16 sps:$4 sm:$0xff]   ;;  %v4626_v48 = vld [vmem:[%s6372_s3 + $0x748] ss:$16 sps:$4 sm:$0xff]  }
 0x1fd   :  { %v1163_v53 = vadd.f32 %v1159_v49, %v1148_v51  ;;  %v4631_v49 = vld [vmem:[%s6372_s3 + $0x36c] ss:$16 sps:$4 sm:$0xff]   ;;  %v4629_v51 = vld [vmem:[%s6372_s3 + $0x368] ss:$16 sps:$4 sm:$0xff]  }
 0x1fe   :  { %v4634_v50 = vld [vmem:[%s6372_s3 + $0x76c] ss:$16 sps:$4 sm:$0xff]  }
 0x1ff   :  { %v4171_v54 = vpack.c.bf16 %v1163_v53, %v1162_v52  ;;  %v4632_v52 = vld [vmem:[%s6372_s3 + $0x768] ss:$16 sps:$4 sm:$0xff]   ;;  %v4637_v53 = vld [vmem:[%s6372_s3 + $0x38c] ss:$16 sps:$4 sm:$0xff]  }
 0x201   :  { %1172 = vst [vmem:[#allocation2] sm:$0xff] %v4171_v54  ;;  %v4640_v54 = vld [vmem:[%s6372_s3 + $0x78c] ss:$16 sps:$4 sm:$0xff]  }
 0x208   :  { %v1238_v55 = vld [vmem:[#allocation2] sm:$0x22]  ;;  %v2124_v56 = vld [vmem:[#allocation2] sm:$0x44]  ;;  %v5616_v57 = vld [vmem:[#allocation2] sm:$0x88] }
 0x209   :  { %v3745_v58 = vcombine.low %v1238_v55, %v1238_v55  ;;  %v3746_v59 = vcombine.high %v1238_v55, %v1238_v55  ;;  %v3941_v60 = vcombine.low %v2124_v56, %v2124_v56  ;;  %v3942_v61 = vcombine.high %v2124_v56, %v2124_v56  ;;  %v4635_v55 = vld [vmem:[%s6372_s3 + $0x388] ss:$16 sps:$4 sm:$0xff]  }
 0x20a   :  { %v4072_v63 = vcombine.high %v5616_v57, %v5616_v57  ;;  %v4638_v56 = vld [vmem:[%s6372_s3 + $0x788] ss:$16 sps:$4 sm:$0xff]  }
 0x20b   :  { %v1310_v0 = vrot.slane %v3746_v59, 1  ;;  %v5623_v1 = vrot.slane %v3941_v60, 2  ;;  %v5625_v2 = vrot.slane %v3942_v61, 2  ;;  %v5630_v4 = vrot.slane %v3745_v58, 1  ;;  %v4643_v58 = vld [vmem:[%s6372_s3 + $0x3ac] ss:$16 sps:$4 sm:$0xff]  }
 0x20c   :  { %v5641_v7 = vrot.slane %v4072_v63, 3  ;;  %v4646_v59 = vld [vmem:[%s6372_s3 + $0x7ac] ss:$16 sps:$4 sm:$0xff]   ;;  %v4641_v60 = vld [vmem:[%s6372_s3 + $0x3a8] ss:$16 sps:$4 sm:$0xff]  }
 0x20d   :  { %1665 = vmatprep.mubr.bf16.mxu1 %v1310_v0  ;;  %2592 = vmatprep.mubr.bf16.mxu0 %v5625_v2  ;;  %v4644_v61 = vld [vmem:[%s6372_s3 + $0x7a8] ss:$16 sps:$4 sm:$0xff]   ;;  %v4652_v63 = vld [vmem:[%s6372_s3 + $0x7cc] ss:$16 sps:$4 sm:$0xff]  }
 0x20e   :  { %1666 = vmatmul.mubr.bf16.vlgmr.msra.gmra.mrb[0].mxu1 %v5630_v4  ;;  %2593 = vmatmul.mubr.bf16.vlgmr.msra.gmra.mrb[4].mxu0 %v5623_v1 }
 0x20f   :  { %1675 = vmatpush1.bf16.msra.mxu1 %v4559_v62  ;;  %3042 = vmatpush1.bf16.msra.mxu0 %v4564_v3  ;;  %v4649_v62 = vld [vmem:[%s6372_s3 + $0x3cc] ss:$16 sps:$4 sm:$0xff]   ;;  %v4650_v3 = vld [vmem:[%s6372_s3 + $0x7c8] ss:$16 sps:$4 sm:$0xff]  }
 0x210   :  { %1706 = vmatprep.mubr.bf16.mxu1 %v1310_v0  ;;  %3073 = vmatprep.mubr.bf16.mxu0 %v5641_v7  ;;  %v4647_v0 = vld [vmem:[%s6372_s3 + $0x3c8] ss:$16 sps:$4 sm:$0xff]  }
 0x211   :  { %1676 = vmatprep.subr.bf16.mxu1 %v4571_v5  ;;  %3043 = vmatprep.subr.bf16.mxu0 %v4574_v6  ;;  %v4655_v5 = vld [vmem:[%s6372_s3 + $0x3ec] ss:$16 sps:$4 sm:$0xff]  }
 0x212   :  { %v4658_v6 = vld [vmem:[%s6372_s3 + $0x7ec] ss:$16 sps:$4 sm:$0xff]  }
 0x213   :  { %1677 = vmatpush1.bf16.msra.mxu1 %v4569_v8  ;;  %3044 = vmatpush1.bf16.msra.mxu0 %v4572_v9  ;;  %v4653_v8 = vld [vmem:[%s6372_s3 + $0x3e8] ss:$16 sps:$4 sm:$0xff]  }
 0x214   :  { %1678 = vmatprep.subr.bf16.mxu1 %v4577_v10  ;;  %3045 = vmatprep.subr.bf16.mxu0 %v4580_v11  ;;  %v4656_v9 = vld [vmem:[%s6372_s3 + $0x7e8] ss:$16 sps:$4 sm:$0xff]   ;;  %v4071_v10 = vcombine.low %v5616_v57, %v5616_v57  ;;  %v4661_v11 = vld [vmem:[%s6372_s3 + $0x4] ss:$16 sps:$4 sm:$0xff]  }
 0x215   :  { %v4666_v57 = vld [vmem:[%s6372_s3 + $0x24] ss:$16 sps:$4 sm:$0xff]  }
 0x217   :  { %1679 = vmatpush1.bf16.msra.mxu1 %v4575_v12  ;;  %3046 = vmatpush1.bf16.msra.mxu0 %v4578_v13  ;;  %v5823_v12 = vld [vmem:[#allocation2] sm:$0x11] }
 0x218   :  { %1680 = vmatprep.subr.bf16.mxu1 %v4583_v14  ;;  %3047 = vmatprep.subr.bf16.mxu0 %v4586_v15  ;;  %v4659_v13 = vld [vmem:[%s6372_s3] ss:$16 sps:$4 sm:$0xff]   ;;  %v5828_v14 = vrot.slane %v4071_v10, 3  ;;  %v5835_v15 = vcombine.high %v5823_v12, %v5823_v12  ;;  %v4739_v10 = vld [vmem:[%s6372_s3 + $0x148] ss:$16 sps:$4 sm:$0xff]  }
 0x21b   :  { %1681 = vmatpush1.bf16.msra.mxu1 %v4581_v16  ;;  %3048 = vmatpush1.bf16.msra.mxu0 %v4584_v17  ;;  %v4664_v16 = vld [vmem:[%s6372_s3 + $0x20] ss:$16 sps:$4 sm:$0xff]   ;;  %v4669_v17 = vld [vmem:[%s6372_s3 + $0x44] ss:$16 sps:$4 sm:$0xff]  }
 0x21c   :  { %1682 = vmatprep.subr.bf16.mxu1 %v4589_v18  ;;  %3049 = vmatprep.subr.bf16.mxu0 %v4592_v19  ;;  %v4667_v18 = vld [vmem:[%s6372_s3 + $0x40] ss:$16 sps:$4 sm:$0xff]  }
 0x21d   :  { %v4670_v19 = vld [vmem:[%s6372_s3 + $0x60] ss:$16 sps:$4 sm:$0xff]  }
 0x21f   :  { %1683 = vmatpush1.bf16.msra.mxu1 %v4587_v20  ;;  %3050 = vmatpush1.bf16.msra.mxu0 %v4590_v21  ;;  %v4675_v20 = vld [vmem:[%s6372_s3 + $0x84] ss:$16 sps:$4 sm:$0xff]   ;;  %v4673_v21 = vld [vmem:[%s6372_s3 + $0x80] ss:$16 sps:$4 sm:$0xff]  }
 0x220   :  { %1684 = vmatprep.subr.bf16.mxu1 %v4595_v22  ;;  %3051 = vmatprep.subr.bf16.mxu0 %v4598_v23  ;;  %v4678_v22 = vld [vmem:[%s6372_s3 + $0xa4] ss:$16 sps:$4 sm:$0xff]   ;;  %v4676_v23 = vld [vmem:[%s6372_s3 + $0xa0] ss:$16 sps:$4 sm:$0xff]  }
 0x223   :  { %1685 = vmatpush1.bf16.msra.mxu1 %v4593_v24  ;;  %3052 = vmatpush1.bf16.msra.mxu0 %v4596_v25  ;;  %v4681_v24 = vld [vmem:[%s6372_s3 + $0xc4] ss:$16 sps:$4 sm:$0xff]   ;;  %v4679_v25 = vld [vmem:[%s6372_s3 + $0xc0] ss:$16 sps:$4 sm:$0xff]  }
 0x224   :  { %1686 = vmatprep.subr.bf16.mxu1 %v4601_v26  ;;  %3053 = vmatprep.subr.bf16.mxu0 %v4604_v27  ;;  %v4684_v26 = vld [vmem:[%s6372_s3 + $0xe4] ss:$16 sps:$4 sm:$0xff]   ;;  %v4682_v27 = vld [vmem:[%s6372_s3 + $0xe0] ss:$16 sps:$4 sm:$0xff]  }
 0x227   :  { %1687 = vmatpush1.bf16.msra.mxu1 %v4599_v28  ;;  %3054 = vmatpush1.bf16.msra.mxu0 %v4602_v29  ;;  %v4687_v28 = vld [vmem:[%s6372_s3 + $0x104] ss:$16 sps:$4 sm:$0xff]   ;;  %v4685_v29 = vld [vmem:[%s6372_s3 + $0x100] ss:$16 sps:$4 sm:$0xff]  }
 0x228   :  { %1688 = vmatprep.subr.bf16.mxu1 %v4607_v30  ;;  %3055 = vmatprep.subr.bf16.mxu0 %v4610_v31  ;;  %v4690_v30 = vld [vmem:[%s6372_s3 + $0x124] ss:$16 sps:$4 sm:$0xff]   ;;  %v4688_v31 = vld [vmem:[%s6372_s3 + $0x120] ss:$16 sps:$4 sm:$0xff]  }
 0x22b   :  { %1689 = vmatpush1.bf16.msra.mxu1 %v4605_v32  ;;  %3056 = vmatpush1.bf16.msra.mxu0 %v4608_v35  ;;  %v4693_v32 = vld [vmem:[%s6372_s3 + $0x144] ss:$16 sps:$4 sm:$0xff]   ;;  %v4691_v35 = vld [vmem:[%s6372_s3 + $0x140] ss:$16 sps:$4 sm:$0xff]  }
 0x22c   :  { %1690 = vmatprep.subr.bf16.mxu1 %v4613_v37  ;;  %3057 = vmatprep.subr.bf16.mxu0 %v4616_v38  ;;  %v4696_v37 = vld [vmem:[%s6372_s3 + $0x164] ss:$16 sps:$4 sm:$0xff]   ;;  %v4694_v38 = vld [vmem:[%s6372_s3 + $0x160] ss:$16 sps:$4 sm:$0xff]  }
 0x22f   :  { %1691 = vmatpush1.bf16.msra.mxu1 %v4611_v39  ;;  %3058 = vmatpush1.bf16.msra.mxu0 %v4614_v40  ;;  %v4699_v39 = vld [vmem:[%s6372_s3 + $0x184] ss:$16 sps:$4 sm:$0xff]   ;;  %v4697_v40 = vld [vmem:[%s6372_s3 + $0x180] ss:$16 sps:$4 sm:$0xff]  }
 0x230   :  { %1692 = vmatprep.subr.bf16.mxu1 %v4619_v41  ;;  %3059 = vmatprep.subr.bf16.mxu0 %v4622_v42  ;;  %v4702_v41 = vld [vmem:[%s6372_s3 + $0x1a4] ss:$16 sps:$4 sm:$0xff]   ;;  %v4700_v42 = vld [vmem:[%s6372_s3 + $0x1a0] ss:$16 sps:$4 sm:$0xff]  }
 0x233   :  { %1693 = vmatpush1.bf16.msra.mxu1 %v4617_v43  ;;  %3060 = vmatpush1.bf16.msra.mxu0 %v4620_v44  ;;  %v4705_v43 = vld [vmem:[%s6372_s3 + $0x1c4] ss:$16 sps:$4 sm:$0xff]   ;;  %v4703_v44 = vld [vmem:[%s6372_s3 + $0x1c0] ss:$16 sps:$4 sm:$0xff]  }
 0x234   :  { %1694 = vmatprep.subr.bf16.mxu1 %v4625_v45  ;;  %3061 = vmatprep.subr.bf16.mxu0 %v4628_v46  ;;  %v4708_v45 = vld [vmem:[%s6372_s3 + $0x1e4] ss:$16 sps:$4 sm:$0xff]   ;;  %v4706_v46 = vld [vmem:[%s6372_s3 + $0x1e0] ss:$16 sps:$4 sm:$0xff]  }
 0x237   :  { %1695 = vmatpush1.bf16.msra.mxu1 %v4623_v47  ;;  %3062 = vmatpush1.bf16.msra.mxu0 %v4626_v48  ;;  %v4711_v47 = vld [vmem:[%s6372_s3 + $0xc] ss:$16 sps:$4 sm:$0xff]   ;;  %v4709_v48 = vld [vmem:[%s6372_s3 + $0x8] ss:$16 sps:$4 sm:$0xff]  }
 0x238   :  { %1696 = vmatprep.subr.bf16.mxu1 %v4631_v49  ;;  %3063 = vmatprep.subr.bf16.mxu0 %v4634_v50  ;;  %v5935_v49 = vcombine.low %v5823_v12, %v5823_v12  ;;  %v4714_v50 = vld [vmem:[%s6372_s3 + $0x2c] ss:$16 sps:$4 sm:$0xff]   ;;  %v4742_v12 = vld [vmem:[%s6372_s3 + $0x168] ss:$16 sps:$4 sm:$0xff]  }
 0x23b   :  { %1697 = vmatpush1.bf16.msra.mxu1 %v4629_v51  ;;  %3064 = vmatpush1.bf16.msra.mxu0 %v4632_v52  ;;  %v4712_v51 = vld [vmem:[%s6372_s3 + $0x28] ss:$16 sps:$4 sm:$0xff]   ;;  %v4717_v52 = vld [vmem:[%s6372_s3 + $0x4c] ss:$16 sps:$4 sm:$0xff]  }
 0x23c   :  { %1698 = vmatprep.subr.bf16.mxu1 %v4637_v53  ;;  %3065 = vmatprep.subr.bf16.mxu0 %v4640_v54  ;;  %v4715_v53 = vld [vmem:[%s6372_s3 + $0x48] ss:$16 sps:$4 sm:$0xff]   ;;  %v4720_v54 = vld [vmem:[%s6372_s3 + $0x6c] ss:$16 sps:$4 sm:$0xff]  }
 0x23f   :  { %1699 = vmatpush1.bf16.msra.mxu1 %v4635_v55  ;;  %3066 = vmatpush1.bf16.msra.mxu0 %v4638_v56  ;;  %v4718_v55 = vld [vmem:[%s6372_s3 + $0x68] ss:$16 sps:$4 sm:$0xff]   ;;  %v4723_v56 = vld [vmem:[%s6372_s3 + $0x8c] ss:$16 sps:$4 sm:$0xff]  }
 0x240   :  { %1700 = vmatprep.subr.bf16.mxu1 %v4643_v58  ;;  %3067 = vmatprep.subr.bf16.mxu0 %v4646_v59  ;;  %v4721_v58 = vld [vmem:[%s6372_s3 + $0x88] ss:$16 sps:$4 sm:$0xff]   ;;  %v4726_v59 = vld [vmem:[%s6372_s3 + $0xac] ss:$16 sps:$4 sm:$0xff]  }
 0x243   :  { %1701 = vmatpush1.bf16.msra.mxu1 %v4641_v60  ;;  %3068 = vmatpush1.bf16.msra.mxu0 %v4644_v61  ;;  %v4724_v60 = vld [vmem:[%s6372_s3 + $0xa8] ss:$16 sps:$4 sm:$0xff]   ;;  %v4729_v61 = vld [vmem:[%s6372_s3 + $0xcc] ss:$16 sps:$4 sm:$0xff]  }
 0x244   :  { %1702 = vmatprep.subr.bf16.mxu1 %v4649_v62  ;;  %3069 = vmatprep.subr.bf16.mxu0 %v4652_v63  ;;  %v4727_v62 = vld [vmem:[%s6372_s3 + $0xc8] ss:$16 sps:$4 sm:$0xff]   ;;  %v4732_v63 = vld [vmem:[%s6372_s3 + $0xec] ss:$16 sps:$4 sm:$0xff]  }
 0x247   :  { %1703 = vmatpush1.bf16.msra.mxu1 %v4647_v0  ;;  %3070 = vmatpush1.bf16.msra.mxu0 %v4650_v3  ;;  %v4730_v0 = vld [vmem:[%s6372_s3 + $0xe8] ss:$16 sps:$4 sm:$0xff]   ;;  %v4735_v3 = vld [vmem:[%s6372_s3 + $0x10c] ss:$16 sps:$4 sm:$0xff]  }
 0x248   :  { %1704 = vmatprep.subr.bf16.mxu1 %v4655_v5  ;;  %3071 = vmatprep.subr.bf16.mxu0 %v4658_v6  ;;  %v4733_v5 = vld [vmem:[%s6372_s3 + $0x108] ss:$16 sps:$4 sm:$0xff]   ;;  %v4738_v6 = vld [vmem:[%s6372_s3 + $0x12c] ss:$16 sps:$4 sm:$0xff]  }
 0x24b   :  { %1705 = vmatpush1.bf16.msra.mxu1 %v4653_v8  ;;  %3072 = vmatpush1.bf16.msra.mxu0 %v4656_v9  ;;  %v4736_v8 = vld [vmem:[%s6372_s3 + $0x128] ss:$16 sps:$4 sm:$0xff]   ;;  %v4741_v9 = vld [vmem:[%s6372_s3 + $0x14c] ss:$16 sps:$4 sm:$0xff]  }
 0x24c   :  { %2042 = vmatprep.subr.bf16.mxu1 %v4661_v11  ;;  %v4744_v11 = vld [vmem:[%s6372_s3 + $0x16c] ss:$16 sps:$4 sm:$0xff]  }
 0x24e   :  { %1707 = vmatmul.mubr.bf16.vlgmr.msra.gmra.mrb[4].mxu1 %v5630_v4  ;;  %3074 = vmatmul.mubr.bf16.vlgmr.msra.gmra.mrb[8].mxu0 %v5828_v14  ;;  %v4672_v4 = vld [vmem:[%s6372_s3 + $0x64] ss:$16 sps:$4 sm:$0xff]  }
 0x24f   :  { %2043 = vmatpush1.bf16.msra.mxu1 %v4659_v13  ;;  %2074 = vmatprep.mubr.bf16.mxu1 %v5835_v15  ;;  %v4747_v13 = vld [vmem:[%s6372_s3 + $0x18c] ss:$16 sps:$4 sm:$0xff]  }
 0x250   :  { %2044 = vmatprep.subr.bf16.mxu1 %v4666_v57  ;;  %v4745_v57 = vld [vmem:[%s6372_s3 + $0x188] ss:$16 sps:$4 sm:$0xff]  }
 0x253   :  { %2045 = vmatpush1.bf16.msra.mxu1 %v4664_v16  ;;  %v4748_v16 = vld [vmem:[%s6372_s3 + $0x1a8] ss:$16 sps:$4 sm:$0xff]  }
 0x254   :  { %2046 = vmatprep.subr.bf16.mxu1 %v4669_v17  ;;  %v4753_v17 = vld [vmem:[%s6372_s3 + $0x1cc] ss:$16 sps:$4 sm:$0xff]  }
 0x257   :  { %2047 = vmatpush1.bf16.msra.mxu1 %v4667_v18  ;;  %v4751_v18 = vld [vmem:[%s6372_s3 + $0x1c8] ss:$16 sps:$4 sm:$0xff]  }
 0x258   :  { %2048 = vmatprep.subr.bf16.mxu1 %v4672_v4  ;;  %v4756_v4 = vld [vmem:[%s6372_s3 + $0x1ec] ss:$16 sps:$4 sm:$0xff]  }
 0x25b   :  { %2049 = vmatpush1.bf16.msra.mxu1 %v4670_v19  ;;  %v4754_v19 = vld [vmem:[%s6372_s3 + $0x1e8] ss:$16 sps:$4 sm:$0xff]  }
 0x25c   :  { %2050 = vmatprep.subr.bf16.mxu1 %v4675_v20  ;;  %v4759_v20 = vld [vmem:[%s6372_s3 + $0x404] ss:$16 sps:$4 sm:$0xff]  }
 0x25f   :  { %2051 = vmatpush1.bf16.msra.mxu1 %v4673_v21  ;;  %v4757_v21 = vld [vmem:[%s6372_s3 + $0x400] ss:$16 sps:$4 sm:$0xff]  }
 0x260   :  { %2052 = vmatprep.subr.bf16.mxu1 %v4678_v22  ;;  %v4762_v22 = vld [vmem:[%s6372_s3 + $0x424] ss:$16 sps:$4 sm:$0xff]  }
 0x263   :  { %2053 = vmatpush1.bf16.msra.mxu1 %v4676_v23  ;;  %v4760_v23 = vld [vmem:[%s6372_s3 + $0x420] ss:$16 sps:$4 sm:$0xff]  }
 0x264   :  { %2054 = vmatprep.subr.bf16.mxu1 %v4681_v24  ;;  %v4765_v24 = vld [vmem:[%s6372_s3 + $0x444] ss:$16 sps:$4 sm:$0xff]  }
 0x267   :  { %2055 = vmatpush1.bf16.msra.mxu1 %v4679_v25  ;;  %v4763_v25 = vld [vmem:[%s6372_s3 + $0x440] ss:$16 sps:$4 sm:$0xff]  }
 0x268   :  { %2056 = vmatprep.subr.bf16.mxu1 %v4684_v26  ;;  %v4768_v26 = vld [vmem:[%s6372_s3 + $0x464] ss:$16 sps:$4 sm:$0xff]  }
 0x26b   :  { %2057 = vmatpush1.bf16.msra.mxu1 %v4682_v27  ;;  %v4771_v27 = vld [vmem:[%s6372_s3 + $0x484] ss:$16 sps:$4 sm:$0xff]  }
 0x26c   :  { %2058 = vmatprep.subr.bf16.mxu1 %v4687_v28  ;;  %v4769_v28 = vld [vmem:[%s6372_s3 + $0x480] ss:$16 sps:$4 sm:$0xff]  }
 0x26f   :  { %2059 = vmatpush1.bf16.msra.mxu1 %v4685_v29  ;;  %v4774_v29 = vld [vmem:[%s6372_s3 + $0x4a4] ss:$16 sps:$4 sm:$0xff]  }
 0x270   :  { %2060 = vmatprep.subr.bf16.mxu1 %v4690_v30  ;;  %v4772_v30 = vld [vmem:[%s6372_s3 + $0x4a0] ss:$16 sps:$4 sm:$0xff]  }
 0x273   :  { %2061 = vmatpush1.bf16.msra.mxu1 %v4688_v31  ;;  %v4777_v31 = vld [vmem:[%s6372_s3 + $0x4c4] ss:$16 sps:$4 sm:$0xff]  }
 0x274   :  { %2062 = vmatprep.subr.bf16.mxu1 %v4693_v32 }
 0x277   :  { %2063 = vmatpush1.bf16.msra.mxu1 %v4691_v35 }
 0x278   :  { %2064 = vmatprep.subr.bf16.mxu1 %v4696_v37 }
 0x27b   :  { %2065 = vmatpush1.bf16.msra.mxu1 %v4694_v38 }
 0x27c   :  { %2066 = vmatprep.subr.bf16.mxu1 %v4699_v39 }
 0x27f   :  { %2067 = vmatpush1.bf16.msra.mxu1 %v4697_v40 }
 0x280   :  { %2068 = vmatprep.subr.bf16.mxu1 %v4702_v41  ;;  %v4775_v41 = vld [vmem:[%s6372_s3 + $0x4c0] ss:$16 sps:$4 sm:$0xff]  }
 0x283   :  { %2069 = vmatpush1.bf16.msra.mxu1 %v4700_v42 }
 0x284   :  { %2070 = vmatprep.subr.bf16.mxu1 %v4705_v43 }
 0x287   :  { %2071 = vmatpush1.bf16.msra.mxu1 %v4703_v44  ;;  %v4780_v44 = vld [vmem:[%s6372_s3 + $0x4e4] ss:$16 sps:$4 sm:$0xff]  }
 0x288   :  { %2072 = vmatprep.subr.bf16.mxu1 %v4708_v45  ;;  %v4778_v45 = vld [vmem:[%s6372_s3 + $0x4e0] ss:$16 sps:$4 sm:$0xff]  }
 0x28b   :  { %2073 = vmatpush1.bf16.msra.mxu1 %v4706_v46  ;;  %v4853_v46 = vld [vmem:[%s6374_s5 + $0xc0] sm:$0xff]  }
 0x28c   :  { %2083 = vmatprep.subr.bf16.mxu1 %v4711_v47  ;;  %v4783_v47 = vld [vmem:[%s6372_s3 + $0x504] ss:$16 sps:$4 sm:$0xff]   ;;  %4194 = vmatprep.subr.bf16.mxu0 %v4853_v46 }
 0x28d   :  { %v4834_v46 = vld [vmem:[%s6372_s3 + $0x724] ss:$16 sps:$4 sm:$0xff]  }
 0x28e   :  { %2075 = vmatmul.mubr.bf16.vlgmr.msra.gmra.mrb[8].mxu1 %v5935_v49 }
 0x28f   :  { %2084 = vmatpush1.bf16.msra.mxu1 %v4709_v48  ;;  %2115 = vmatprep.mubr.bf16.mxu1 %v5835_v15  ;;  %v4750_v15 = vld [vmem:[%s6372_s3 + $0x1ac] ss:$16 sps:$4 sm:$0xff]   ;;  %v4854_v48 = vld [vmem:[%s6374_s5 + $0x80] sm:$0xff]  }
 0x290   :  { %2085 = vmatprep.subr.bf16.mxu1 %v4714_v50  ;;  %4195 = vmatpush3.bf16.msra.mxu0 %v4854_v48  ;;  %v4856_v50 = vld [vmem:[%s6374_s5 + $0x88] sm:$0xff]   ;;  %v4868_v48 = vld [vmem:[%s6374_s5 + $0xb8] sm:$0xff]  }
 0x293   :  { %2086 = vmatpush1.bf16.msra.mxu1 %v4712_v51  ;;  %v4781_v51 = vld [vmem:[%s6372_s3 + $0x500] ss:$16 sps:$4 sm:$0xff]  }
 0x294   :  { %2087 = vmatprep.subr.bf16.mxu1 %v4717_v52  ;;  %v4857_v52 = vld [vmem:[%s6374_s5 + $0xd0] sm:$0xff]  }
 0x297   :  { %2088 = vmatpush1.bf16.msra.mxu1 %v4715_v53  ;;  %v4786_v53 = vld [vmem:[%s6372_s3 + $0x524] ss:$16 sps:$4 sm:$0xff]  }
 0x298   :  { %2089 = vmatprep.subr.bf16.mxu1 %v4720_v54  ;;  %v4858_v54 = vld [vmem:[%s6374_s5 + $0x90] sm:$0xff]  }
 0x29b   :  { %2090 = vmatpush1.bf16.msra.mxu1 %v4718_v55  ;;  %v4859_v55 = vld [vmem:[%s6374_s5 + $0xd8] sm:$0xff]  }
 0x29c   :  { %2091 = vmatprep.subr.bf16.mxu1 %v4723_v56  ;;  %v4784_v56 = vld [vmem:[%s6372_s3 + $0x520] ss:$16 sps:$4 sm:$0xff]  }
 0x29f   :  { %2092 = vmatpush1.bf16.msra.mxu1 %v4721_v58  ;;  %v4789_v58 = vld [vmem:[%s6372_s3 + $0x544] ss:$16 sps:$4 sm:$0xff]  }
 0x2a0   :  { %2093 = vmatprep.subr.bf16.mxu1 %v4726_v59  ;;  %v4787_v59 = vld [vmem:[%s6372_s3 + $0x540] ss:$16 sps:$4 sm:$0xff]  }
 0x2a3   :  { %2094 = vmatpush1.bf16.msra.mxu1 %v4724_v60  ;;  %v4792_v60 = vld [vmem:[%s6372_s3 + $0x564] ss:$16 sps:$4 sm:$0xff]  }
 0x2a4   :  { %2095 = vmatprep.subr.bf16.mxu1 %v4729_v61  ;;  %v4790_v61 = vld [vmem:[%s6372_s3 + $0x560] ss:$16 sps:$4 sm:$0xff]  }
 0x2a7   :  { %2096 = vmatpush1.bf16.msra.mxu1 %v4727_v62  ;;  %v4795_v62 = vld [vmem:[%s6372_s3 + $0x584] ss:$16 sps:$4 sm:$0xff]  }
 0x2a8   :  { %2097 = vmatprep.subr.bf16.mxu1 %v4732_v63  ;;  %v4793_v63 = vld [vmem:[%s6372_s3 + $0x580] ss:$16 sps:$4 sm:$0xff]  }
 0x2ab   :  { %2098 = vmatpush1.bf16.msra.mxu1 %v4730_v0  ;;  %v4798_v0 = vld [vmem:[%s6372_s3 + $0x5a4] ss:$16 sps:$4 sm:$0xff]  }
 0x2ac   :  { %2099 = vmatprep.subr.bf16.mxu1 %v4735_v3  ;;  %v4796_v3 = vld [vmem:[%s6372_s3 + $0x5a0] ss:$16 sps:$4 sm:$0xff]  }
 0x2af   :  { %2100 = vmatpush1.bf16.msra.mxu1 %v4733_v5  ;;  %v4801_v5 = vld [vmem:[%s6372_s3 + $0x5c4] ss:$16 sps:$4 sm:$0xff]  }
 0x2b0   :  { %2101 = vmatprep.subr.bf16.mxu1 %v4738_v6  ;;  %v4799_v6 = vld [vmem:[%s6372_s3 + $0x5c0] ss:$16 sps:$4 sm:$0xff]  }
 0x2b3   :  { %2102 = vmatpush1.bf16.msra.mxu1 %v4736_v8  ;;  %v4804_v8 = vld [vmem:[%s6372_s3 + $0x5e4] ss:$16 sps:$4 sm:$0xff]  }
 0x2b4   :  { %2103 = vmatprep.subr.bf16.mxu1 %v4741_v9  ;;  %v4802_v9 = vld [vmem:[%s6372_s3 + $0x5e0] ss:$16 sps:$4 sm:$0xff]  }
 0x2b7   :  { %2104 = vmatpush1.bf16.msra.mxu1 %v4739_v10  ;;  %v4807_v10 = vld [vmem:[%s6372_s3 + $0x604] ss:$16 sps:$4 sm:$0xff]  }
 0x2b8   :  { %2105 = vmatprep.subr.bf16.mxu1 %v4744_v11  ;;  %v4805_v11 = vld [vmem:[%s6372_s3 + $0x600] ss:$16 sps:$4 sm:$0xff]  }
 0x2bb   :  { %2106 = vmatpush1.bf16.msra.mxu1 %v4742_v12  ;;  %v4810_v12 = vld [vmem:[%s6372_s3 + $0x624] ss:$16 sps:$4 sm:$0xff]  }
 0x2bc   :  { %2107 = vmatprep.subr.bf16.mxu1 %v4747_v13  ;;  %v4808_v13 = vld [vmem:[%s6372_s3 + $0x620] ss:$16 sps:$4 sm:$0xff]  }
 0x2bf   :  { %2108 = vmatpush1.bf16.msra.mxu1 %v4745_v57  ;;  %v4813_v57 = vld [vmem:[%s6372_s3 + $0x644] ss:$16 sps:$4 sm:$0xff]  }
 0x2c0   :  { %2109 = vmatprep.subr.bf16.mxu1 %v4750_v15  ;;  %v4811_v15 = vld [vmem:[%s6372_s3 + $0x640] ss:$16 sps:$4 sm:$0xff]  }
 0x2c3   :  { %2110 = vmatpush1.bf16.msra.mxu1 %v4748_v16  ;;  %v4819_v16 = vld [vmem:[%s6372_s3 + $0x684] ss:$16 sps:$4 sm:$0xff]  }
 0x2c4   :  { %2111 = vmatprep.subr.bf16.mxu1 %v4753_v17  ;;  %v4817_v17 = vld [vmem:[%s6372_s3 + $0x680] ss:$16 sps:$4 sm:$0xff]  }
 0x2c7   :  { %2112 = vmatpush1.bf16.msra.mxu1 %v4751_v18  ;;  %v4822_v18 = vld [vmem:[%s6372_s3 + $0x6a4] ss:$16 sps:$4 sm:$0xff]  }
 0x2c8   :  { %2113 = vmatprep.subr.bf16.mxu1 %v4756_v4  ;;  %v4820_v4 = vld [vmem:[%s6372_s3 + $0x6a0] ss:$16 sps:$4 sm:$0xff]  }
 0x2cb   :  { %2114 = vmatpush1.bf16.msra.mxu1 %v4754_v19  ;;  %v4860_v19 = vld [vmem:[%s6374_s5 + $0x98] sm:$0xff]  }
 0x2cc   :  { %2519 = vmatprep.subr.bf16.mxu1 %v4759_v20  ;;  %v4825_v20 = vld [vmem:[%s6372_s3 + $0x6c4] ss:$16 sps:$4 sm:$0xff]  }
 0x2ce   :  { %2116 = vmatmul.mubr.bf16.vlgmr.msra.gmra.mrb[12].mxu1 %v5935_v49  ;;  %v4855_v49 = vld [vmem:[%s6374_s5 + $0xc8] sm:$0xff]  }
 0x2cf   :  { %2520 = vmatpush1.bf16.msra.mxu1 %v4757_v21  ;;  %2551 = vmatprep.mubr.bf16.mxu1 %v5625_v2  ;;  %v4766_v2 = vld [vmem:[%s6372_s3 + $0x460] ss:$16 sps:$4 sm:$0xff]  }
 0x2d0   :  { %2521 = vmatprep.subr.bf16.mxu1 %v4762_v22  ;;  %4196 = vmatprep.subr.bf16.mxu0 %v4855_v49  ;;  %v4832_v49 = vld [vmem:[%s6372_s3 + $0x720] ss:$16 sps:$4 sm:$0xff]  }
 0x2d1   :  { %4197 = vmatpush3.bf16.msra.mxu0 %v4856_v50  ;;  %v4837_v50 = vld [vmem:[%s6372_s3 + $0x744] ss:$16 sps:$4 sm:$0xff]  }
 0x2d2   :  { %4198 = vmatprep.subr.bf16.mxu0 %v4857_v52  ;;  %v4840_v52 = vld [vmem:[%s6372_s3 + $0x764] ss:$16 sps:$4 sm:$0xff]  }
 0x2d3   :  { %2522 = vmatpush1.bf16.msra.mxu1 %v4760_v23 }
 0x2d4   :  { %2523 = vmatprep.subr.bf16.mxu1 %v4765_v24 }
 0x2d5   :  { %4199 = vmatpush3.bf16.msra.mxu0 %v4858_v54  ;;  %v4843_v54 = vld [vmem:[%s6372_s3 + $0x784] ss:$16 sps:$4 sm:$0xff]  }
 0x2d6   :  { %4200 = vmatprep.subr.bf16.mxu0 %v4859_v55  ;;  %v4841_v55 = vld [vmem:[%s6372_s3 + $0x780] ss:$16 sps:$4 sm:$0xff]  }
 0x2d7   :  { %2524 = vmatpush1.bf16.msra.mxu1 %v4763_v25  ;;  %v4861_v25 = vld [vmem:[%s6374_s5 + $0xe0] sm:$0xff]  }
 0x2d8   :  { %2525 = vmatprep.subr.bf16.mxu1 %v4768_v26 }
 0x2d9   :  { %4201 = vmatpush3.bf16.msra.mxu0 %v4860_v19  ;;  %v4879_v19 = vld [vmem:[%s6374_s5 + $0x68] sm:$0xff]  }
 0x2da   :  { %4202 = vmatprep.subr.bf16.mxu0 %v4861_v25 }
 0x2db   :  { %2526 = vmatpush1.bf16.msra.mxu1 %v4766_v2 }
 0x2dc   :  { %2527 = vmatprep.subr.bf16.mxu1 %v4771_v27  ;;  %v4823_v27 = vld [vmem:[%s6372_s3 + $0x6c0] ss:$16 sps:$4 sm:$0xff]  }
 0x2df   :  { %2528 = vmatpush1.bf16.msra.mxu1 %v4769_v28  ;;  %v4862_v28 = vld [vmem:[%s6374_s5 + $0xa0] sm:$0xff]  }
 0x2e0   :  { %2529 = vmatprep.subr.bf16.mxu1 %v4774_v29  ;;  %4203 = vmatpush3.bf16.msra.mxu0 %v4862_v28 }
 0x2e1   :  { %v6070_v32 = vpop.f32.mrb[0].mxu1  ;;  %v6072_v35 = vpop.f32.mrb[4].mxu0 }
 0x2e2   :  { %v6074_v37 = vpop.f32.mrb[1].mxu1  ;;  %v6076_v38 = vpop.f32.mrb[5].mxu0 }
 0x2e3   :  { %2530 = vmatpush1.bf16.msra.mxu1 %v4772_v30  ;;  %v1671_v39 = vpop.f32.mrb[2].mxu1  ;;  %v2598_v40 = vpop.f32.mrb[6].mxu0 }
 0x2e4   :  { %v1672_v42 = vpop.f32.mrb[3].mxu1  ;;  %v2599_v43 = vpop.f32.mrb[7].mxu0  ;;  %2531 = vmatprep.subr.bf16.mxu1 %v4777_v31  ;;  %v4828_v31 = vld [vmem:[%s6372_s3 + $0x6e4] ss:$16 sps:$4 sm:$0xff]   ;;  %v4863_v39 = vld [vmem:[%s6374_s5 + $0xe8] sm:$0xff]  }
 0x2e5   :  { %v4826_v40 = vld [vmem:[%s6372_s3 + $0x6e0] ss:$16 sps:$4 sm:$0xff]   ;;  %v4831_v42 = vld [vmem:[%s6372_s3 + $0x704] ss:$16 sps:$4 sm:$0xff]   ;;  %4204 = vmatprep.subr.bf16.mxu0 %v4863_v39 }
 0x2e6   :  { %v4865_v43 = vld [vmem:[%s6374_s5 + $0xf0] sm:$0xff]  }
 0x2e7   :  { %2532 = vmatpush1.bf16.msra.mxu1 %v4775_v41  ;;  %v4864_v41 = vld [vmem:[%s6374_s5 + $0xa8] sm:$0xff]  }
 0x2e8   :  { %2533 = vmatprep.subr.bf16.mxu1 %v4780_v44  ;;  %4205 = vmatpush3.bf16.msra.mxu0 %v4864_v41  ;;  %v4829_v44 = vld [vmem:[%s6372_s3 + $0x700] ss:$16 sps:$4 sm:$0xff]   ;;  %v4883_v41 = vld [vmem:[%s6374_s5 + $0x78] sm:$0xff]  }
 0x2e9   :  { %4206 = vmatprep.subr.bf16.mxu0 %v4865_v43  ;;  %v4884_v43 = vld [vmem:[%s6374_s5 + $0x38] sm:$0xff]  }
 0x2eb   :  { %2534 = vmatpush1.bf16.msra.mxu1 %v4778_v45  ;;  %v4866_v45 = vld [vmem:[%s6374_s5 + $0xb0] sm:$0xff]  }
 0x2ec   :  { %2535 = vmatprep.subr.bf16.mxu1 %v4783_v47  ;;  %v4867_v47 = vld [vmem:[%s6374_s5 + $0xf8] sm:$0xff]   ;;  %4207 = vmatpush3.bf16.msra.mxu0 %v4866_v45 }
 0x2ed   :  { %4208 = vmatprep.subr.bf16.mxu0 %v4867_v47 }
 0x2ef   :  { %2536 = vmatpush1.bf16.msra.mxu1 %v4781_v51  ;;  %v4835_v51 = vld [vmem:[%s6372_s3 + $0x740] ss:$16 sps:$4 sm:$0xff]  }
 0x2f0   :  { %2537 = vmatprep.subr.bf16.mxu1 %v4786_v53  ;;  %4209 = vmatpush3.bf16.msra.mxu0 %v4868_v48  ;;  %v4838_v53 = vld [vmem:[%s6372_s3 + $0x760] ss:$16 sps:$4 sm:$0xff]  }
 0x2f3   :  { %2538 = vmatpush1.bf16.msra.mxu1 %v4784_v56  ;;  %v4846_v56 = vld [vmem:[%s6372_s3 + $0x7a4] ss:$16 sps:$4 sm:$0xff]  }
 0x2f4   :  { %2539 = vmatprep.subr.bf16.mxu1 %v4789_v58  ;;  %v4844_v58 = vld [vmem:[%s6372_s3 + $0x7a0] ss:$16 sps:$4 sm:$0xff]  }
 0x2f7   :  { %2540 = vmatpush1.bf16.msra.mxu1 %v4787_v59  ;;  %v4849_v59 = vld [vmem:[%s6372_s3 + $0x7c4] ss:$16 sps:$4 sm:$0xff]  }
 0x2f8   :  { %2541 = vmatprep.subr.bf16.mxu1 %v4792_v60  ;;  %v4847_v60 = vld [vmem:[%s6372_s3 + $0x7c0] ss:$16 sps:$4 sm:$0xff]  }
 0x2fb   :  { %2542 = vmatpush1.bf16.msra.mxu1 %v4790_v61  ;;  %v4852_v61 = vld [vmem:[%s6372_s3 + $0x7e4] ss:$16 sps:$4 sm:$0xff]  }
 0x2fc   :  { %2543 = vmatprep.subr.bf16.mxu1 %v4795_v62  ;;  %v4850_v62 = vld [vmem:[%s6372_s3 + $0x7e0] ss:$16 sps:$4 sm:$0xff]  }
 0x2ff   :  { %2544 = vmatpush1.bf16.msra.mxu1 %v4793_v63 }
 0x300   :  { %2545 = vmatprep.subr.bf16.mxu1 %v4798_v0 }
 0x303   :  { %2546 = vmatpush1.bf16.msra.mxu1 %v4796_v3 }
 0x304   :  { %2547 = vmatprep.subr.bf16.mxu1 %v4801_v5 }
 0x307   :  { %2548 = vmatpush1.bf16.msra.mxu1 %v4799_v6 }
 0x308   :  { %2549 = vmatprep.subr.bf16.mxu1 %v4804_v8 }
 0x30b   :  { %2550 = vmatpush1.bf16.msra.mxu1 %v4802_v9  ;;  %v4869_v9 = vld [vmem:[%s6374_s5 + $0x40] sm:$0xff]  }
 0x30c   :  { %3000 = vmatprep.subr.bf16.mxu1 %v4807_v10  ;;  %v4870_v10 = vld [vmem:[%s6374_s5] sm:$0xff]  }
 0x30e   :  { %2552 = vmatmul.mubr.bf16.vlgmr.msra.gmra.mrb[16].mxu1 %v5623_v1  ;;  %v4816_v1 = vld [vmem:[%s6372_s3 + $0x664] ss:$16 sps:$4 sm:$0xff]  }
 0x30f   :  { %3001 = vmatpush1.bf16.msra.mxu1 %v4805_v11  ;;  %3032 = vmatprep.mubr.bf16.mxu1 %v5641_v7  ;;  %v4814_v7 = vld [vmem:[%s6372_s3 + $0x660] ss:$16 sps:$4 sm:$0xff]  }
 0x310   :  { %3002 = vmatprep.subr.bf16.mxu1 %v4810_v12  ;;  %v4874_v11 = vld [vmem:[%s6374_s5 + $0x10] sm:$0xff]   ;;  %v4875_v12 = vld [vmem:[%s6374_s5 + $0x58] sm:$0xff]  }
 0x313   :  { %3003 = vmatpush1.bf16.msra.mxu1 %v4808_v13  ;;  %v4876_v13 = vld [vmem:[%s6374_s5 + $0x18] sm:$0xff]  }
 0x314   :  { %3004 = vmatprep.subr.bf16.mxu1 %v4813_v57  ;;  %v4877_v57 = vld [vmem:[%s6374_s5 + $0x60] sm:$0xff]  }
 0x317   :  { %3005 = vmatpush1.bf16.msra.mxu1 %v4811_v15  ;;  %v4878_v15 = vld [vmem:[%s6374_s5 + $0x20] sm:$0xff]  }
 0x318   :  { %3006 = vmatprep.subr.bf16.mxu1 %v4816_v1  ;;  %v3098_v1 = vsub.s32 2, %v5598_v33 }
 0x31b   :  { %3007 = vmatpush1.bf16.msra.mxu1 %v4814_v7 }
 0x31c   :  { %3008 = vmatprep.subr.bf16.mxu1 %v4819_v16  ;;  %v3086_v16 = vld [vmem:[%s6375_s4] ss:$2 sm:$0xf] }
 0x31f   :  { %3009 = vmatpush1.bf16.msra.mxu1 %v4817_v17  ;;  %v3102_v17 = vsub.s32 3, %v5598_v33 }
 0x320   :  { %3010 = vmatprep.subr.bf16.mxu1 %v4822_v18 }
 0x321   :  { %v6200_v21 = vpop.f32.mrb[4].mxu1  ;;  %v6202_v22 = vpop.f32.mrb[8].mxu0 }
 0x322   :  { %v6204_v23 = vpop.f32.mrb[5].mxu1  ;;  %v6206_v24 = vpop.f32.mrb[9].mxu0 }
 0x323   :  { %v1712_v26 = vpop.f32.mrb[6].mxu1  ;;  %3011 = vmatpush1.bf16.msra.mxu1 %v4820_v4  ;;  %v3079_v2 = vpop.f32.mrb[10].mxu0 }
 0x324   :  { %v1713_v29 = vpop.f32.mrb[7].mxu1  ;;  %v3080_v30 = vpop.f32.mrb[11].mxu0  ;;  %3012 = vmatprep.subr.bf16.mxu1 %v4825_v20  ;;  %v4880_v26 = vld [vmem:[%s6374_s5 + $0x28] sm:$0xff]  }
 0x327   :  { %3013 = vmatpush1.bf16.msra.mxu1 %v4823_v27  ;;  %v3099_v27 = vrot.slane %v3086_v16, %v3098_v1 }
 0x328   :  { %3014 = vmatprep.subr.bf16.mxu1 %v4828_v31  ;;  %v4137_v31 = vld [vmem:[%s6375_s4 + $0x1] ss:$2 sm:$0xf] }
 0x32b   :  { %3015 = vmatpush1.bf16.msra.mxu1 %v4826_v40 }
 0x32c   :  { %3016 = vmatprep.subr.bf16.mxu1 %v4831_v42 }
 0x32f   :  { %3017 = vmatpush1.bf16.msra.mxu1 %v4829_v44 }
 0x330   :  { %3018 = vmatprep.subr.bf16.mxu1 %v4834_v46 }
 0x333   :  { %3019 = vmatpush1.bf16.msra.mxu1 %v4832_v49 }
 0x334   :  { %3020 = vmatprep.subr.bf16.mxu1 %v4837_v50 }
 0x337   :  { %3021 = vmatpush1.bf16.msra.mxu1 %v4835_v51 }
 0x338   :  { %3022 = vmatprep.subr.bf16.mxu1 %v4840_v52 }
 0x33b   :  { %3023 = vmatpush1.bf16.msra.mxu1 %v4838_v53 }
 0x33c   :  { %3024 = vmatprep.subr.bf16.mxu1 %v4843_v54 }
 0x33f   :  { %3025 = vmatpush1.bf16.msra.mxu1 %v4841_v55 }
 0x340   :  { %3026 = vmatprep.subr.bf16.mxu1 %v4846_v56  ;;  %v3091_v56 = vrot.slane %v3086_v16, %v5601_v34 }
 0x343   :  { %3027 = vmatpush1.bf16.msra.mxu1 %v4844_v58 }
 0x344   :  { %3028 = vmatprep.subr.bf16.mxu1 %v4849_v59  ;;  %v3095_v59 = vrot.slane %v3086_v16, %v5607_v36 }
 0x347   :  { %3029 = vmatpush1.bf16.msra.mxu1 %v4847_v60 }
 0x348   :  { %3030 = vmatprep.subr.bf16.mxu1 %v4852_v61 }
 0x34b   :  { %3031 = vmatpush1.bf16.msra.mxu1 %v4850_v62 }
 0x34c   :  { %4172 = vmatprep.subr.bf16.mxu1 %v4869_v9 }
 0x34e   :  { %3033 = vmatmul.mubr.bf16.vlgmr.msra.gmra.mrb[20].mxu1 %v5828_v14  ;;  %v4871_v14 = vld [vmem:[%s6374_s5 + $0x48] sm:$0xff]  }
 0x34f   :  { %4173 = vmatpush3.bf16.msra.mxu1 %v4870_v10 }
 0x350   :  { %4174 = vmatprep.subr.bf16.mxu1 %v4871_v14 }
 0x361   :  { %v2076_v63 = vpop.f32.mrb[8].mxu1 }
 0x362   :  { %v6291_v0 = vadd.f32 %v2076_v63, %v6070_v32  ;;  %v2078_v3 = vpop.f32.mrb[9].mxu1  ;;  %v4872_v32 = vld [vmem:[%s6374_s5 + $0x8] sm:$0xff]  }
 0x363   :  { %v6294_v5 = vadd.f32 %v2078_v3, %v6074_v37  ;;  %v2080_v6 = vpop.f32.mrb[10].mxu1  ;;  %v4873_v37 = vld [vmem:[%s6374_s5 + $0x50] sm:$0xff]   ;;  %4175 = vmatpush3.bf16.msra.mxu1 %v4872_v32 }
 0x364   :  { %v2081_v8 = vpop.f32.mrb[11].mxu1  ;;  %4176 = vmatprep.subr.bf16.mxu1 %v4873_v37 }
 0x367   :  { %4177 = vmatpush3.bf16.msra.mxu1 %v4874_v11 }
 0x368   :  { %4178 = vmatprep.subr.bf16.mxu1 %v4875_v12 }
 0x36b   :  { %4179 = vmatpush3.bf16.msra.mxu1 %v4876_v13 }
 0x36c   :  { %4180 = vmatprep.subr.bf16.mxu1 %v4877_v57 }
 0x36f   :  { %4181 = vmatpush3.bf16.msra.mxu1 %v4878_v15 }
 0x370   :  { %4182 = vmatprep.subr.bf16.mxu1 %v4879_v19 }
 0x373   :  { %4183 = vmatpush3.bf16.msra.mxu1 %v4880_v26 }
 0x3a1   :  { %v2117_v7 = vpop.f32.mrb[12].mxu1 }
 0x3a2   :  { %v2118_v18 = vadd.f32 %v2117_v7, %v6200_v21  ;;  %v2119_v4 = vpop.f32.mrb[13].mxu1  ;;  %v3103_v21 = vrot.slane %v3086_v16, %v3102_v17 }
 0x3a3   :  { %v2120_v20 = vadd.f32 %v2119_v4, %v6204_v23  ;;  %v2121_v25 = vpop.f32.mrb[14].mxu1  ;;  %v4881_v23 = vld [vmem:[%s6374_s5 + $0x70] sm:$0xff]  }
 0x3a4   :  { %v2603_v2 = vadd.f32 %v6072_v35, %v2118_v18  ;;  %v2122_v28 = vpop.f32.mrb[15].mxu1  ;;  %v4882_v35 = vld [vmem:[%s6374_s5 + $0x30] sm:$0xff]   ;;  %4184 = vmatprep.subr.bf16.mxu1 %v4881_v23 }
 0x3a5   :  { %v2604_v33 = vadd.f32 %v6076_v38, %v2120_v20  ;;  %4185 = vmatpush3.bf16.msra.mxu1 %v4882_v35 }
 0x3a6   :  { %v3084_v29 = vadd.f32 %v6202_v22, %v2603_v2  ;;  %v3134_v22 = vrot.slane %v4137_v31, %v3098_v1  ;;  %4186 = vmatprep.subr.bf16.mxu1 %v4883_v41 }
 0x3a7   :  { %v3085_v30 = vadd.f32 %v6206_v24, %v2604_v33  ;;  %v3138_v24 = vrot.slane %v4137_v31, %v3102_v17 }
 0x3a8   :  { %v3110_v39 = vadd.f32 %v3099_v27, %v3084_v29 }
 0x3a9   :  { %v3111_v38 = vadd.f32 %v3103_v21, %v3085_v30  ;;  %4187 = vmatpush3.bf16.msra.mxu1 %v4884_v43 }
 0x3aa   :  { %v3114_v40 = vmul.f32 0.2, %v3110_v39 }
 0x3ab   :  { %v3115_v42 = vmul.f32 0.2, %v3111_v38 }
 0x3ac   :  { %v3118_v44 = vmax.f32 %v3110_v39, %v3114_v40 }
 0x3ad   :  { %v3119_v45 = vmax.f32 %v3111_v38, %v3115_v42 }
 0x3ae   :  { %v3145_v46 = vadd.f32 %v3134_v22, %v3118_v44 }
 0x3af   :  { %v3146_v47 = vadd.f32 %v3138_v24, %v3119_v45 }
 0x3b0   :  { %v3149_v49 = vpack.c.bf16 %v3145_v46, %v3145_v46 }
 0x3b1   :  { %v3150_v48 = vpack.c.bf16 %v3146_v47, %v3146_v47 }
 0x3b3   :  { %3486 = vmatprep.mubr.bf16.mxu0 %v3150_v48 }
 0x3b4   :  { %3487 = vmatmul.mubr.bf16.vlgmr.msra.gmra.mrb[12].mxu0 %v3149_v49 }
 0x3e1   :  { %v2553_v50 = vpop.f32.mrb[16].mxu1 }
 0x3e2   :  { %v2601_v51 = vadd.f32 %v2553_v50, %v6291_v0  ;;  %v2555_v52 = vpop.f32.mrb[17].mxu1  ;;  %v3126_v0 = vrot.slane %v4137_v31, %v5601_v34  ;;  %v4138_v34 = vld [vmem:[%s6376_s6] ss:$0 sm:$0xff] }
 0x3e3   :  { %v2602_v53 = vadd.f32 %v2555_v52, %v6294_v5  ;;  %v2557_v54 = vpop.f32.mrb[18].mxu1  ;;  %v3130_v5 = vrot.slane %v4137_v31, %v5607_v36 }
 0x3e4   :  { %v2558_v55 = vpop.f32.mrb[19].mxu1 }
 0x421   :  { %v3034_v58 = vpop.f32.mrb[20].mxu1 }
 0x422   :  { %v3082_v60 = vadd.f32 %v3034_v58, %v2601_v51  ;;  %v3036_v61 = vpop.f32.mrb[21].mxu1 }
 0x423   :  { %v3083_v62 = vadd.f32 %v3036_v61, %v2602_v53  ;;  %v3038_v63 = vpop.f32.mrb[22].mxu1 }
 0x424   :  { %v3108_v3 = vadd.f32 %v3091_v56, %v3082_v60  ;;  %v3039_v6 = vpop.f32.mrb[23].mxu1 }
 0x425   :  { %v3109_v8 = vadd.f32 %v3095_v59, %v3083_v62 }
 0x426   :  { %v3112_v9 = vmul.f32 0.2, %v3108_v3 }
 0x427   :  { %v3113_v10 = vmul.f32 0.2, %v3109_v8 }
 0x428   :  { %v3116_v14 = vmax.f32 %v3108_v3, %v3112_v9 }
 0x429   :  { %v3117_v32 = vmax.f32 %v3109_v8, %v3113_v10 }
 0x42a   :  { %v3143_v37 = vadd.f32 %v3126_v0, %v3116_v14 }
 0x42b   :  { %v3144_v11 = vadd.f32 %v3130_v5, %v3117_v32 }
 0x42c   :  { %v3147_v13 = vpack.c.bf16 %v3143_v37, %v3143_v37 }
 0x42d   :  { %v3148_v12 = vpack.c.bf16 %v3144_v11, %v3144_v11 }
 0x42f   :  { %3446 = vmatprep.mubr.bf16.mxu1 %v3148_v12 }
 0x430   :  { %3447 = vmatmul.mubr.bf16.vlgmr.msra.gmra.mrb[24].mxu1 %v3147_v13 }
 0x487   :  { %v4210_v57 = vpop.f32.mrb[12].mxu0 }
 0x488   :  { %v4211_v15 = vpop.f32.mrb[13].mxu0 }
 0x489   :  { %v4212_v1 = vadd.f32 %v4211_v15, %v4210_v57  ;;  %v4213_v7 = vpop.f32.mrb[14].mxu0 }
 0x48a   :  { %v4214_v16 = vpop.f32.mrb[15].mxu0 }
 0x503   :  { %v4188_v17 = vpop.f32.mrb[24].mxu1 }
 0x504   :  { %v4189_v18 = vpop.f32.mrb[25].mxu1 }
 0x505   :  { %v4190_v36 = vadd.f32 %v4189_v18, %v4188_v17  ;;  %v4191_v4 = vpop.f32.mrb[26].mxu1 }
 0x506   :  { %v4192_v19 = vpop.f32.mrb[27].mxu1 }
 0x507   :  { %v3449_v20 = vadd.f32 %v4190_v36, %v4138_v34 }
 0x509   :  { %v3489_v25 = vadd.f32 %v4212_v1, %v3449_v20 }
 0x50b   :  { %v3501_v26 = vsel %vm3500_vm0, %v3489_v25, -inf  ;;  %v3494_v23 = vsub.f32 0.0, %v3489_v25 }
 0x50c   :  { %3502 = vmax.xlane.f32.xlu0 %v3501_v26 }
 0x50d   :  { %v3495_v30 = vmul.f32 1.442695, %v3494_v23 }
 0x599   :  { %v3503_v2 = vpop.xlane.xlu0 %3502 }
 0x59a   :  { %v3504_v27 = vsub.f32 %v3489_v25, %v3503_v2 }
 0x59c   :  { %v3505_v28 = vmul.f32 1.442695, %v3504_v27 }
 0x59e   :  { %4885 = vpow2.f32 %v3505_v28 }
 0x59f   :  { %4887 = vpow2.f32 %v3495_v30 }
 0x5a8   :  { %v4886_v33 = vpop.eup %4885 }
 0x5a9   :  { %3508 = vrot.lane.b32.xlu0 %v4886_v33, %s4894_s16  ;;  %v4888_v31 = vpop.eup %4887 }
 0x5aa   :  { %v3497_v35 = vadd.f32 1.0, %v4888_v31 }
 0x61b   :  { %v3509_v21 = vpop.permute.xlu0 %3508 }
 0x61c   :  { %v3512_v29 = vsel %vm3511_vm1, %v3509_v21, 0.0 }
 0x61d   :  { %3513 = vadd.xlane.f32.xlu1 %v3512_v29 }
 0x6aa   :  { %v3514_v39 = vpop.xlane.xlu1 %3513 }
 0x6ab   :  { %4889 = vrcp.f32 %v3514_v39 }
 0x6ac   :  { %4891 = vrcp.f32 %v3497_v35 }
 0x6b5   :  { %v4890_v38 = vpop.eup %4889 }
 0x6b6   :  { %v3516_v40 = vmul.f32 %v4890_v38, %v4886_v33  ;;  %v4892_v22 = vpop.eup %4891 }
 0x6b8   :  { %v3518_v41 = vsel %vm3517_vm2, %v4892_v22, %v3516_v40 }
 0x6b9   :  { %v3520_v42 = vsel %vm3519_vm3, %v3518_v41, 0.0 }
 0x6ba   :  { %3521 = vst [vmem:[%s6377_s7] sm:$0x3] %v3520_v42 }

</bundles_post_ra>
